<compile_context>
chip_gen: v7x
topology: tpu7x:2x2x1
jax: 0.10.0
libtpu: 0.0.40
codegen_flags: <defaults>
</compile_context>

<pallas_src>
import jax
import jax.numpy as jnp
from jax import lax
from jax.experimental import pallas as pl
from jax.experimental.pallas import tpu as pltpu


_SQRT_HALF = 0.7071067811865476


def _gelu_exact(x):
    # Plain-JAX reference: torch nn.GELU() default: 0.5*x*(1+erf(x/sqrt(2))).
    return 0.5 * x * (1.0 + lax.erf(x * _SQRT_HALF))


def _gelu_kernel(x):
    # In-kernel exact-erf GELU; erf via Abramowitz & Stegun 7.1.26
    # (|error| <= 1.5e-7, negligible vs. bf16 quantization noise).
    ax = jnp.abs(x) * _SQRT_HALF
    t = 1.0 / (1.0 + 0.3275911 * ax)
    poly = t * (0.254829592 + t * (-0.284496736 + t * (1.421413741
               + t * (-1.453152027 + t * 1.061405429))))
    erf_ax = 1.0 - poly * jnp.exp(-(ax * ax))
    erf_x = jnp.where(x >= 0.0, erf_ax, -erf_ax)
    return 0.5 * x * (1.0 + erf_x)


def _head_kernel(x_ref, w1_ref, b1_ref, w2_ref, b2_ref, w3_ref, b3_ref,
                 wl_ref, o_ref, z_sc):
    # Grid = (batch tiles [parallel], out_dim tiles [arbitrary]).
    # The MLP + L2-normalize only depends on the batch tile, so it is computed
    # once per batch tile (at out-tile j == 0) into a bf16 VMEM scratch and
    # reused by every out tile of that batch tile.
    # NOTE: this is only correct because axis 1 is 'arbitrary' (sequential on
    # one core) and scratch is per-core; do NOT mark axis 1 'parallel'.
    @pl.when(pl.program_id(1) == 0)
    def _():
        x = x_ref[...]                                            # bf16 tile
        h = jnp.dot(x, w1_ref[...], preferred_element_type=jnp.float32)
        h = _gelu_kernel(h + b1_ref[...])                         # f32
        h = jnp.dot(h.astype(w2_ref.dtype), w2_ref[...],
                    preferred_element_type=jnp.float32)
        h = _gelu_kernel(h + b2_ref[...])
        z = jnp.dot(h.astype(w3_ref.dtype), w3_ref[...],
                    preferred_element_type=jnp.float32) + b3_ref[...]
        # z / max(||z||, 1e-12) == z * rsqrt(max(||z||^2, 1e-24)); normalize
        # in f32, cast to bf16 exactly once per batch tile.
        ssq = jnp.sum(z * z, axis=-1, keepdims=True)
        z_sc[...] = (z * lax.rsqrt(jnp.maximum(ssq, 1e-24))).astype(z_sc.dtype)

    # Weight-normalized last layer (column normalization folded in the
    # wrapper): one K=bottleneck bf16 matmul per (batch tile, out tile).
    o_ref[...] = jnp.dot(z_sc[...], wl_ref[...],
                         preferred_element_type=jnp.float32).astype(o_ref.dtype)


def _vmem_limit_bytes():
    # Generation-aware headroom: ~48 MiB on v7x (64 MiB physical per TC),
    # ~96 MiB on v5e/v6e (128 MiB physical).
    try:
        cap = int(pltpu.get_tpu_info().vmem_capacity_bytes)
    except Exception:
        cap = 64 * 1024 * 1024          # conservative fallback
    return (cap * 3) // 4


def _pick_block_n(out_dim_p):
    # out_dim_p is a multiple of 128; large lane-dense tiles amortize the
    # ~0.35us per-grid-step overhead and keep W_last / out DMAs big.
    for bn in (2048, 1024, 512, 256, 128):
        if out_dim_p % bn == 0:
            return bn
    return out_dim_p


def localizability_head(x, params, *, block_m=256, block_n=None,
                        weight_dtype=jnp.bfloat16):
    """x: (B, in_dim) float32.  params hold weights TRANSPOSED vs. torch,
    i.e. (fan_in, fan_out); biases and weight-norm gain g are (1, fan_out)."""
    B, in_dim = x.shape
    w1, b1 = params["w1"], params["b1"]
    w2, b2 = params["w2"], params["b2"]
    w3, b3 = params["w3"], params["b3"]
    v, g = params["v"], params["g"]
    hidden = w1.shape[1]
    bottleneck = w3.shape[1]
    out_dim = v.shape[1]

    # ---- hoist weight_norm (dim=0) out of the kernel (loop-invariant) ----
    v32 = v.astype(jnp.float32)
    col_inv = lax.rsqrt(jnp.sum(v32 * v32, axis=0, keepdims=True))
    w_last = v32 * (g.astype(jnp.float32) * col_inv)              # (bneck, out)

    # ---- cast matmul operands once (bf16 MXU path, f32 accumulation) ----
    xq = x.astype(weight_dtype)
    w1q, w2q, w3q = (w.astype(weight_dtype) for w in (w1, w2, w3))
    wlq = w_last.astype(weight_dtype)
    b1f, b2f, b3f = (b.astype(jnp.float32) for b in (b1, b2, b3))

    # ---- batch tiling: keep >= 2 tiles when B permits (v7x megacore),
    #      pad batch to a multiple of block_m ----
    while block_m > 128 and -(-B // block_m) < 2:
        block_m //= 2
    m_tiles = -(-B // block_m)
    Bp = m_tiles * block_m
    if Bp != B:
        xq = jnp.pad(xq, ((0, Bp - B), (0, 0)))

    # ---- out_dim tiling: pad to a multiple of 128 (unmasked lane-dense
    #      stores), then pick a large block_n ----
    out_dim_p = -(-out_dim // 128) * 128
    if out_dim_p != out_dim:
        wlq = jnp.pad(wlq, ((0, 0), (0, out_dim_p - out_dim)))
    if block_n is None:
        block_n = _pick_block_n(out_dim_p)
    assert out_dim_p % block_n == 0
    n_tiles = out_dim_p // block_n

    def build_call(use_pipeline_mode):
        def spec(shape, index_map, nbuf=None):
            if use_pipeline_mode and nbuf is not None:
                return pl.BlockSpec(shape, index_map,
                                    pipeline_mode=pl.Buffered(nbuf))
            return pl.BlockSpec(shape, index_map)

        # Grid-invariant weights/biases: single-buffered (their block index is
        # constant -> no re-DMA; frees VMEM for larger x/W_last/out tiles).
        inv = lambda shape: spec(shape, lambda i, j: (0, 0), nbuf=1)
        # W_last: deeper pipeline so the HBM stream stays ahead of the small
        # K=bottleneck inner matmul.
        wl_spec = spec((bottleneck, block_n), lambda i, j: (0, j),
                       nbuf=3 if n_tiles >= 3 else 2)

        return pl.pallas_call(
            _head_kernel,
            out_shape=jax.ShapeDtypeStruct((Bp, out_dim_p), jnp.float32),
            grid_spec=pltpu.PrefetchScalarGridSpec(
                num_scalar_prefetch=0,
                grid=(m_tiles, n_tiles),
                in_specs=[
                    pl.BlockSpec((block_m, in_dim), lambda i, j: (i, 0)),  # x
                    inv((in_dim, hidden)), inv((1, hidden)),          # W1, b1
                    inv((hidden, hidden)), inv((1, hidden)),          # W2, b2
                    inv((hidden, bottleneck)), inv((1, bottleneck)),  # W3, b3
                    wl_spec,                                          # W_last
                ],
                out_specs=pl.BlockSpec((block_m, block_n),
                                       lambda i, j: (i, j)),
                scratch_shapes=[pltpu.VMEM((block_m, bottleneck),
                                           weight_dtype)],
            ),
            compiler_params=pltpu.CompilerParams(
                dimension_semantics=("parallel", "arbitrary"),
                vmem_limit_bytes=_vmem_limit_bytes()),
        )

    args = (xq, w1q, b1f, w2q, b2f, w3q, b3f, wlq)
    try:
        out = build_call(True)(*args)
    except Exception:
        # Fallback for jax versions without per-BlockSpec pipeline_mode.
        out = build_call(False)(*args)

    if Bp != B or out_dim_p != out_dim:
        out = out[:B, :out_dim]
    return out


def init_params(key, in_dim, out_dim, hidden_dim, bottleneck_dim):
    """Deterministic synthetic init (trunc_normal std=0.02 -> normal*0.02;
    biases zero; weight_norm gain g = 1 as in the module)."""
    k1, k2, k3, k4 = jax.random.split(key, 4)
    std = 0.02
    return {
        "w1": jax.random.normal(k1, (in_dim, hidden_dim), jnp.float32) * std,
        "b1": jnp.zeros((1, hidden_dim), jnp.float32),
        "w2": jax.random.normal(k2, (hidden_dim, hidden_dim), jnp.float32) * std,
        "b2": jnp.zeros((1, hidden_dim), jnp.float32),
        "w3": jax.random.normal(k3, (hidden_dim, bottleneck_dim), jnp.float32) * std,
        "b3": jnp.zeros((1, bottleneck_dim), jnp.float32),
        # last_layer keeps torch's default Linear init (module's apply() runs
        # before the weight_norm wrapping); deterministic random is fine here.
        "v": jax.random.normal(k4, (bottleneck_dim, out_dim), jnp.float32) * 0.1,
        "g": jnp.ones((1, out_dim), jnp.float32),   # weight_g filled with 1
    }


def _reference_bf16(x, p, weight_dtype=jnp.bfloat16):
    """Mirrors the kernel's precision scheme (bf16 operands, f32 accumulation)."""
    f32 = jnp.float32
    w1, w2, w3 = (p[k].astype(weight_dtype) for k in ("w1", "w2", "w3"))
    h = jnp.dot(x.astype(weight_dtype), w1, preferred_element_type=f32) + p["b1"]
    h = _gelu_exact(h)
    h = jnp.dot(h.astype(weight_dtype), w2, preferred_element_type=f32) + p["b2"]
    h = _gelu_exact(h)
    z = jnp.dot(h.astype(weight_dtype), w3, preferred_element_type=f32) + p["b3"]
    z = z * lax.rsqrt(jnp.maximum(jnp.sum(z * z, -1, keepdims=True), 1e-24))
    v = p["v"]
    wl = (v * (p["g"] * lax.rsqrt(jnp.sum(v * v, 0, keepdims=True)))).astype(weight_dtype)
    return jnp.dot(z.astype(weight_dtype), wl, preferred_element_type=f32)


def _reference_f32(x, p):
    h = jax.nn.gelu(x @ p["w1"] + p["b1"], approximate=False)
    h = jax.nn.gelu(h @ p["w2"] + p["b2"], approximate=False)
    z = h @ p["w3"] + p["b3"]
    z = z / jnp.maximum(jnp.linalg.norm(z, axis=-1, keepdims=True), 1e-12)
    w = p["v"] * (p["g"] / jnp.linalg.norm(p["v"], axis=0, keepdims=True))
    return z @ w


def _check(B, in_dim, hidden, bottleneck, out_dim, key):
    kx, kp = jax.random.split(key)
    x = jax.random.normal(kx, (B, in_dim), jnp.float32)
    params = init_params(kp, in_dim, out_dim, hidden, bottleneck)

    y = jax.block_until_ready(localizability_head(x, params))
    assert y.shape == (B, out_dim)

    y_ref = _reference_bf16(x, params)
    assert jnp.allclose(y, y_ref, atol=5e-3, rtol=5e-3), \
        "mismatch vs bf16/f32-accum JAX reference"

    y_f32 = _reference_f32(x, params)
    assert jnp.allclose(y, y_f32, atol=3e-2, rtol=3e-2), \
        "mismatch vs full-f32 JAX reference"


if __name__ == "__main__":
    root = jax.random.PRNGKey(0)
    k1, k2 = jax.random.split(root)
    # Ragged batch (200 -> block_m auto-drops to 128, 2 batch tiles) +
    # lane-aligned out_dim tiling (3 tiles of 128, exercises Buffered(3)).
    _check(200, 128, 256, 128, 384, k1)
    # Non-128-multiple out_dim (200 -> padded to 256, sliced back) + small
    # batch (single padded tile).
    _check(64, 128, 256, 128, 200, k2)
    print("KERNEL_OK")
</pallas_src>

<mosaic_0001>
module attributes {stable_mosaic.version = 11 : i64} {
  func.func @_head_kernel(%arg0: i32, %arg1: i32, %arg2: memref<128x128xbf16, #tpu.memory_space<vmem>>, %arg3: memref<128x256xbf16, #tpu.memory_space<vmem>>, %arg4: memref<1x256xf32, #tpu.memory_space<vmem>>, %arg5: memref<256x256xbf16, #tpu.memory_space<vmem>>, %arg6: memref<1x256xf32, #tpu.memory_space<vmem>>, %arg7: memref<256x128xbf16, #tpu.memory_space<vmem>>, %arg8: memref<1x128xf32, #tpu.memory_space<vmem>>, %arg9: memref<128x128xbf16, #tpu.memory_space<vmem>>, %arg10: memref<128x128xf32, #tpu.memory_space<vmem>>, %arg11: memref<128x128xbf16, #tpu.memory_space<vmem>>) attributes {dimension_semantics = [#tpu.dimension_semantics<parallel>, #tpu.dimension_semantics<arbitrary>], iteration_bounds = array<i64: 2, 3>, scalar_prefetch = 0 : i64, scratch_operands = 1 : i64, tpu.core_type = #tpu.core_type<tc>, window_params = [{transform_indices = @transform_0, window_bounds = array<i64: 128, 128>}, {pipeline_mode = #tpu.pipeline_mode<synchronous>, transform_indices = @transform_1, window_bounds = array<i64: 128, 256>}, {pipeline_mode = #tpu.pipeline_mode<synchronous>, transform_indices = @transform_2, window_bounds = array<i64: 1, 256>}, {pipeline_mode = #tpu.pipeline_mode<synchronous>, transform_indices = @transform_3, window_bounds = array<i64: 256, 256>}, {pipeline_mode = #tpu.pipeline_mode<synchronous>, transform_indices = @transform_4, window_bounds = array<i64: 1, 256>}, {pipeline_mode = #tpu.pipeline_mode<synchronous>, transform_indices = @transform_5, window_bounds = array<i64: 256, 128>}, {pipeline_mode = #tpu.pipeline_mode<synchronous>, transform_indices = @transform_6, window_bounds = array<i64: 1, 128>}, {transform_indices = @transform_7, window_bounds = array<i64: 128, 128>}, {transform_indices = @transform_8, window_bounds = array<i64: 128, 128>}]} {
    %c0_i32 = arith.constant 0 : i32
    %0 = arith.cmpi eq, %arg1, %c0_i32 : i32
    %1 = arith.extui %0 : i1 to i32
    %c0_i32_0 = arith.constant 0 : i32
    %2 = arith.cmpi ne, %1, %c0_i32_0 : i32
    scf.if %2 {
      %c0_6 = arith.constant 0 : index
      %c0_7 = arith.constant 0 : index
      %7 = vector.load %arg2[%c0_6, %c0_7] : memref<128x128xbf16, #tpu.memory_space<vmem>>, vector<128x128xbf16>
      %c0_8 = arith.constant 0 : index
      %c0_9 = arith.constant 0 : index
      %8 = vector.load %arg3[%c0_8, %c0_9] : memref<128x256xbf16, #tpu.memory_space<vmem>>, vector<128x256xbf16>
      %cst_10 = arith.constant dense<0.000000e+00> : vector<128x256xf32>
      %9 = tpu.matmul %7, %8, %cst_10 {dimension_numbers = #tpu.dot_dimension_numbers<[1], [0], [0], [1], [0, 0, 1, 1], [], []>} : vector<128x128xbf16>, vector<128x256xbf16>, vector<128x256xf32> -> vector<128x256xf32>
      %c0_11 = arith.constant 0 : index
      %c0_12 = arith.constant 0 : index
      %10 = vector.load %arg4[%c0_11, %c0_12] : memref<1x256xf32, #tpu.memory_space<vmem>>, vector<1x256xf32>
      %11 = vector.broadcast %10 : vector<1x256xf32> to vector<128x256xf32>
      %12 = arith.addf %9, %11 : vector<128x256xf32>
      %13 = math.absf %12 : vector<128x256xf32>
      %cst_13 = arith.constant 0.707106769 : f32
      %14 = vector.broadcast %cst_13 : f32 to vector<128x256xf32>
      %15 = arith.mulf %13, %14 : vector<128x256xf32>
      %cst_14 = arith.constant 0.327591091 : f32
      %16 = vector.broadcast %cst_14 : f32 to vector<128x256xf32>
      %17 = arith.mulf %16, %15 : vector<128x256xf32>
      %cst_15 = arith.constant 1.000000e+00 : f32
      %18 = vector.broadcast %cst_15 : f32 to vector<128x256xf32>
      %19 = arith.addf %18, %17 : vector<128x256xf32>
      %cst_16 = arith.constant 1.000000e+00 : f32
      %20 = vector.broadcast %cst_16 : f32 to vector<128x256xf32>
      %21 = arith.divf %20, %19 : vector<128x256xf32>
      %cst_17 = arith.constant 1.06140542 : f32
      %22 = vector.broadcast %cst_17 : f32 to vector<128x256xf32>
      %23 = arith.mulf %21, %22 : vector<128x256xf32>
      %cst_18 = arith.constant -1.45315206 : f32
      %24 = vector.broadcast %cst_18 : f32 to vector<128x256xf32>
      %25 = arith.addf %24, %23 : vector<128x256xf32>
      %26 = arith.mulf %21, %25 : vector<128x256xf32>
      %cst_19 = arith.constant 1.42141378 : f32
      %27 = vector.broadcast %cst_19 : f32 to vector<128x256xf32>
      %28 = arith.addf %27, %26 : vector<128x256xf32>
      %29 = arith.mulf %21, %28 : vector<128x256xf32>
      %cst_20 = arith.constant -0.284496725 : f32
      %30 = vector.broadcast %cst_20 : f32 to vector<128x256xf32>
      %31 = arith.addf %30, %29 : vector<128x256xf32>
      %32 = arith.mulf %21, %31 : vector<128x256xf32>
      %cst_21 = arith.constant 0.254829586 : f32
      %33 = vector.broadcast %cst_21 : f32 to vector<128x256xf32>
      %34 = arith.addf %33, %32 : vector<128x256xf32>
      %35 = arith.mulf %21, %34 : vector<128x256xf32>
      %36 = arith.mulf %15, %15 : vector<128x256xf32>
      %cst_22 = arith.constant 0.000000e+00 : f32
      %37 = vector.broadcast %cst_22 : f32 to vector<128x256xf32>
      %38 = arith.subf %37, %36 : vector<128x256xf32>
      %39 = math.exp %38 : vector<128x256xf32>
      %40 = arith.mulf %35, %39 : vector<128x256xf32>
      %cst_23 = arith.constant 1.000000e+00 : f32
      %41 = vector.broadcast %cst_23 : f32 to vector<128x256xf32>
      %42 = arith.subf %41, %40 : vector<128x256xf32>
      %cst_24 = arith.constant 0.000000e+00 : f32
      %43 = vector.broadcast %cst_24 : f32 to vector<128x256xf32>
      %44 = arith.cmpf oge, %12, %43 : vector<128x256xf32>
      %cst_25 = arith.constant 0.000000e+00 : f32
      %45 = vector.broadcast %cst_25 : f32 to vector<128x256xf32>
      %46 = arith.subf %45, %42 : vector<128x256xf32>
      %47 = arith.select %44, %42, %46 : vector<128x256xi1>, vector<128x256xf32>
      %cst_26 = arith.constant 5.000000e-01 : f32
      %48 = vector.broadcast %cst_26 : f32 to vector<128x256xf32>
      %49 = arith.mulf %48, %12 : vector<128x256xf32>
      %cst_27 = arith.constant 1.000000e+00 : f32
      %50 = vector.broadcast %cst_27 : f32 to vector<128x256xf32>
      %51 = arith.addf %50, %47 : vector<128x256xf32>
      %52 = arith.mulf %49, %51 : vector<128x256xf32>
      %53 = arith.truncf %52 : vector<128x256xf32> to vector<128x256xbf16>
      %c0_28 = arith.constant 0 : index
      %c0_29 = arith.constant 0 : index
      %54 = vector.load %arg5[%c0_28, %c0_29] : memref<256x256xbf16, #tpu.memory_space<vmem>>, vector<256x256xbf16>
      %cst_30 = arith.constant dense<0.000000e+00> : vector<128x256xf32>
      %55 = tpu.matmul %53, %54, %cst_30 {dimension_numbers = #tpu.dot_dimension_numbers<[1], [0], [0], [1], [0, 0, 1, 1], [], []>} : vector<128x256xbf16>, vector<256x256xbf16>, vector<128x256xf32> -> vector<128x256xf32>
      %c0_31 = arith.constant 0 : index
      %c0_32 = arith.constant 0 : index
      %56 = vector.load %arg6[%c0_31, %c0_32] : memref<1x256xf32, #tpu.memory_space<vmem>>, vector<1x256xf32>
      %57 = vector.broadcast %56 : vector<1x256xf32> to vector<128x256xf32>
      %58 = arith.addf %55, %57 : vector<128x256xf32>
      %59 = math.absf %58 : vector<128x256xf32>
      %cst_33 = arith.constant 0.707106769 : f32
      %60 = vector.broadcast %cst_33 : f32 to vector<128x256xf32>
      %61 = arith.mulf %59, %60 : vector<128x256xf32>
      %cst_34 = arith.constant 0.327591091 : f32
      %62 = vector.broadcast %cst_34 : f32 to vector<128x256xf32>
      %63 = arith.mulf %62, %61 : vector<128x256xf32>
      %cst_35 = arith.constant 1.000000e+00 : f32
      %64 = vector.broadcast %cst_35 : f32 to vector<128x256xf32>
      %65 = arith.addf %64, %63 : vector<128x256xf32>
      %cst_36 = arith.constant 1.000000e+00 : f32
      %66 = vector.broadcast %cst_36 : f32 to vector<128x256xf32>
      %67 = arith.divf %66, %65 : vector<128x256xf32>
      %cst_37 = arith.constant 1.06140542 : f32
      %68 = vector.broadcast %cst_37 : f32 to vector<128x256xf32>
      %69 = arith.mulf %67, %68 : vector<128x256xf32>
      %cst_38 = arith.constant -1.45315206 : f32
      %70 = vector.broadcast %cst_38 : f32 to vector<128x256xf32>
      %71 = arith.addf %70, %69 : vector<128x256xf32>
      %72 = arith.mulf %67, %71 : vector<128x256xf32>
      %cst_39 = arith.constant 1.42141378 : f32
      %73 = vector.broadcast %cst_39 : f32 to vector<128x256xf32>
      %74 = arith.addf %73, %72 : vector<128x256xf32>
      %75 = arith.mulf %67, %74 : vector<128x256xf32>
      %cst_40 = arith.constant -0.284496725 : f32
      %76 = vector.broadcast %cst_40 : f32 to vector<128x256xf32>
      %77 = arith.addf %76, %75 : vector<128x256xf32>
      %78 = arith.mulf %67, %77 : vector<128x256xf32>
      %cst_41 = arith.constant 0.254829586 : f32
      %79 = vector.broadcast %cst_41 : f32 to vector<128x256xf32>
      %80 = arith.addf %79, %78 : vector<128x256xf32>
      %81 = arith.mulf %67, %80 : vector<128x256xf32>
      %82 = arith.mulf %61, %61 : vector<128x256xf32>
      %cst_42 = arith.constant 0.000000e+00 : f32
      %83 = vector.broadcast %cst_42 : f32 to vector<128x256xf32>
      %84 = arith.subf %83, %82 : vector<128x256xf32>
      %85 = math.exp %84 : vector<128x256xf32>
      %86 = arith.mulf %81, %85 : vector<128x256xf32>
      %cst_43 = arith.constant 1.000000e+00 : f32
      %87 = vector.broadcast %cst_43 : f32 to vector<128x256xf32>
      %88 = arith.subf %87, %86 : vector<128x256xf32>
      %cst_44 = arith.constant 0.000000e+00 : f32
      %89 = vector.broadcast %cst_44 : f32 to vector<128x256xf32>
      %90 = arith.cmpf oge, %58, %89 : vector<128x256xf32>
      %cst_45 = arith.constant 0.000000e+00 : f32
      %91 = vector.broadcast %cst_45 : f32 to vector<128x256xf32>
      %92 = arith.subf %91, %88 : vector<128x256xf32>
      %93 = arith.select %90, %88, %92 : vector<128x256xi1>, vector<128x256xf32>
      %cst_46 = arith.constant 5.000000e-01 : f32
      %94 = vector.broadcast %cst_46 : f32 to vector<128x256xf32>
      %95 = arith.mulf %94, %58 : vector<128x256xf32>
      %cst_47 = arith.constant 1.000000e+00 : f32
      %96 = vector.broadcast %cst_47 : f32 to vector<128x256xf32>
      %97 = arith.addf %96, %93 : vector<128x256xf32>
      %98 = arith.mulf %95, %97 : vector<128x256xf32>
      %99 = arith.truncf %98 : vector<128x256xf32> to vector<128x256xbf16>
      %c0_48 = arith.constant 0 : index
      %c0_49 = arith.constant 0 : index
      %100 = vector.load %arg7[%c0_48, %c0_49] : memref<256x128xbf16, #tpu.memory_space<vmem>>, vector<256x128xbf16>
      %cst_50 = arith.constant dense<0.000000e+00> : vector<128x128xf32>
      %101 = tpu.matmul %99, %100, %cst_50 {dimension_numbers = #tpu.dot_dimension_numbers<[1], [0], [0], [1], [0, 0, 1, 1], [], []>} : vector<128x256xbf16>, vector<256x128xbf16>, vector<128x128xf32> -> vector<128x128xf32>
      %c0_51 = arith.constant 0 : index
      %c0_52 = arith.constant 0 : index
      %102 = vector.load %arg8[%c0_51, %c0_52] : memref<1x128xf32, #tpu.memory_space<vmem>>, vector<1x128xf32>
      %103 = vector.broadcast %102 : vector<1x128xf32> to vector<128x128xf32>
      %104 = arith.addf %101, %103 : vector<128x128xf32>
      %105 = arith.mulf %104, %104 : vector<128x128xf32>
      %cst_53 = arith.constant dense<0.000000e+00> : vector<128xf32>
      %106 = vector.multi_reduction <add>, %105, %cst_53 [1] : vector<128x128xf32> to vector<128xf32>
      %107 = vector.shape_cast %106 : vector<128xf32> to vector<128x1xf32>
      %cst_54 = arith.constant 1.000000e-24 : f32
      %108 = vector.broadcast %cst_54 : f32 to vector<128x1xf32>
      %109 = arith.maximumf %107, %108 : vector<128x1xf32>
      %110 = math.rsqrt %109 : vector<128x1xf32>
      %111 = vector.broadcast %110 : vector<128x1xf32> to vector<128x128xf32>
      %112 = arith.mulf %104, %111 : vector<128x128xf32>
      %113 = arith.truncf %112 : vector<128x128xf32> to vector<128x128xbf16>
      %c0_55 = arith.constant 0 : index
      %c0_56 = arith.constant 0 : index
      %114 = vector.load %arg11[%c0_55, %c0_56] : memref<128x128xbf16, #tpu.memory_space<vmem>>, vector<128x128xbf16>
      tpu.vector_store %arg11[%c0_55, %c0_56], %113 {strides = array<i32>} : memref<128x128xbf16, #tpu.memory_space<vmem>>, vector<128x128xbf16>,
    } else {
    }
    %c0 = arith.constant 0 : index
    %c0_1 = arith.constant 0 : index
    %3 = vector.load %arg11[%c0, %c0_1] : memref<128x128xbf16, #tpu.memory_space<vmem>>, vector<128x128xbf16>
    %c0_2 = arith.constant 0 : index
    %c0_3 = arith.constant 0 : index
    %4 = vector.load %arg9[%c0_2, %c0_3] : memref<128x128xbf16, #tpu.memory_space<vmem>>, vector<128x128xbf16>
    %cst = arith.constant dense<0.000000e+00> : vector<128x128xf32>
    %5 = tpu.matmul %3, %4, %cst {dimension_numbers = #tpu.dot_dimension_numbers<[1], [0], [0], [1], [0, 0, 1, 1], [], []>} : vector<128x128xbf16>, vector<128x128xbf16>, vector<128x128xf32> -> vector<128x128xf32>
    %c0_4 = arith.constant 0 : index
    %c0_5 = arith.constant 0 : index
    %6 = vector.load %arg10[%c0_4, %c0_5] : memref<128x128xf32, #tpu.memory_space<vmem>>, vector<128x128xf32>
    tpu.vector_store %arg10[%c0_4, %c0_5], %5 {strides = array<i32>} : memref<128x128xf32, #tpu.memory_space<vmem>>, vector<128x128xf32>,
    return
  }
  func.func @transform_0(%arg0: i32, %arg1: i32) -> (i32, i32) {
    %c0_i32 = arith.constant 0 : i32
    %c0_i32_0 = arith.constant 0 : i32
    return %arg0, %c0_i32 : i32, i32
  }
  func.func @transform_1(%arg0: i32, %arg1: i32) -> (i32, i32) {
    %c0_i32 = arith.constant 0 : i32
    %c0_i32_0 = arith.constant 0 : i32
    %c0_i32_1 = arith.constant 0 : i32
    return %c0_i32, %c0_i32_0 : i32, i32
  }
  func.func @transform_2(%arg0: i32, %arg1: i32) -> (i32, i32) {
    %c0_i32 = arith.constant 0 : i32
    %c0_i32_0 = arith.constant 0 : i32
    %c0_i32_1 = arith.constant 0 : i32
    return %c0_i32, %c0_i32_0 : i32, i32
  }
  func.func @transform_3(%arg0: i32, %arg1: i32) -> (i32, i32) {
    %c0_i32 = arith.constant 0 : i32
    %c0_i32_0 = arith.constant 0 : i32
    %c0_i32_1 = arith.constant 0 : i32
    return %c0_i32, %c0_i32_0 : i32, i32
  }
  func.func @transform_4(%arg0: i32, %arg1: i32) -> (i32, i32) {
    %c0_i32 = arith.constant 0 : i32
    %c0_i32_0 = arith.constant 0 : i32
    %c0_i32_1 = arith.constant 0 : i32
    return %c0_i32, %c0_i32_0 : i32, i32
  }
  func.func @transform_5(%arg0: i32, %arg1: i32) -> (i32, i32) {
    %c0_i32 = arith.constant 0 : i32
    %c0_i32_0 = arith.constant 0 : i32
    %c0_i32_1 = arith.constant 0 : i32
    return %c0_i32, %c0_i32_0 : i32, i32
  }
  func.func @transform_6(%arg0: i32, %arg1: i32) -> (i32, i32) {
    %c0_i32 = arith.constant 0 : i32
    %c0_i32_0 = arith.constant 0 : i32
    %c0_i32_1 = arith.constant 0 : i32
    return %c0_i32, %c0_i32_0 : i32, i32
  }
  func.func @transform_7(%arg0: i32, %arg1: i32) -> (i32, i32) {
    %c0_i32 = arith.constant 0 : i32
    %c0_i32_0 = arith.constant 0 : i32
    return %c0_i32, %arg1 : i32, i32
  }
  func.func @transform_8(%arg0: i32, %arg1: i32) -> (i32, i32) {
    %c0_i32 = arith.constant 0 : i32
    return %arg0, %arg1 : i32, i32
  }
}

</mosaic_0001>

<bundles_post_ra>
// kernel: tpu_custom_call.1
= control target key start
LH: loop header
LB: loop body
LE: loop exit
PB: predicated region body
PF: predicated region fallthrough
CT: control target
= control target key end

     0   :  { %s6799_s0 = inlined_call_operand.hbm [shape: bf16[256,128], index: 0, kind: input, shape index: {}]   ;;  %s6800_s1 = inlined_call_operand.hbm [shape: bf16[128,256], index: 1, kind: input, shape index: {}]   ;;  %s6801_s2 = inlined_call_operand.vmem [shape: f32[1,256], index: 2, kind: input, shape index: {}]   ;;  %s6802_s3 = inlined_call_operand.hbm [shape: bf16[256,256], index: 3, kind: input, shape index: {}]   ;;  %s6803_s4 = inlined_call_operand.vmem [shape: f32[1,256], index: 4, kind: input, shape index: {}]   ;;  %s6804_s5 = inlined_call_operand.hbm [shape: bf16[256,128], index: 5, kind: input, shape index: {}]   ;;  %s6805_s6 = inlined_call_operand.vmem [shape: f32[1,128], index: 6, kind: input, shape index: {}]   ;;  %s6806_s7 = inlined_call_operand.hbm [shape: bf16[128,384], index: 7, kind: input, shape index: {}]   ;;  %s6807_s8 = inlined_call_operand.hbm [shape: f32[256,384], index: 8, kind: output, shape index: {}]  }
   0x1   :  { %6851 = sst [smem:[#allocation65_spill]] %s6799_s0 }
   0x2   :  { %6852 = sst [smem:[#allocation66_spill]] %s6800_s1 }
   0x3   :  { %6853 = sst [smem:[#allocation67_spill]] %s6801_s2 }
   0x4   :  { %6854 = sst [smem:[#allocation68_spill]] %s6803_s4 }
   0x5   :  { %6855 = sst [smem:[#allocation69_spill]] %s6805_s6 }
   0x6   :  { %6856 = sst [smem:[#allocation70_spill]] %s6807_s8 }
   0x7   :  { %13 = vsyncpa [#allocation4], 0 }
   0x8   :  { %15 = vsyncpa [#allocation4 + $0x1], 0 }
   0x9   :  { %16 = vsyncpa [#allocation7], 0 }
   0xa   :  { %17 = vsyncpa [#allocation10], 0 }
   0xb   :  { %18 = vsyncpa [#allocation5], 0 }
   0xc   :  { %20 = vsyncpa [#allocation5 + $0x1], 0  ;;  %s4647_s27 = smov 0   ;;  %s4649_s28 = smov 0  }
   0xd   :  { %s4651_s29 = smov 0   ;;  %s4653_s30 = smov 0  }
   0xe   :  { %s4655_s9 = smov 0   ;;  %s4657_s10 = smov 0  }
   0xf   :  { %s4659_s11 = smov 0   ;;  %s4661_s12 = smov 0  }
  0x10   :  { %s4663_s13 = smov 0   ;;  %s4665_s14 = smov 0  }
  0x11   :  { %s4667_s15 = smov 0   ;;  %s4669_s16 = smov 0  }
  0x12   :  { %s4671_s17 = smov 0   ;;  %s4673_s18 = smov 0  }
  0x13 LB: > { %6857 = sst [smem:[#allocation18_spill]] %s4533_s27  ;;  %s4714_s19 = sadd.s32 4294967295, %s4585_s18   ;;  %s4585_s18 = sphi %s4673_s18, %s26_s18   ;;  %s4581_s17 = sphi %s4671_s17, %s7047_s17   ;;  %s4577_s16 = sphi %s4669_s16, %s7056_s16   ;;  %s4573_s15 = sphi %s4667_s15, %s7045_s15   ;;  %s4569_s14 = sphi %s4665_s14, %s7055_s14   ;;  %s4565_s13 = sphi %s4663_s13, %s7054_s13   ;;  %s4561_s12 = sphi %s4661_s12, %s7053_s12   ;;  %s4557_s11 = sphi %s4659_s11, %s7052_s11   ;;  %s4553_s10 = sphi %s4657_s10, %s7051_s10   ;;  %s4549_s9 = sphi %s4655_s9, %s7050_s9   ;;  %s4545_s30 = sphi %s4653_s30, %s7043_s30   ;;  %s4541_s29 = sphi %s4651_s29, %s7049_s29   ;;  %s4537_s28 = sphi %s4649_s28, %s7048_s28   ;;  %s4533_s27 = sphi %s4647_s27, %s7042_s27  }
  0x14   : > { %6858 = sst [smem:[#allocation19_spill]] %s4537_s28  ;;  %s3468_s20 = sadd.s32 4294967294, %s4585_s18  }
  0x15   : > { %6859 = sst [smem:[#allocation20_spill]] %s4549_s9  ;;  %p58_p0 = scmp.ne.s32.totalorder %s4561_s12, %s4557_s11 }
  0x16   : > { %6860 = sst [smem:[#allocation21_spill]] %s4569_s14  ;;  %p6813_p1 = scmp.eq.s32.totalorder %s4714_s19, 0 }
  0x17   : > { %6861 = sst [smem:[#allocation22_spill]] %s4573_s15  ;;  %p210_p3 = scmp.ne.s32.totalorder %s4549_s9, %s4545_s30 }
  0x18   : > { %6862 = sst [smem:[#allocation23_spill]] %s4581_s17  ;;  %p4724_p4 = por %p6813_p1, %p58_p0 }
  0x19   : > { %p235_p5 = scmp.ne.s32.totalorder %s4541_s29, %s4537_s28  ;;  %p4732_p6 = por %p210_p3, %p6813_p1 }
  0x1a   : > { %s6863_s21 = scalar_select %p4724_p4, 1, 0 }
  0x1b   : > { %s6865_s22 = scalar_select %p4732_p6, 1, 0 }
  0x1c   : > { %6864 = sst [smem:[#allocation24_spill]] %s6863_s21  ;;  %p236_p7 = scmp.eq.s32.totalorder %s4714_s19, 5 }
  0x1d   : > { %6866 = sst [smem:[#allocation25_spill]] %s6865_s22  ;;  %p241_p8 = scmp.ne.s32.totalorder %s4537_s28, %s4533_s27 }
  0x1e   : > { %p242_p9 = scmp.eq.s32.totalorder %s3468_s20, 5  ;;  %p4739_p10 = por %p236_p7, %p235_p5 }
  0x1f   : > { %p3469_p11 = scmp.ge.s32.totalorder %s4585_s18, 1  ;;  %p249_p13 = scmp.lt.s32.totalorder %s4585_s18, 7 }
  0x20   : > { %s6867_s23 = scalar_select %p4739_p10, 1, 0 }
  0x21   : > { %p4744_p12 = por %p242_p9, %p241_p8  ;;  %p4749_p0 = pnand %p3469_p11, %p249_p13 }
  0x22   : > { %6868 = sst [smem:[#allocation26_spill]] %s6867_s23  ;;  %s4587_s26 = smov [#allocation6]  }
  0x23   : > { %s6869_s24 = scalar_select %p4744_p12, 1, 0 }
  0x24   : > { %s6871_s25 = scalar_select %p4749_p0, 1, 0 }
  0x25   : > { %6870 = sst [smem:[#allocation27_spill]] %s6869_s24  ;;  %s261_s30 = sshll.u32 %s4587_s26, 4  ;;  %s262_s30 = int_to_ptr.vmem [resolvable:$true] %s261_s30 }
  0x26   : > { %p3738_p3 = pneg %p4749_p0  ;;  %s6873_s1 = sld [smem:[#allocation66_spill]] }
  0x28   : > { %p4757_p5 = pnand %p3738_p3, %p6813_p1 }
  0x2a   : > { %s6872_s11 = scalar_select %p4757_p5, 1, 0 }
  0x2b   : > { %p4769_p8 = pneg %p4757_p5 }
  0x2c   : > { %s4283_s24 = scalar_lea.hbm %s6873_s1, 2048 }
  0x2d   : > { %p4284_p7 = scmp.ne.s32.totalorder %s6873_s1, %s4283_s24  ;;  %p4290_p13 = scmp.lt.u32.totalorder %s4283_s24, %s6873_s1 }
  0x2f   : > { %p4286_p9 = pnand %p4769_p8, %p4284_p7 }
  0x31   : > { %p4287_p11 = pneg %p4286_p9 }
  0x33   : > { %p4292_p3 = pnand %p4290_p13, %p4287_p11 }
  0x35   : > { %4295 = shalt.err (!%p4292_p3)
}
  0x36   : > { %s4296_s27 = scalar_lea.vmem %s262_s30, 2048  ;;  %p4304_p10 = scmp.lt.s32.totalorder %s262_s30, %s262_s30 }
  0x37   : > { %p4297_p1 = scmp.ne.s32.totalorder %s262_s30, %s4296_s27  ;;  %p4305_p6 = scmp.lt.s32.totalorder %s4296_s27, %s4296_s27 }
  0x39   : > { %p4299_p2 = pnand %p4297_p1, %p4769_p8  ;;  %p4306_p4 = por %p4305_p6, %p4304_p10 }
  0x3b   : > { %p4300_p12 = pneg %p4299_p2 }
  0x3d   : > { %p4307_p0 = pnand %p4306_p4, %p4300_p12 }
  0x3f   : > { %4310 = shalt.err (!%p4307_p0)
}
  0x40   : > { %s6818_s8 = smov 128   ;;  %s6819_s6 = smov 8  }
  0x41   : > { %3741 = dma.hbm_to_vmem [thread:$0]  (!%p4757_p5), %s6873_s1, 2048, %s262_s30, [#allocation7], %s6818_s8, %s6818_s8, %s6819_s6  }
  0x42   : > { %s35_s24 = sadd.s32 1, %s4577_s16  ;;  %s38_s20 = sadd.s32 1, %s4581_s17 }
  0x43   : > { %p36_p1 = scmp.ge.s32.totalorder %s35_s24, 3  ;;  %s45_s27 = sadd.s32 1, %s4565_s13 }
  0x44   : > { %p52_p2 = scmp.ne.s32.totalorder %s4565_s13, %s4561_s12  ;;  %p53_p4 = scmp.eq.s32.totalorder %s4585_s18, 0 }
  0x45   : > { %s7058_s24 = smov (%p36_p1, %s35_s24), 0  ;;  %s7060_s20 = smov (!%p36_p1, %s38_s20), %s4581_s17 }
  0x46   : > { %6875 = sst [smem:[#allocation28_spill]] %s7058_s24  ;;  %s194_s15 = ssub.s32 %s4577_s16, %s7058_s24 }
  0x47   : > { %p40_p6 = scmp.ge.s32.totalorder %s7060_s20, 2  ;;  %p195_p10 = scmp.eq.s32.totalorder %s194_s15, 0 }
  0x48   : > { %p4799_p12 = por %p53_p4, %p52_p2  ;;  %s197_s23 = sadd.s32 1, %s4553_s10 }
  0x49   : > { %s7062_s20 = smov (%p40_p6, %s7060_s20), 0  ;;  %p6879_p0 = scmp.ne.s32.totalorder %s4553_s10, %s4549_s9 }
  0x4a   : > { %6877 = sst [smem:[#allocation29_spill]] %s7062_s20  ;;  %s42_s6 = ssub.s32 %s4581_s17, %s7062_s20 }
  0x4b   : > { %s4807_s8 = scalar_select %p195_p10, %s4553_s10, %s197_s23  }
  0x4c   : > { %p4814_p7 = por %p6879_p0, %p53_p4  ;;  %p43_p9 = scmp.eq.s32.totalorder %s42_s6, 0 }
  0x4d   : > { %6878 = sst [smem:[#allocation30_spill]] %s4807_s8  ;;  %s222_s24 = sor.u32 %s194_s15, %s42_s6 }
  0x4e   : > { %p223_p11 = scmp.eq.s32.totalorder %s222_s24, 0  ;;  %s225_s4 = sadd.s32 1, %s4541_s29 }
  0x4f   : > { %s4820_s2 = scalar_select %p43_p9, %s4565_s13, %s45_s27  }
  0x50   : > { %s4823_s14 = scalar_select %p223_p11, %s4541_s29, %s225_s4  }
  0x51   : > { %p3762_p13 = scmp.lt.s32.totalorder %s4585_s18, 6  ;;  %s310_s28 = sand.u32 1, %s4585_s18  }
  0x52   : > { %s312_s23 = sand.u32 1, %s4565_s13   ;;  %s3574_s20 = sshll.u32 %s4581_s17, 10 }
  0x53   : > { %s3474_s8 = sshll.u32 %s312_s23, 6  ;;  %s6881_s0 = sld [smem:[#allocation65_spill]] }
  0x54   : > { %s314_s6 = scalar_lea.vmem [#allocation3], %s3474_s8  ;;  %p4836_p3 = pnand %p3762_p13, %p4799_p12 }
  0x55   : > { %s321_s24 = sshll.u32 %s314_s6, 4  ;;  %p4844_p1 = pnand %p3762_p13, %p4814_p7  ;;  %s4840_s24 = int_to_ptr.vmem [resolvable:$true] %s321_s24 }
  0x56   : > { %s4848_s22 = scalar_lea.sflag [#allocation4], %s310_s28  ;;  %p4313_p4 = pneg %p4836_p3 }
  0x57   : > { %s6883_s9 = scalar_select %p4844_p1, 1, 0 }
  0x59   : > { %s4832_s21 = scalar_lea.hbm %s6881_s0, %s3574_s20  ;;  %s4316_s15 = scalar_lea.hbm %s6881_s0, 2048 }
  0x5a   : > { %s4311_s20 = scalar_lea.hbm %s4832_s21, 1024  ;;  %p4317_p12 = scmp.lt.u32.totalorder %s4832_s21, %s6881_s0 }
  0x5b   : > { %p4312_p2 = scmp.ne.s32.totalorder %s4832_s21, %s4311_s20  ;;  %p4318_p0 = scmp.lt.u32.totalorder %s4316_s15, %s4311_s20 }
  0x5c   : > { %p4320_p9 = scmp.lt.u32.totalorder %s4311_s20, %s4832_s21 }
  0x5d   : > { %p4314_p6 = pnand %p4313_p4, %p4312_p2  ;;  %p4319_p7 = por %p4318_p0, %p4317_p12 }
  0x5f   : > { %p4315_p10 = pneg %p4314_p6  ;;  %p4321_p11 = por %p4320_p9, %p4319_p7 }
  0x61   : > { %p4322_p13 = pnand %p4321_p11, %p4315_p10 }
  0x63   : > { %4325 = shalt.err (!%p4322_p13)
}
  0x64   : > { %s4326_s28 = scalar_lea.vmem %s4840_s24, 1024  ;;  %s4590_s23 = smov [#allocation3]  }
  0x65   : > { %p4327_p2 = scmp.ne.s32.totalorder %s4840_s24, %s4326_s28  ;;  %s4331_s6 = sshll.u32 %s4590_s23, 4  ;;  %s4332_s6 = int_to_ptr.vmem [resolvable:$false] %s4331_s6 }
  0x66   : > { %s4333_s8 = scalar_lea.vmem %s4332_s6, 2048  ;;  %p4334_p5 = scmp.lt.s32.totalorder %s4840_s24, %s4332_s6 }
  0x67   : > { %p4329_p6 = pnand %p4327_p2, %p4313_p4  ;;  %p4335_p12 = scmp.lt.s32.totalorder %s4333_s8, %s4326_s28 }
  0x69   : > { %p4330_p1 = pneg %p4329_p6  ;;  %p4336_p0 = por %p4335_p12, %p4334_p5 }
  0x6b   : > { %p4337_p7 = pnand %p4336_p0, %p4330_p1 }
  0x6d   : > { %4340 = shalt.err (!%p4337_p7)
}
  0x6e   : > { %s6832_s20 = smov 64   ;;  %s6834_s27 = smov 4  }
  0x6f   : > { %3751 = dma.hbm_to_vmem [thread:$0]  (!%p4836_p3), %s4832_s21, 1024, %s4840_s24, %s4848_s22, %s6832_s20, %s6832_s20, %s6834_s27  }
  0x70   : > { %s4593_s15 = smov [#allocation8]   ;;  %s4341_s23 = scalar_lea.hbm %s6802_s3, 4096 }
  0x71   : > { %s277_s30 = sshll.u32 %s4593_s15, 4  ;;  %p4342_p5 = scmp.ne.s32.totalorder %s6802_s3, %s4341_s23  ;;  %s278_s30 = int_to_ptr.vmem [resolvable:$true] %s277_s30 }
  0x72   : > { %p4348_p10 = scmp.lt.u32.totalorder %s4341_s23, %s6802_s3 }
  0x73   : > { %p4344_p1 = pnand %p4342_p5, %p4769_p8 }
  0x75   : > { %p4345_p4 = pneg %p4344_p1 }
  0x77   : > { %p4350_p9 = pnand %p4348_p10, %p4345_p4 }
  0x79   : > { %4353 = shalt.err (!%p4350_p9)
}
  0x7a   : > { %s4354_s21 = scalar_lea.vmem %s278_s30, 4096  ;;  %p4362_p2 = scmp.lt.s32.totalorder %s278_s30, %s278_s30 }
  0x7b   : > { %p4355_p3 = scmp.ne.s32.totalorder %s278_s30, %s4354_s21  ;;  %p4363_p6 = scmp.lt.s32.totalorder %s4354_s21, %s4354_s21 }
  0x7d   : > { %p4357_p11 = pnand %p4355_p3, %p4769_p8  ;;  %p4364_p12 = por %p4363_p6, %p4362_p2 }
  0x7f   : > { %p4358_p13 = pneg %p4357_p11 }
  0x81   : > { %p4365_p0 = pnand %p4364_p12, %p4358_p13 }
  0x83   : > { %4368 = shalt.err (!%p4365_p0)
}
  0x84   : > { %p6884_p7 = scmp.ne.s32.totalorder %s6872_s11, 0  ;;  %s6885_s24 = smov 8  }
  0x85   : > { %s6886_s15 = smov 128   ;;  %s4594_s28 = smov [#allocation9]  }
  0x86   : > { %3744 = dma.hbm_to_vmem [thread:$0]  (!%p6884_p7), %s6802_s3, 4096, %s278_s30, [#allocation7], %s6886_s15, %s6886_s15, %s6885_s24  }
  0x87   : > { %s293_s23 = sshll.u32 %s4594_s28, 4  ;;  %s333_s6 = sand.u32 1, %s4553_s10   ;;  %s294_s23 = int_to_ptr.vmem [resolvable:$true] %s293_s23 }
  0x88   : > { %s3477_s8 = sshll.u32 %s333_s6, 6  ;;  %s4369_s20 = scalar_lea.hbm %s6804_s5, 2048 }
  0x89   : > { %p4370_p5 = scmp.ne.s32.totalorder %s6804_s5, %s4369_s20  ;;  %p4376_p10 = scmp.lt.u32.totalorder %s4369_s20, %s6804_s5 }
  0x8b   : > { %p4372_p1 = pnand %p4370_p5, %p4769_p8 }
  0x8d   : > { %p4373_p4 = pneg %p4372_p1 }
  0x8f   : > { %p4378_p9 = pnand %p4376_p10, %p4373_p4 }
  0x91   : > { %4381 = shalt.err (!%p4378_p9)
}
  0x92   : > { %s4382_s30 = scalar_lea.vmem %s294_s23, 2048  ;;  %p4390_p2 = scmp.lt.s32.totalorder %s294_s23, %s294_s23 }
  0x93   : > { %p4383_p3 = scmp.ne.s32.totalorder %s294_s23, %s4382_s30  ;;  %p4391_p6 = scmp.lt.s32.totalorder %s4382_s30, %s4382_s30 }
  0x95   : > { %p4385_p11 = pnand %p4383_p3, %p4769_p8  ;;  %p4392_p12 = por %p4391_p6, %p4390_p2 }
  0x97   : > { %p4386_p13 = pneg %p4385_p11 }
  0x99   : > { %p4393_p0 = pnand %p4392_p12, %p4386_p13 }
  0x9b   : > { %4396 = shalt.err (!%p4393_p0)
}
  0x9c   : > { %s6887_s17 = smov 4   ;;  %s6888_s27 = smov 64  }
  0x9d   : > { %3747 = dma.hbm_to_vmem [thread:$0]  (!%p6884_p7), %s6804_s5, 2048, %s294_s23, [#allocation10], %s6888_s27, %s6888_s27, %s6887_s17  }
  0x9e   : > { %s3478_s26 = sshll.u32 %s4577_s16, 6  ;;  %s335_s11 = scalar_lea.vmem [#allocation11], %s3477_s8 }
  0x9f   : > { %s4926_s6 = scalar_lea.hbm %s6806_s7, %s3478_s26  ;;  %s341_s4 = sshll.u32 %s335_s11, 4  ;;  %s4928_s4 = int_to_ptr.vmem [resolvable:$true] %s341_s4 }
  0xa0   : > { %s4397_s21 = scalar_lea.hbm %s4926_s6, 1024  ;;  %p6889_p5 = scmp.ne.s32.totalorder %s6883_s9, 0 }
  0xa1   : > { %p4398_p8 = scmp.ne.s32.totalorder %s4926_s6, %s4397_s21  ;;  %s4402_s1 = scalar_lea.hbm %s6806_s7, 3072 }
  0xa2   : > { %p4399_p1 = pneg %p6889_p5  ;;  %p4403_p10 = scmp.lt.u32.totalorder %s4926_s6, %s6806_s7 }
  0xa3   : > { %p4404_p9 = scmp.lt.u32.totalorder %s4402_s1, %s4397_s21  ;;  %p4406_p11 = scmp.lt.u32.totalorder %s4397_s21, %s4926_s6 }
  0xa4   : > { %p4400_p7 = pnand %p4399_p1, %p4398_p8 }
  0xa5   : > { %p4405_p3 = por %p4404_p9, %p4403_p10 }
  0xa6   : > { %p4401_p4 = pneg %p4400_p7 }
  0xa7   : > { %p4407_p13 = por %p4406_p11, %p4405_p3 }
  0xa9   : > { %p4408_p2 = pnand %p4407_p13, %p4401_p4 }
  0xab   : > { %4411 = shalt.err (!%p4408_p2)
}
  0xac   : > { %s4412_s8 = scalar_lea.vmem %s4928_s4, 1024  ;;  %s4595_s20 = smov [#allocation11]  }
  0xad   : > { %p4413_p6 = scmp.ne.s32.totalorder %s4928_s4, %s4412_s8  ;;  %s4417_s26 = sshll.u32 %s4595_s20, 4  ;;  %s4418_s26 = int_to_ptr.vmem [resolvable:$false] %s4417_s26 }
  0xae   : > { %s4419_s15 = scalar_lea.vmem %s4418_s26, 2048  ;;  %p4420_p8 = scmp.lt.s32.totalorder %s4928_s4, %s4418_s26 }
  0xaf   : > { %p4415_p12 = pnand %p4413_p6, %p4399_p1  ;;  %p4421_p7 = scmp.lt.s32.totalorder %s4419_s15, %s4412_s8 }
  0xb1   : > { %p4416_p0 = pneg %p4415_p12  ;;  %p4422_p10 = por %p4421_p7, %p4420_p8 }
  0xb3   : > { %p4423_p9 = pnand %p4422_p10, %p4416_p0 }
  0xb5   : > { %4426 = shalt.err (!%p4423_p9)
}
  0xb6   : > { %s4596_s28 = smov 192   ;;  %p6890_p1 = scmp.ne.s32.totalorder %s6871_s25, 0 }
  0xb7   : > { %3754 = dma.hbm_to_vmem [thread:$0]  (!%p6889_p5), %s4926_s6, 1024, %s4928_s4, %s4848_s22, %s4596_s28, %s6888_s27, %s6887_s17  }
  0xb8   : > { %353 = sbr.rel (%p6890_p1) target bundleno = 1775 (0x6ef), region = 52  ;;  %s6891_s11 = sld [smem:[#allocation24_spill]] (!%p6890_p1) }
  0xb9   : > { %s355_s21 = sand.u32 (!%p6890_p1), 1, %s4714_s19   ;;  %s357_s23 = sand.u32 (!%p6890_p1), 1, %s4561_s12  }
  0xba   : > { %s3480_s0 = sshll.u32 (!%p6890_p1), %s357_s23, 6  ;;  %s356_s1 = scalar_lea.sflag (!%p6890_p1), [#allocation4], %s355_s21 }
  0xbb   : > { %s4962_s30 = scalar_lea.vmem (!%p6890_p1), [#allocation3], %s3480_s0 }
  0xbe   : > { %p6892_p4 = scmp.ne.s32.totalorder (!%p6890_p1), %s6891_s11, 0 }
  0xc0   : > { %4512 = dma.done.wait (%p6892_p4), %s356_s1, 1024  }
  0xc1   : > { %4514 = vsyncadd (%p6892_p4), %s356_s1, 4294966272  ;;  %p6893_p3 = scmp.eq.s32.totalorder %s4714_s19, 0 }
  0xc3   : > { %4516 = dma.done.wait (%p6893_p3), [#allocation7], 6144   ;;  %p6894_p5 = pmov %p6893_p3 }
  0xc4   : > { %p6895_p11 = pmov %p6893_p3 }
  0xc5   : > { %4518 = vsyncadd (%p6894_p5), [#allocation7], 4294961152 }
  0xc6   : > { %4520 = dma.done.wait (%p6895_p11), [#allocation10], 2048   ;;  %p6896_p13 = pmov %p6893_p3 }
  0xc7   : > { %s6897_s25 = sld [smem:[#allocation20_spill]]  ;;  %s6898_s9 = sld [smem:[#allocation25_spill]] }
  0xc8   : > { %4522 = vsyncadd (%p6896_p13), [#allocation10], 4294965248 }
  0xcd   : > { %s378_s22 = sand.u32 1, %s6897_s25   ;;  %p6899_p2 = scmp.ne.s32.totalorder %s6898_s9, 0 }
  0xce   : > { %s3484_s17 = sshll.u32 %s378_s22, 6 }
  0xcf   : > { %s4977_s27 = scalar_lea.vmem [#allocation11], %s3484_s17 }
  0xd0   : > { %4524 = dma.done.wait (%p6899_p2), %s356_s1, 1024  }
  0xd1   : > { %4526 = vsyncadd (%p6899_p2), %s356_s1, 4294966272  ;;  %s6900_s6 = sld [smem:[#allocation19_spill]]  ;;  %s6901_s19 = sld [smem:[#allocation21_spill]] }
  0xd7   : > { %s415_s4 = sand.u32 1, %s6900_s6   ;;  %p3486_p6 = scmp.ne.s32.totalorder %s6901_s19, 0 }
  0xd8   : > { %s3485_s24 = sshll.u32 %s415_s4, 7 }
  0xd9   : > { %s4986_s8 = scalar_lea.vmem [#allocation12], %s3485_s24  ;;  %424 = sbr.rel (%p3486_p6) target bundleno = 1503 (0x5df), region = 76 }
  0xe0   : > { %v3891_v0 = vld [vmem:[#allocation6 + $0x4] ss:$8 sps:$4 sm:$0xff]   ;;  %v3893_v1 = vld [vmem:[#allocation6] ss:$8 sps:$4 sm:$0xff]   ;;  %v4597_v2 = vmov 0   ;;  %v3917_v23 = vld [vmem:[%s4962_s30 + $0x10] sm:$0xff]   ;;  %v459_v49 = vlaneseq }
  0xe1   : > { %629 = vmatprep.mubr.bf16.mxu0 %v4597_v2  ;;  %597 = vmatprep.subr.bf16.mxu0 %v3891_v0  ;;  %v3894_v3 = vld [vmem:[#allocation6 + $0x14] ss:$8 sps:$4 sm:$0xff]   ;;  %v3896_v4 = vld [vmem:[#allocation6 + $0x10] ss:$8 sps:$4 sm:$0xff]   ;;  %v3897_v5 = vld [vmem:[#allocation6 + $0x24] ss:$8 sps:$4 sm:$0xff]  }
  0xe2   : > { %598 = vmatpush1.bf16.msra.mxu0 %v3893_v1  ;;  %v3899_v6 = vld [vmem:[#allocation6 + $0x20] ss:$8 sps:$4 sm:$0xff]   ;;  %v3900_v7 = vld [vmem:[#allocation6 + $0x34] ss:$8 sps:$4 sm:$0xff]   ;;  %v3902_v8 = vld [vmem:[#allocation6 + $0x30] ss:$8 sps:$4 sm:$0xff]  }
  0xe3   : > { %599 = vmatprep.subr.bf16.mxu0 %v3894_v3  ;;  %v3903_v9 = vld [vmem:[#allocation6 + $0x44] ss:$8 sps:$4 sm:$0xff]   ;;  %v3905_v10 = vld [vmem:[#allocation6 + $0x40] ss:$8 sps:$4 sm:$0xff]   ;;  %v3906_v11 = vld [vmem:[#allocation6 + $0x54] ss:$8 sps:$4 sm:$0xff]  }
  0xe4   : > { %v3908_v12 = vld [vmem:[#allocation6 + $0x50] ss:$8 sps:$4 sm:$0xff]   ;;  %v3909_v13 = vld [vmem:[#allocation6 + $0x64] ss:$8 sps:$4 sm:$0xff]   ;;  %v3925_v15 = vld [vmem:[#allocation8] ss:$8 sps:$4 sm:$0xff]  }
  0xe5   : > { %v3923_v14 = vld [vmem:[#allocation8 + $0x4] ss:$8 sps:$4 sm:$0xff]   ;;  %v3926_v16 = vld [vmem:[#allocation8 + $0x14] ss:$8 sps:$4 sm:$0xff]   ;;  %v3911_v17 = vld [vmem:[#allocation6 + $0x60] ss:$8 sps:$4 sm:$0xff]  }
  0xe6   : > { %600 = vmatpush1.bf16.msra.mxu0 %v3896_v4  ;;  %1794 = vmatprep.subr.bf16.mxu1 %v3923_v14  ;;  %v3928_v18 = vld [vmem:[#allocation8 + $0x10] ss:$8 sps:$4 sm:$0xff]   ;;  %v3912_v19 = vld [vmem:[#allocation6 + $0x74] ss:$8 sps:$4 sm:$0xff]   ;;  %v3915_v21 = vld [vmem:[%s4962_s30] sm:$0xff]   ;;  %v4997_v50 = vshrl.u32 %v459_v49, 7 }
  0xe7   : > { %601 = vmatprep.subr.bf16.mxu0 %v3897_v5  ;;  %1795 = vmatpush1.bf16.msra.mxu1 %v3925_v15  ;;  %v3914_v20 = vld [vmem:[#allocation6 + $0x70] ss:$8 sps:$4 sm:$0xff]   ;;  %v3916_v22 = vld [vmem:[%s4962_s30 + $0x8] sm:$0xff]   ;;  %v3919_v25 = vld [vmem:[%s4962_s30 + $0x20] sm:$0xff]   ;;  %s6903_s15 = sld [smem:[#allocation67_spill]]  ;;  %s6978_s21 = sld [smem:[#allocation68_spill]] }
  0xe8   : > { %1796 = vmatprep.subr.bf16.mxu1 %v3926_v16  ;;  %v3918_v24 = vld [vmem:[%s4962_s30 + $0x18] sm:$0xff]   ;;  %v3920_v26 = vld [vmem:[%s4962_s30 + $0x28] sm:$0xff]   ;;  %v3921_v27 = vld [vmem:[%s4962_s30 + $0x30] sm:$0xff]   ;;  %6902 = vst [vmem:[#allocation31_spill] sm:$0xff] %v4997_v50  ;;  %v6838_v51 = vsub.s32 0, %v4997_v50  ;;  %v6837_v1 = vsub.s32 1, %v4997_v50 }
  0xe9   : > { %v3922_v28 = vld [vmem:[%s4962_s30 + $0x38] sm:$0xff]   ;;  %v3929_v29 = vld [vmem:[#allocation8 + $0x24] ss:$8 sps:$4 sm:$0xff]   ;;  %v3931_v30 = vld [vmem:[#allocation8 + $0x20] ss:$8 sps:$4 sm:$0xff]   ;;  %s7031_s1 = sld [smem:[#allocation69_spill]] }
  0xea   : > { %602 = vmatpush1.bf16.msra.mxu0 %v3899_v6  ;;  %v3932_v31 = vld [vmem:[#allocation8 + $0x34] ss:$8 sps:$4 sm:$0xff]   ;;  %v3934_v32 = vld [vmem:[#allocation8 + $0x30] ss:$8 sps:$4 sm:$0xff]   ;;  %v3935_v33 = vld [vmem:[#allocation8 + $0x44] ss:$8 sps:$4 sm:$0xff]  }
  0xeb   : > { %603 = vmatprep.subr.bf16.mxu0 %v3900_v7  ;;  %1797 = vmatpush1.bf16.msra.mxu1 %v3928_v18  ;;  %v3937_v34 = vld [vmem:[#allocation8 + $0x40] ss:$8 sps:$4 sm:$0xff]   ;;  %v3938_v35 = vld [vmem:[#allocation8 + $0x54] ss:$8 sps:$4 sm:$0xff]   ;;  %v3940_v36 = vld [vmem:[#allocation8 + $0x50] ss:$8 sps:$4 sm:$0xff]  }
  0xec   : > { %1798 = vmatprep.subr.bf16.mxu1 %v3929_v29  ;;  %v3941_v37 = vld [vmem:[#allocation8 + $0x64] ss:$8 sps:$4 sm:$0xff]   ;;  %v3943_v38 = vld [vmem:[#allocation8 + $0x60] ss:$8 sps:$4 sm:$0xff]   ;;  %v3944_v39 = vld [vmem:[#allocation8 + $0x74] ss:$8 sps:$4 sm:$0xff]  }
  0xed   : > { %v3946_v40 = vld [vmem:[#allocation8 + $0x70] ss:$8 sps:$4 sm:$0xff]   ;;  %v3947_v41 = vld [vmem:[#allocation8 + $0x84] ss:$8 sps:$4 sm:$0xff]   ;;  %v3949_v42 = vld [vmem:[#allocation8 + $0x80] ss:$8 sps:$4 sm:$0xff]  }
  0xee   : > { %604 = vmatpush1.bf16.msra.mxu0 %v3902_v8  ;;  %v3950_v43 = vld [vmem:[#allocation8 + $0x94] ss:$8 sps:$4 sm:$0xff]   ;;  %v3952_v44 = vld [vmem:[#allocation8 + $0x90] ss:$8 sps:$4 sm:$0xff]   ;;  %v3953_v45 = vld [vmem:[#allocation8 + $0xa4] ss:$8 sps:$4 sm:$0xff]  }
  0xef   : > { %605 = vmatprep.subr.bf16.mxu0 %v3903_v9  ;;  %1799 = vmatpush1.bf16.msra.mxu1 %v3931_v30  ;;  %v3955_v46 = vld [vmem:[#allocation8 + $0xa0] ss:$8 sps:$4 sm:$0xff]   ;;  %v3956_v47 = vld [vmem:[#allocation8 + $0xb4] ss:$8 sps:$4 sm:$0xff]   ;;  %v3958_v48 = vld [vmem:[#allocation8 + $0xb0] ss:$8 sps:$4 sm:$0xff]  }
  0xf0   : > { %1800 = vmatprep.subr.bf16.mxu1 %v3932_v31  ;;  %v457_v52 = vld [vmem:[%s6903_s15] sm:$0x3]  ;;  %v3959_v53 = vld [vmem:[#allocation8 + $0xc4] ss:$8 sps:$4 sm:$0xff]   ;;  %v3962_v57 = vld [vmem:[#allocation8 + $0xd4] ss:$8 sps:$4 sm:$0xff]  }
  0xf1   : > { %v5005_v54 = vrot.slane %v457_v52, %v6838_v51  ;;  %v3961_v55 = vld [vmem:[#allocation8 + $0xc0] ss:$8 sps:$4 sm:$0xff]   ;;  %v3964_v60 = vld [vmem:[#allocation8 + $0xd0] ss:$8 sps:$4 sm:$0xff]   ;;  %v5020_v6 = vrot.slane %v457_v52, %v6837_v1  ;;  %v3965_v15 = vld [vmem:[#allocation8 + $0xe4] ss:$8 sps:$4 sm:$0xff]  }
  0xf2   : > { %606 = vmatpush1.bf16.msra.mxu0 %v3905_v10 }
  0xf3   : > { %607 = vmatprep.subr.bf16.mxu0 %v3906_v11  ;;  %1801 = vmatpush1.bf16.msra.mxu1 %v3934_v32 }
  0xf4   : > { %1802 = vmatprep.subr.bf16.mxu1 %v3935_v33 }
  0xf6   : > { %608 = vmatpush1.bf16.msra.mxu0 %v3908_v12 }
  0xf7   : > { %609 = vmatprep.subr.bf16.mxu0 %v3909_v13  ;;  %1803 = vmatpush1.bf16.msra.mxu1 %v3937_v34 }
  0xf8   : > { %1804 = vmatprep.subr.bf16.mxu1 %v3938_v35 }
  0xfa   : > { %610 = vmatpush1.bf16.msra.mxu0 %v3911_v17 }
  0xfb   : > { %611 = vmatprep.subr.bf16.mxu0 %v3912_v19  ;;  %1805 = vmatpush1.bf16.msra.mxu1 %v3940_v36 }
  0xfc   : > { %1806 = vmatprep.subr.bf16.mxu1 %v3941_v37 }
  0xfe   : > { %612 = vmatpush1.bf16.msra.mxu0 %v3914_v20 }
  0xff   : > { %1807 = vmatpush1.bf16.msra.mxu1 %v3943_v38 }
 0x100   : > { %1808 = vmatprep.subr.bf16.mxu1 %v3944_v39 }
 0x101   : > { %630 = vmatmul.mubr.bf16.vlgmr.msra.gmra.mrb[0].mxu0 %v3915_v21 }
 0x102   : > { %639 = vmatprep.mubr.bf16.mxu0 %v4597_v2 }
 0x103   : > { %1809 = vmatpush1.bf16.msra.mxu1 %v3946_v40  ;;  %v3967_v40 = vld [vmem:[#allocation8 + $0xe0] ss:$8 sps:$4 sm:$0xff]  }
 0x104   : > { %1810 = vmatprep.subr.bf16.mxu1 %v3947_v41 }
 0x107   : > { %1811 = vmatpush1.bf16.msra.mxu1 %v3949_v42 }
 0x108   : > { %1812 = vmatprep.subr.bf16.mxu1 %v3950_v43 }
 0x109   : > { %640 = vmatmul.mubr.bf16.gmra.mrb[4].mxu0 %v3916_v22 }
 0x10a   : > { %649 = vmatprep.mubr.bf16.mxu0 %v4597_v2 }
 0x10b   : > { %1813 = vmatpush1.bf16.msra.mxu1 %v3952_v44 }
 0x10c   : > { %1814 = vmatprep.subr.bf16.mxu1 %v3953_v45 }
 0x10f   : > { %1815 = vmatpush1.bf16.msra.mxu1 %v3955_v46 }
 0x110   : > { %1816 = vmatprep.subr.bf16.mxu1 %v3956_v47 }
 0x111   : > { %650 = vmatmul.mubr.bf16.gmra.mrb[8].mxu0 %v3917_v23 }
 0x112   : > { %659 = vmatprep.mubr.bf16.mxu0 %v4597_v2 }
 0x113   : > { %1817 = vmatpush1.bf16.msra.mxu1 %v3958_v48 }
 0x114   : > { %1818 = vmatprep.subr.bf16.mxu1 %v3959_v53 }
 0x117   : > { %1819 = vmatpush1.bf16.msra.mxu1 %v3961_v55 }
 0x118   : > { %1820 = vmatprep.subr.bf16.mxu1 %v3962_v57 }
 0x119   : > { %660 = vmatmul.mubr.bf16.gmra.mrb[12].mxu0 %v3918_v24 }
 0x11a   : > { %669 = vmatprep.mubr.bf16.mxu0 %v4597_v2 }
 0x11b   : > { %1821 = vmatpush1.bf16.msra.mxu1 %v3964_v60 }
 0x11c   : > { %1822 = vmatprep.subr.bf16.mxu1 %v3965_v15 }
 0x11f   : > { %1823 = vmatpush1.bf16.msra.mxu1 %v3967_v40 }
 0x121   : > { %670 = vmatmul.mubr.bf16.gmra.mrb[16].mxu0 %v3919_v25 }
 0x122   : > { %679 = vmatprep.mubr.bf16.mxu0 %v4597_v2 }
 0x129   : > { %680 = vmatmul.mubr.bf16.gmra.mrb[20].mxu0 %v3920_v26 }
 0x12a   : > { %689 = vmatprep.mubr.bf16.mxu0 %v4597_v2 }
 0x131   : > { %690 = vmatmul.mubr.bf16.gmra.mrb[24].mxu0 %v3921_v27 }
 0x132   : > { %699 = vmatprep.mubr.bf16.mxu0 %v4597_v2 }
 0x139   : > { %700 = vmatmul.mubr.bf16.gmra.mrb[28].mxu0 %v3922_v28 }
 0x1d4   : > { %v631_v56 = vpop.f32.mrb[0].mxu0 }
 0x1d5   : > { %v5008_v58 = vadd.f32 %v631_v56, %v5005_v54  ;;  %v633_v59 = vpop.f32.mrb[1].mxu0 }
 0x1d6   : > { %v635_v61 = vpop.f32.mrb[2].mxu0  ;;  %v5024_v14 = vadd.f32 %v633_v59, %v5020_v6 }
 0x1d7   : > { %v710_v62 = vand.u32 2147483647, %v5008_v58  ;;  %v5012_v63 = vadd.f32 %v635_v61, %v5005_v54  ;;  %v637_v0 = vpop.f32.mrb[3].mxu0  ;;  %v5080_v61 = vmul.f32 0.5, %v5008_v58  ;;  %vm1382_vm0 = vcmp.ge.f32.partialorder %v5008_v58, 0.0 }
 0x1d8   : > { %6904 = vst [vmem:[#allocation32_spill] sm:$0xff] %v5024_v14  ;;  %v711_v21 = vand.u32 2147483647, %v5024_v14  ;;  %v5048_v30 = vadd.f32 %v637_v0, %v5020_v6 }
 0x1d9   : > { %v742_v2 = vmul.f32 0.70710677, %v710_v62  ;;  %v712_v3 = vand.u32 2147483647, %v5012_v63  ;;  %6906 = vst [vmem:[#allocation34_spill] sm:$0xff] %v5080_v61  ;;  %v5093_v15 = vmul.f32 0.5, %v5012_v63 }
 0x1da   : > { %6905 = vst [vmem:[#allocation33_spill] sm:$0xff] %v5048_v30  ;;  %v743_v34 = vmul.f32 0.70710677, %v711_v21  ;;  %v713_v44 = vand.u32 2147483647, %v5048_v30  ;;  %vm1384_vm1 = vcmp.ge.f32.partialorder %v5012_v63, 0.0 }
 0x1db   : > { %v774_v4 = vmul.f32 0.3275911, %v742_v2  ;;  %v5016_v5 = vmul.f32 0.70710677, %v712_v3  ;;  %v1190_v47 = vmul.f32 %v742_v2, %v742_v2  ;;  %6907 = vst [vmem:[#allocation35_spill] sm:$0xff] %v5093_v15 }
 0x1dc   : > { %v641_v7 = vpop.f32.mrb[4].mxu0  ;;  %v1191_v56 = vmul.f32 %v743_v34, %v743_v34  ;;  %v745_v62 = vmul.f32 0.70710677, %v713_v44  ;;  %v3970_v21 = vld [vmem:[#allocation8 + $0xf0] ss:$8 sps:$4 sm:$0xff]  }
 0x1dd   : > { %v806_v8 = vadd.f32 1.0, %v774_v4  ;;  %v776_v9 = vmul.f32 0.3275911, %v5016_v5  ;;  %v643_v10 = vpop.f32.mrb[5].mxu0  ;;  %v5027_v16 = vadd.f32 %v641_v7, %v5005_v54  ;;  %v1222_v4 = vsub.f32 0.0, %v1190_v47 }
 0x1de   : > { %v645_v11 = vpop.f32.mrb[6].mxu0  ;;  %v5030_v17 = vadd.f32 %v643_v10, %v5020_v6 }
 0x1df   : > { %3987 = vrcp.f32 %v806_v8  ;;  %v808_v12 = vadd.f32 1.0, %v776_v9  ;;  %v647_v13 = vpop.f32.mrb[7].mxu0  ;;  %v5033_v18 = vadd.f32 %v645_v11, %v5005_v54  ;;  %v714_v20 = vand.u32 2147483647, %v5027_v16 }
 0x1e0   : > { %v5036_v19 = vadd.f32 %v647_v13, %v5020_v6  ;;  %v715_v22 = vand.u32 2147483647, %v5030_v17  ;;  %v1192_v8 = vmul.f32 %v5016_v5, %v5016_v5  ;;  %v775_v9 = vmul.f32 0.3275911, %v743_v34 }
 0x1e1   : > { %3989 = vrcp.f32 %v808_v12  ;;  %v5041_v24 = vmul.f32 0.70710677, %v714_v20  ;;  %v716_v25 = vand.u32 2147483647, %v5033_v18  ;;  %v1223_v12 = vsub.f32 0.0, %v1191_v56 }
 0x1e2   : > { %v5044_v27 = vmul.f32 0.70710677, %v715_v22  ;;  %v717_v28 = vand.u32 2147483647, %v5036_v19  ;;  %v3968_v20 = vld [vmem:[#allocation8 + $0xf4] ss:$8 sps:$4 sm:$0xff]  }
 0x1e3   : > { %v778_v31 = vmul.f32 0.3275911, %v5041_v24  ;;  %v5051_v32 = vmul.f32 0.70710677, %v716_v25  ;;  %v5095_v22 = vmul.f32 0.3275911, %v745_v62  ;;  %1824 = vmatprep.subr.bf16.mxu1 %v3968_v20  ;;  %v1194_v40 = vmul.f32 %v5041_v24, %v5041_v24 }
 0x1e4   : > { %v651_v23 = vpop.f32.mrb[8].mxu0  ;;  %v779_v35 = vmul.f32 0.3275911, %v5044_v27  ;;  %v5056_v36 = vmul.f32 0.70710677, %v717_v28  ;;  %1825 = vmatpush1.bf16.msra.mxu1 %v3970_v21  ;;  %v1195_v24 = vmul.f32 %v5044_v27, %v5044_v27  ;;  %vm1386_vm2 = vcmp.ge.f32.partialorder %v5027_v16, 0.0 }
 0x1e5   : > { %v653_v26 = vpop.f32.mrb[9].mxu0  ;;  %v810_v38 = vadd.f32 1.0, %v778_v31  ;;  %v780_v39 = vmul.f32 0.3275911, %v5051_v32  ;;  %v5069_v53 = vadd.f32 %v651_v23, %v5005_v54  ;;  %v5097_v23 = vmul.f32 %v745_v62, %v745_v62 }
 0x1e6   : > { %v655_v29 = vpop.f32.mrb[10].mxu0  ;;  %v811_v42 = vadd.f32 1.0, %v779_v35  ;;  %v781_v43 = vmul.f32 0.3275911, %v5056_v36  ;;  %v5075_v59 = vadd.f32 %v653_v26, %v5020_v6  ;;  %v1254_v28 = vmul.f32 1.442695, %v1222_v4 }
 0x1e7   : > { %v5053_v33 = vpop.f32.mrb[11].mxu0  ;;  %3991 = vrcp.f32 %v810_v38  ;;  %v812_v45 = vadd.f32 1.0, %v780_v39  ;;  %v718_v0 = vand.u32 2147483647, %v5069_v53  ;;  %v1224_v31 = vsub.f32 0.0, %v1192_v8 }
 0x1e8   : > { %3993 = vrcp.f32 %v811_v42  ;;  %v813_v52 = vadd.f32 1.0, %v781_v43  ;;  %v719_v11 = vand.u32 2147483647, %v5075_v59  ;;  %v5103_v34 = vadd.f32 %v655_v29, %v5005_v54 }
 0x1e9   : > { %v5058_v37 = vpop.eup %3987  ;;  %3995 = vrcp.f32 %v812_v45  ;;  %v5088_v10 = vmul.f32 0.70710677, %v718_v0  ;;  %v807_v45 = vadd.f32 1.0, %v775_v9  ;;  %v1256_v0 = vmul.f32 1.442695, %v1223_v12 }
 0x1ea   : > { %v902_v41 = vmul.f32 1.0614054, %v5058_v37  ;;  %3997 = vrcp.f32 %v813_v52  ;;  %v5100_v25 = vmul.f32 0.70710677, %v719_v11  ;;  %v1225_v8 = vsub.f32 0.0, %v5097_v23 }
 0x1eb   : > { %v5066_v49 = vpop.eup %3989  ;;  %v782_v5 = vmul.f32 0.3275911, %v5088_v10  ;;  %v1226_v9 = vsub.f32 0.0, %v1194_v40  ;;  %vm1387_vm3 = vcmp.ge.f32.partialorder %v5030_v17, 0.0  ;;  %vm1388_vm4 = vcmp.ge.f32.partialorder %v5033_v18, 0.0 }
 0x1ec   : > { %v934_v46 = vadd.f32 -1.4531521, %v902_v41  ;;  %v5064_v48 = vpop.f32.mrb[12].mxu0  ;;  %v904_v57 = vmul.f32 1.0614054, %v5066_v49  ;;  %vm1389_vm5 = vcmp.ge.f32.partialorder %v5036_v19, 0.0 }
 0x1ed   : > { %v5071_v55 = vpop.f32.mrb[13].mxu0  ;;  %v814_v41 = vadd.f32 1.0, %v782_v5  ;;  %v783_v42 = vmul.f32 0.3275911, %v5100_v25  ;;  %v1196_v5 = vmul.f32 %v5051_v32, %v5051_v32  ;;  %vm1390_vm6 = vcmp.ge.f32.partialorder %v5069_v53, 0.0 }
 0x1ee   : > { %v5077_v60 = vpop.f32.mrb[14].mxu0  ;;  %v966_v3 = vmul.f32 %v5058_v37, %v934_v46  ;;  %v936_v7 = vadd.f32 -1.4531521, %v904_v57  ;;  %v720_v46 = vand.u32 2147483647, %v5103_v34  ;;  %vm1391_vm7 = vcmp.ge.f32.partialorder %v5075_v59, 0.0 }
 0x1ef   : > { %v5083_v2 = vpop.f32.mrb[15].mxu0  ;;  %3999 = vrcp.f32 %v814_v41  ;;  %v815_v56 = vadd.f32 1.0, %v783_v42  ;;  %vm1392_vm8 = vcmp.ge.f32.partialorder %v5103_v34, 0.0 }
 0x1f0   : > { %v968_v13 = vmul.f32 %v5066_v49, %v936_v7  ;;  %v998_v26 = vadd.f32 1.4214138, %v966_v3  ;;  %v1258_v3 = vmul.f32 1.442695, %v1224_v31  ;;  %v1227_v31 = vsub.f32 0.0, %v1195_v24 }
 0x1f1   : > { %v5107_v38 = vpop.eup %3991  ;;  %4001 = vrcp.f32 %v815_v56  ;;  %v1262_v24 = vmul.f32 1.442695, %v1226_v9 }
 0x1f2   : > { %v1000_v39 = vadd.f32 1.4214138, %v968_v13  ;;  %v5114_v44 = vpop.eup %3993  ;;  %v906_v29 = vmul.f32 1.0614054, %v5107_v38  ;;  %v1030_v62 = vmul.f32 %v5058_v37, %v998_v26  ;;  %v5129_v13 = vmul.f32 0.70710677, %v720_v46 }
 0x1f3   : > { %v907_v52 = vmul.f32 1.0614054, %v5114_v44  ;;  %v5126_v7 = vpop.eup %3995  ;;  %4003 = vrcp.f32 %v807_v45 }
 0x1f4   : > { %v5105_v35 = vpop.f32.mrb[16].mxu0  ;;  %v938_v4 = vadd.f32 -1.4531521, %v906_v29  ;;  %v1032_v20 = vmul.f32 %v5066_v49, %v1000_v39  ;;  %v908_v21 = vmul.f32 1.0614054, %v5126_v7  ;;  %v5136_v12 = vpop.eup %3997  ;;  %v1197_v39 = vmul.f32 %v5056_v36, %v5056_v36 }
 0x1f5   : > { %v5112_v43 = vpop.f32.mrb[17].mxu0  ;;  %v939_v11 = vadd.f32 -1.4531521, %v907_v52  ;;  %v784_v23 = vmul.f32 0.3275911, %v5129_v13 }
 0x1f6   : > { %v5118_v47 = vpop.f32.mrb[18].mxu0  ;;  %v970_v27 = vmul.f32 %v5107_v38, %v938_v4  ;;  %v1062_v40 = vadd.f32 -0.28449672, %v1030_v62  ;;  %v940_v42 = vadd.f32 -1.4531521, %v908_v21 }
 0x1f7   : > { %v5123_v57 = vpop.f32.mrb[19].mxu0  ;;  %v971_v26 = vmul.f32 %v5114_v44, %v939_v11  ;;  %v909_v46 = vmul.f32 1.0614054, %v5136_v12  ;;  %v816_v52 = vadd.f32 1.0, %v784_v23  ;;  %v1064_v4 = vadd.f32 -0.28449672, %v1032_v20 }
 0x1f8   : > { %v1002_v41 = vadd.f32 1.4214138, %v970_v27  ;;  %v972_v56 = vmul.f32 %v5126_v7, %v940_v42  ;;  %v1228_v27 = vsub.f32 0.0, %v1196_v5  ;;  %v1229_v23 = vsub.f32 0.0, %v1197_v39 }
 0x1f9   : > { %v1003_v29 = vadd.f32 1.4214138, %v971_v26  ;;  %v941_v21 = vadd.f32 -1.4531521, %v909_v46  ;;  %4005 = vrcp.f32 %v816_v52  ;;  %v5154_v20 = vpop.eup %3999  ;;  %v1094_v9 = vmul.f32 %v5058_v37, %v1062_v40 }
 0x1fa   : > { %v1034_v11 = vmul.f32 %v5107_v38, %v1002_v41  ;;  %4007 = vpow2.f32 %v1254_v28  ;;  %v1004_v26 = vadd.f32 1.4214138, %v972_v56  ;;  %v5157_v41 = vmul.f32 1.442695, %v1225_v8 }
 0x1fb   : > { %v1035_v62 = vmul.f32 %v5114_v44, %v1003_v29  ;;  %4009 = vpow2.f32 %v1256_v0  ;;  %v973_v42 = vmul.f32 %v5136_v12, %v941_v21  ;;  %v1096_v5 = vmul.f32 %v5066_v49, %v1064_v4  ;;  %v5168_v8 = vpop.eup %4001 }
 0x1fc   : > { %v5143_v32 = vpop.f32.mrb[20].mxu0  ;;  %v1066_v45 = vadd.f32 -0.28449672, %v1034_v11  ;;  %4011 = vpow2.f32 %v1258_v3  ;;  %v1264_v29 = vmul.f32 1.442695, %v1227_v31  ;;  %v1036_v28 = vmul.f32 %v5126_v7, %v1004_v26 }
 0x1fd   : > { %v5147_v1 = vpop.f32.mrb[21].mxu0  ;;  %4013 = vpow2.f32 %v1262_v24  ;;  %v1067_v46 = vadd.f32 -0.28449672, %v1035_v62  ;;  %v1005_v39 = vadd.f32 1.4214138, %v973_v42  ;;  %v5166_v0 = vadd.f32 %v5053_v33, %v5020_v6  ;;  %v5177_v26 = vpop.eup %4003 }
 0x1fe   : > { %v5150_v36 = vpop.f32.mrb[22].mxu0  ;;  %v910_v52 = vmul.f32 1.0614054, %v5154_v20  ;;  %v1098_v11 = vmul.f32 %v5107_v38, %v1066_v45  ;;  %v1266_v56 = vmul.f32 1.442695, %v1228_v27  ;;  %v5172_v62 = vadd.f32 1.0, %v5095_v22 }
 0x1ff   : > { %v5152_v51 = vpop.f32.mrb[23].mxu0  ;;  %v1268_v40 = vmul.f32 1.442695, %v1229_v23  ;;  %v1126_v4 = vadd.f32 0.2548296, %v1094_v9  ;;  %v1037_v31 = vmul.f32 %v5136_v12, %v1005_v39  ;;  %4015 = vpow2.f32 %v1264_v29  ;;  %6908 = vst [vmem:[#allocation36_spill] sm:$0xff] %v5177_v26 }
 0x200   : > { %v1068_v3 = vadd.f32 -0.28449672, %v1036_v28  ;;  %v942_v21 = vadd.f32 -1.4531521, %v910_v52  ;;  %v1128_v24 = vadd.f32 0.2548296, %v1096_v5  ;;  %v1099_v33 = vmul.f32 %v5114_v44, %v1067_v46 }
 0x201   : > { %v911_v45 = vmul.f32 1.0614054, %v5168_v8  ;;  %v1069_v23 = vadd.f32 -0.28449672, %v1037_v31  ;;  %v1198_v42 = vmul.f32 %v5088_v10, %v5088_v10  ;;  %v1130_v5 = vadd.f32 0.2548296, %v1098_v11 }
 0x202   : > { %v974_v9 = vmul.f32 %v5154_v20, %v942_v21  ;;  %v5186_v22 = vmul.f32 0.5, %v5027_v16  ;;  %4017 = vpow2.f32 %v1266_v56  ;;  %v1100_v46 = vmul.f32 %v5126_v7, %v1068_v3 }
 0x203   : > { %v943_v29 = vadd.f32 -1.4531521, %v911_v45  ;;  %v5190_v52 = vpop.eup %4005  ;;  %v1199_v21 = vmul.f32 %v5100_v25, %v5100_v25  ;;  %v721_v10 = vand.u32 2147483647, %v5166_v0  ;;  %v1158_v15 = vmul.f32 %v5058_v37, %v1126_v4 }
 0x204   : > { %v5175_v27 = vpop.f32.mrb[24].mxu0  ;;  %6909 = vst [vmem:[#allocation37_spill] sm:$0xff] %v5186_v22  ;;  %v1006_v31 = vadd.f32 1.4214138, %v974_v9  ;;  %v4008_v11 = vpop.eup %4007  ;;  %v1160_v56 = vmul.f32 %v5066_v49, %v1128_v24  ;;  %v912_v22 = vmul.f32 1.0614054, %v5190_v52  ;;  %v1101_v9 = vmul.f32 %v5136_v12, %v1069_v23 }
 0x205   : > { %v5183_v28 = vpop.f32.mrb[25].mxu0  ;;  %v975_v45 = vmul.f32 %v5168_v8, %v943_v29  ;;  %v5202_v61 = vpop.eup %4009  ;;  %v1131_v3 = vadd.f32 0.2548296, %v1099_v33  ;;  %v1230_v30 = vsub.f32 0.0, %v1198_v42  ;;  %v5205_v25 = vmul.f32 0.70710677, %v721_v10 }
 0x206   : > { %v5188_v39 = vpop.f32.mrb[26].mxu0  ;;  %6912 = vst [vmem:[#allocation40_spill] sm:$0xff] %v5202_v61  ;;  %v4012_v14 = vpop.eup %4011  ;;  %4019 = vpow2.f32 %v1268_v40  ;;  %v1038_v26 = vmul.f32 %v5154_v20, %v1006_v31  ;;  %v944_v37 = vadd.f32 -1.4531521, %v912_v22  ;;  %v1162_v24 = vmul.f32 %v5107_v38, %v1130_v5 }
 0x207   : > { %6910 = vst [vmem:[#allocation38_spill] sm:$0xff] %v5188_v39  ;;  %v5196_v50 = vpop.f32.mrb[27].mxu0  ;;  %v4014_v49 = vpop.eup %4013  ;;  %v1132_v29 = vadd.f32 0.2548296, %v1100_v46  ;;  %v1231_v39 = vsub.f32 0.0, %v1199_v21  ;;  %v1318_v61 = vmul.f32 %v4008_v11, %v1158_v15  ;;  %v1320_v23 = vmul.f32 %v4012_v14, %v1160_v56 }
 0x208   : > { %6911 = vst [vmem:[#allocation39_spill] sm:$0xff] %v5196_v50  ;;  %v1007_v50 = vadd.f32 1.4214138, %v975_v45  ;;  %v785_v33 = vmul.f32 0.3275911, %v5205_v25  ;;  %v976_v10 = vmul.f32 %v5190_v52, %v944_v37  ;;  %v5215_v40 = vmul.f32 0.5, %v5030_v17 }
 0x209   : > { %v5218_v22 = vmul.f32 0.5, %v5033_v18  ;;  %v1133_v31 = vadd.f32 0.2548296, %v1101_v9  ;;  %v1270_v45 = vmul.f32 1.442695, %v1230_v30  ;;  %v1163_v38 = vmul.f32 %v5114_v44, %v1131_v3 }
 0x20a   : > { %v1039_v42 = vmul.f32 %v5168_v8, %v1007_v50  ;;  %v1070_v5 = vadd.f32 -0.28449672, %v1038_v26  ;;  %v1008_v46 = vadd.f32 1.4214138, %v976_v10  ;;  %v1200_v14 = vmul.f32 %v5129_v13, %v5129_v13 }
 0x20b   : > { %6914 = vst [vmem:[#allocation42_spill] sm:$0xff] %v5218_v22  ;;  %v1322_v50 = vmul.f32 %v4014_v49, %v1162_v24  ;;  %v1164_v15 = vmul.f32 %v5126_v7, %v1132_v29  ;;  %v817_v21 = vadd.f32 1.0, %v785_v33  ;;  %v5228_v11 = vadd.f32 %v5064_v48, %v5005_v54 }
 0x20c   : > { %v5208_v4 = vpop.f32.mrb[28].mxu0  ;;  %v1350_v56 = vsub.f32 1.0, %v1318_v61  ;;  %v1352_v44 = vsub.f32 1.0, %v1320_v23  ;;  %v1071_v26 = vadd.f32 -0.28449672, %v1039_v42  ;;  %v1165_v9 = vmul.f32 %v5136_v12, %v1133_v31 }
 0x20d   : > { %6913 = vst [vmem:[#allocation41_spill] sm:$0xff] %v5208_v4  ;;  %v4016_v4 = vpop.eup %4015  ;;  %v1272_v3 = vmul.f32 1.442695, %v1231_v39  ;;  %v5232_v13 = vmul.f32 0.5, %v5036_v19  ;;  %v1040_v37 = vmul.f32 %v5190_v52, %v1008_v46  ;;  %4021 = vrcp.f32 %v817_v21 }
 0x20e   : > { %v4018_v30 = vpop.eup %4017  ;;  %v5236_v7 = vmul.f32 %v4016_v4, %v1163_v38  ;;  %v1102_v48 = vmul.f32 %v5154_v20, %v1070_v5  ;;  %v5240_v49 = vmul.f32 0.5, %v5069_v53  ;;  %v1232_v61 = vsub.f32 0.0, %v1200_v14 }
 0x20f   : > { %v1354_v24 = vsub.f32 1.0, %v1322_v50  ;;  %v1324_v39 = vmul.f32 %v4018_v30, %v1164_v15  ;;  %4023 = vpow2.f32 %v1270_v45  ;;  %v722_v12 = vand.u32 2147483647, %v5228_v11 }
 0x210   : > { %6915 = vst [vmem:[#allocation43_spill] sm:$0xff] %v5240_v49  ;;  %v4020_v29 = vpop.eup %4019  ;;  %v1414_v33 = vsub.f32 0.0, %v1350_v56  ;;  %v1416_v23 = vsub.f32 0.0, %v1352_v44  ;;  %v1103_v42 = vmul.f32 %v5168_v8, %v1071_v26  ;;  %4025 = vpow2.f32 %v1272_v3 }
 0x211   : > { %v1325_v10 = vmul.f32 %v4020_v29, %v1165_v9  ;;  %v1072_v4 = vadd.f32 -0.28449672, %v1040_v37  ;;  %v5244_v31 = vmul.f32 0.70710677, %v722_v12  ;;  %v5248_v38 = vadd.f32 %v5071_v55, %v5020_v6 }
 0x212   : > { %v1355_v5 = vsub.f32 1.0, %v5236_v7  ;;  %v1134_v45 = vadd.f32 0.2548296, %v1102_v48  ;;  %v1274_v46 = vmul.f32 1.442695, %v1232_v61  ;;  %v5254_v14 = vadd.f32 %v5077_v60, %v5005_v54 }
 0x213   : > { %v1418_v50 = vsub.f32 0.0, %v1354_v24  ;;  %v1356_v15 = vsub.f32 1.0, %v1324_v39  ;;  %v786_v21 = vmul.f32 0.3275911, %v5244_v31  ;;  %v723_v30 = vand.u32 2147483647, %v5248_v38 }
 0x214   : > { %v1446_v55 = vsel %vm1382_vm0, %v1350_v56, %v1414_v33  ;;  %v1448_v26 = vsel %vm1384_vm1, %v1352_v44, %v1416_v23  ;;  %v1135_v3 = vadd.f32 0.2548296, %v1103_v42  ;;  %v5265_v60 = vmul.f32 0.5, %v5075_v59 }
 0x215   : > { %v1357_v9 = vsub.f32 1.0, %v1325_v10  ;;  %v1104_v37 = vmul.f32 %v5190_v52, %v1072_v4  ;;  %v818_v7 = vadd.f32 1.0, %v786_v21  ;;  %v5268_v48 = vmul.f32 0.70710677, %v723_v30 }
 0x216   : > { %6916 = vst [vmem:[#allocation44_spill] sm:$0xff] %v5265_v60  ;;  %v1419_v61 = vsub.f32 0.0, %v1355_v5  ;;  %v1166_v39 = vmul.f32 %v5154_v20, %v1134_v45  ;;  %4027 = vpow2.f32 %v1274_v46  ;;  %v724_v58 = vand.u32 2147483647, %v5254_v14 }
 0x217   : > { %v5272_v63 = vpop.eup %4021  ;;  %v1450_v56 = vsel %vm1386_vm2, %v1354_v24, %v1418_v50  ;;  %v1420_v44 = vsub.f32 0.0, %v1356_v15  ;;  %4029 = vrcp.f32 %v818_v7  ;;  %v787_v12 = vmul.f32 0.3275911, %v5268_v48 }
 0x218   : > { %v1167_v29 = vmul.f32 %v5168_v8, %v1135_v3  ;;  %v913_v33 = vmul.f32 1.0614054, %v5272_v63  ;;  %v1201_v23 = vmul.f32 %v5205_v25, %v5205_v25  ;;  %v5281_v20 = vmul.f32 0.70710677, %v724_v58  ;;  %v5297_v58 = vpop.f32.mrb[29].mxu0 }
 0x219   : > { %v4024_v42 = vpop.eup %4023  ;;  %v5283_v10 = vadd.f32 1.0, %v1446_v55  ;;  %v1421_v4 = vsub.f32 0.0, %v1357_v9  ;;  %v1136_v45 = vadd.f32 0.2548296, %v1104_v37  ;;  %v819_v16 = vadd.f32 1.0, %v787_v12 }
 0x21a   : > { %v4026_v24 = vpop.eup %4025  ;;  %v1326_v46 = vmul.f32 %v4024_v42, %v1166_v39  ;;  %v5286_v50 = vmul.f32 0.5, %v5103_v34  ;;  %v945_v21 = vadd.f32 -1.4531521, %v913_v33  ;;  %v788_v8 = vmul.f32 0.3275911, %v5281_v20 }
 0x21b   : > { %v5289_v30 = vadd.f32 1.0, %v1448_v26  ;;  %v5291_v3 = vadd.f32 1.0, %v1450_v56  ;;  %v1451_v25 = vsel %vm1387_vm3, %v1355_v5, %v1419_v61  ;;  %4031 = vrcp.f32 %v819_v16 }
 0x21c   : > { %6917 = vst [vmem:[#allocation45_spill] sm:$0xff] %v5286_v50  ;;  %v1452_v55 = vsel %vm1388_vm4, %v1356_v15, %v1420_v44  ;;  %v1327_v37 = vmul.f32 %v4026_v24, %v1167_v29  ;;  %v1233_v7 = vsub.f32 0.0, %v1201_v23  ;;  %v820_v39 = vadd.f32 1.0, %v788_v8 }
 0x21d   : > { %v1453_v12 = vsel %vm1389_vm5, %v1357_v9, %v1421_v4  ;;  %v1168_v26 = vmul.f32 %v5190_v52, %v1136_v45  ;;  %v5304_v56 = vadd.f32 %v5083_v2, %v5020_v6  ;;  %v5308_v17 = vadd.f32 %v5105_v35, %v5005_v54 }
 0x21e   : > { %v1358_v18 = vsub.f32 1.0, %v1326_v46  ;;  %v977_v5 = vmul.f32 %v5272_v63, %v945_v21  ;;  %4033 = vrcp.f32 %v820_v39  ;;  %v5314_v19 = vadd.f32 %v5112_v43, %v5020_v6 }
 0x21f   : > { %v5316_v15 = vadd.f32 1.0, %v1451_v25  ;;  %v5318_v52 = vadd.f32 1.0, %v1452_v55  ;;  %v725_v2 = vand.u32 2147483647, %v5304_v56  ;;  %v726_v9 = vand.u32 2147483647, %v5308_v17 }
 0x220   : > { %v4028_v35 = vpop.eup %4027  ;;  %v5322_v61 = vadd.f32 1.0, %v1453_v12  ;;  %v1359_v44 = vsub.f32 1.0, %v1327_v37  ;;  %v1276_v29 = vmul.f32 1.442695, %v1233_v7  ;;  %v5326_v33 = vmul.f32 0.5, %v5166_v0 }
 0x221   : > { %6918 = vst [vmem:[#allocation46_spill] sm:$0xff] %v5318_v52  ;;  %v5328_v43 = vpop.eup %4029  ;;  %v1328_v23 = vmul.f32 %v4028_v35, %v1168_v26  ;;  %v5330_v42 = vmul.f32 0.70710677, %v725_v2  ;;  %v5332_v4 = vmul.f32 0.70710677, %v726_v9  ;;  %v1422_v16 = vsub.f32 0.0, %v1358_v18 }
 0x222   : > { %6919 = vst [vmem:[#allocation47_spill] sm:$0xff] %v5326_v33  ;;  %v727_v45 = vand.u32 2147483647, %v5314_v19  ;;  %v1009_v24 = vadd.f32 1.4214138, %v977_v5  ;;  %v5337_v21 = vmul.f32 0.5, %v5228_v11  ;;  %v1202_v8 = vmul.f32 %v5244_v31, %v5244_v31 }
 0x223   : > { %v914_v46 = vmul.f32 1.0614054, %v5328_v43  ;;  %v789_v25 = vmul.f32 0.3275911, %v5330_v42  ;;  %v790_v55 = vmul.f32 0.3275911, %v5332_v4  ;;  %v5345_v37 = vadd.f32 %v5118_v47, %v5005_v54 }
 0x224   : > { %6920 = vst [vmem:[#allocation48_spill] sm:$0xff] %v5337_v21  ;;  %v1423_v7 = vsub.f32 0.0, %v1359_v44  ;;  %v5348_v12 = vmul.f32 0.5, %v5248_v38  ;;  %v5350_v26 = vmul.f32 0.70710677, %v727_v45  ;;  %v1360_v2 = vsub.f32 1.0, %v1328_v23 }
 0x225   : > { %v946_v39 = vadd.f32 -1.4531521, %v914_v46  ;;  %v5352_v5 = vpop.eup %4031  ;;  %v1203_v31 = vmul.f32 %v5268_v48, %v5268_v48  ;;  %v821_v9 = vadd.f32 1.0, %v789_v25  ;;  %v822_v35 = vadd.f32 1.0, %v790_v55 }
 0x226   : > { %6921 = vst [vmem:[#allocation49_spill] sm:$0xff] %v5348_v12  ;;  %v1041_v47 = vmul.f32 %v5272_v63, %v1009_v24  ;;  %v915_v46 = vmul.f32 1.0614054, %v5352_v5  ;;  %v791_v12 = vmul.f32 0.3275911, %v5350_v26  ;;  %v1454_v45 = vsel %vm1390_vm6, %v1358_v18, %v1422_v16 }
 0x227   : > { %v978_v21 = vmul.f32 %v5328_v43, %v946_v39  ;;  %v1204_v23 = vmul.f32 %v5281_v20, %v5281_v20  ;;  %4035 = vrcp.f32 %v821_v9  ;;  %v728_v50 = vand.u32 2147483647, %v5345_v37 }
 0x228   : > { %v5366_v48 = vpop.eup %4033  ;;  %v1234_v55 = vsub.f32 0.0, %v1202_v8  ;;  %v947_v24 = vadd.f32 -1.4531521, %v915_v46  ;;  %4037 = vrcp.f32 %v822_v35  ;;  %v1455_v39 = vsel %vm1391_vm7, %v1359_v44, %v1423_v7 }
 0x229   : > { %v1010_v25 = vadd.f32 1.4214138, %v978_v21  ;;  %v1235_v49 = vsub.f32 0.0, %v1203_v31  ;;  %v916_v33 = vmul.f32 1.0614054, %v5366_v48  ;;  %v823_v53 = vadd.f32 1.0, %v791_v12 }
 0x22a   : > { %v1424_v18 = vsub.f32 0.0, %v1360_v2  ;;  %v1073_v16 = vadd.f32 -0.28449672, %v1041_v47  ;;  %v979_v9 = vmul.f32 %v5352_v5, %v947_v24  ;;  %v1236_v52 = vsub.f32 0.0, %v1204_v23  ;;  %v5381_v47 = vpop.f32.mrb[30].mxu0 }
 0x22b   : > { %v1042_v20 = vmul.f32 %v5328_v43, %v1010_v25  ;;  %v948_v60 = vadd.f32 -1.4531521, %v916_v33  ;;  %4039 = vrcp.f32 %v823_v53  ;;  %v5373_v21 = vmul.f32 0.70710677, %v728_v50 }
 0x22c   : > { %4041 = vpow2.f32 %v1276_v29  ;;  %v1278_v35 = vmul.f32 1.442695, %v1234_v55  ;;  %v1011_v59 = vadd.f32 1.4214138, %v979_v9  ;;  %v5375_v44 = vadd.f32 1.0, %v1454_v45 }
 0x22d   : > { %v1074_v8 = vadd.f32 -0.28449672, %v1042_v20  ;;  %v5377_v7 = vadd.f32 1.0, %v1455_v39  ;;  %v980_v12 = vmul.f32 %v5366_v48, %v948_v60  ;;  %v792_v31 = vmul.f32 0.3275911, %v5373_v21 }
 0x22e   : > { %6922 = vst [vmem:[#allocation50_spill] sm:$0xff] %v5375_v44  ;;  %v1456_v33 = vsel %vm1392_vm8, %v1360_v2, %v1424_v18  ;;  %v1105_v50 = vmul.f32 %v5272_v63, %v1073_v16  ;;  %v1043_v29 = vmul.f32 %v5352_v5, %v1011_v59  ;;  %v1280_v46 = vmul.f32 1.442695, %v1235_v49 }
 0x22f   : > { %6923 = vst [vmem:[#allocation51_spill] sm:$0xff] %v5377_v7  ;;  %v1012_v23 = vadd.f32 1.4214138, %v980_v12  ;;  %v1282_v25 = vmul.f32 1.442695, %v1236_v52  ;;  %v824_v45 = vadd.f32 1.0, %v792_v31  ;;  %v5389_v55 = vadd.f32 %v5123_v57, %v5020_v6 }
 0x230   : > { %v1106_v60 = vmul.f32 %v5328_v43, %v1074_v8  ;;  %4043 = vpow2.f32 %v1278_v35  ;;  %v1075_v24 = vadd.f32 -0.28449672, %v1043_v29  ;;  %v5393_v39 = vmul.f32 0.5, %v5254_v14 }
 0x231   : > { %v5395_v34 = vpop.eup %4035  ;;  %v5397_v2 = vadd.f32 1.0, %v1456_v33  ;;  %v1205_v49 = vmul.f32 %v5330_v42, %v5330_v42  ;;  %v5402_v52 = vmul.f32 0.5, %v5304_v56  ;;  %4045 = vrcp.f32 %v824_v45 }
 0x232   : > { %6924 = vst [vmem:[#allocation52_spill] sm:$0xff] %v5393_v39  ;;  %v5404_v57 = vpop.eup %4037  ;;  %v1137_v53 = vadd.f32 0.2548296, %v1105_v50  ;;  %4047 = vpow2.f32 %v1280_v46  ;;  %v917_v18 = vmul.f32 1.0614054, %v5395_v34  ;;  %v1044_v20 = vmul.f32 %v5366_v48, %v1012_v23  ;;  %v5423_v23 = vpop.f32.mrb[31].mxu0 }
 0x233   : > { %6925 = vst [vmem:[#allocation53_spill] sm:$0xff] %v5397_v2  ;;  %6926 = vst [vmem:[#allocation54_spill] sm:$0xff] %v5402_v52  ;;  %v729_v16 = vand.u32 2147483647, %v5389_v55  ;;  %4049 = vpow2.f32 %v1282_v25  ;;  %v918_v9 = vmul.f32 1.0614054, %v5404_v57  ;;  %v1107_v35 = vmul.f32 %v5352_v5, %v1075_v24 }
 0x234   : > { %v5411_v8 = vmul.f32 0.5, %v5308_v17  ;;  %v1138_v42 = vadd.f32 0.2548296, %v1106_v60  ;;  %v949_v59 = vadd.f32 -1.4531521, %v917_v18  ;;  %v1237_v33 = vsub.f32 0.0, %v1205_v49 }
 0x235   : > { %v5414_v12 = vmul.f32 0.70710677, %v729_v16  ;;  %v5416_v31 = vpop.eup %4039  ;;  %v950_v50 = vadd.f32 -1.4531521, %v918_v9  ;;  %v1206_v29 = vmul.f32 %v5332_v4, %v5332_v4  ;;  %v5421_v46 = vmul.f32 0.5, %v5314_v19 }
 0x236   : > { %6927 = vst [vmem:[#allocation55_spill] sm:$0xff] %v5411_v8  ;;  %v4042_v25 = vpop.eup %4041  ;;  %v1169_v45 = vmul.f32 %v5272_v63, %v1137_v53  ;;  %v981_v60 = vmul.f32 %v5395_v34, %v949_v59  ;;  %v919_v24 = vmul.f32 1.0614054, %v5416_v31  ;;  %v1207_v18 = vmul.f32 %v5350_v26, %v5350_v26 }
 0x237   : > { %6928 = vst [vmem:[#allocation56_spill] sm:$0xff] %v5421_v46  ;;  %v1076_v49 = vadd.f32 -0.28449672, %v1044_v20  ;;  %v982_v16 = vmul.f32 %v5404_v57, %v950_v50  ;;  %v793_v4 = vmul.f32 0.3275911, %v5414_v12  ;;  %v5434_v9 = vadd.f32 %v5143_v32, %v5005_v54 }
 0x238   : > { %v1170_v8 = vmul.f32 %v5328_v43, %v1138_v42  ;;  %v1139_v46 = vadd.f32 0.2548296, %v1107_v35  ;;  %v1013_v63 = vadd.f32 1.4214138, %v981_v60  ;;  %v951_v53 = vadd.f32 -1.4531521, %v919_v24 }
 0x239   : > { %v1284_v59 = vmul.f32 1.442695, %v1237_v33  ;;  %v1014_v39 = vadd.f32 1.4214138, %v982_v16  ;;  %v1238_v52 = vsub.f32 0.0, %v1206_v29  ;;  %v825_v2 = vadd.f32 1.0, %v793_v4 }
 0x23a   : > { %v4044_v44 = vpop.eup %4043  ;;  %v1329_v26 = vmul.f32 %v4042_v25, %v1169_v45  ;;  %v1045_v20 = vmul.f32 %v5395_v34, %v1013_v63  ;;  %v983_v50 = vmul.f32 %v5416_v31, %v951_v53  ;;  %v1239_v7 = vsub.f32 0.0, %v1207_v18 }
 0x23b   : > { %v5439_v22 = vpop.eup %4045  ;;  %v1108_v32 = vmul.f32 %v5366_v48, %v1076_v49  ;;  %v1046_v43 = vmul.f32 %v5404_v57, %v1014_v39  ;;  %v1208_v42 = vmul.f32 %v5373_v21, %v5373_v21  ;;  %4051 = vrcp.f32 %v825_v2 }
 0x23c   : > { %v4048_v35 = vpop.eup %4047  ;;  %v1330_v33 = vmul.f32 %v4044_v44, %v1170_v8  ;;  %v1171_v29 = vmul.f32 %v5352_v5, %v1139_v46  ;;  %v1015_v25 = vadd.f32 1.4214138, %v983_v50  ;;  %v730_v45 = vand.u32 2147483647, %v5434_v9 }
 0x23d   : > { %v4050_v60 = vpop.eup %4049  ;;  %4053 = vrcp.f32 %v5172_v62  ;;  %vm1393_vm9 = vcmp.ge.f32.partialorder %v5166_v0, 0.0  ;;  %v1077_v24 = vadd.f32 -0.28449672, %v1045_v20  ;;  %v1078_v18 = vadd.f32 -0.28449672, %v1046_v43 }
 0x23e   : > { %v920_v39 = vmul.f32 1.0614054, %v5439_v22  ;;  %v1361_v49 = vsub.f32 1.0, %v1329_v26  ;;  %v1286_v16 = vmul.f32 1.442695, %v1238_v52  ;;  %v1047_v21 = vmul.f32 %v5416_v31, %v1015_v25 }
 0x23f   : > { %v1288_v2 = vmul.f32 1.442695, %v1239_v7  ;;  %vm1394_vm10 = vcmp.ge.f32.partialorder %v5228_v11, 0.0  ;;  %v1140_v5 = vadd.f32 0.2548296, %v1108_v32  ;;  %4055 = vpow2.f32 %v1284_v59 }
 0x240   : > { %v952_v44 = vadd.f32 -1.4531521, %v920_v39  ;;  %v1240_v8 = vsub.f32 0.0, %v1208_v42  ;;  %v1362_v46 = vsub.f32 1.0, %v1330_v33  ;;  %v1331_v4 = vmul.f32 %v4048_v35, %v1171_v29 }
 0x241   : > { %v1079_v62 = vadd.f32 -0.28449672, %v1047_v21  ;;  %v762_v63 = vmul.f32 0.70710677, %v730_v45  ;;  %v1109_v53 = vmul.f32 %v5395_v34, %v1077_v24  ;;  %v1110_v20 = vmul.f32 %v5404_v57, %v1078_v18 }
 0x242   : > { %v984_v26 = vmul.f32 %v5439_v22, %v952_v44  ;;  %v5457_v52 = vadd.f32 %v5147_v1, %v5020_v6  ;;  %v1425_v7 = vsub.f32 0.0, %v1361_v49  ;;  %4057 = vpow2.f32 %v1286_v16 }
 0x243   : > { %v1111_v59 = vmul.f32 %v5416_v31, %v1079_v62  ;;  %v794_v50 = vmul.f32 0.3275911, %v762_v63  ;;  %vm1395_vm11 = vcmp.ge.f32.partialorder %v5248_v38, 0.0  ;;  %v1172_v32 = vmul.f32 %v5366_v48, %v1140_v5 }
 0x244   : > { %4059 = vpow2.f32 %v1288_v2  ;;  %v1016_v43 = vadd.f32 1.4214138, %v984_v26  ;;  %v731_v42 = vand.u32 2147483647, %v5457_v52  ;;  %v1426_v35 = vsub.f32 0.0, %v1362_v46 }
 0x245   : > { %v1363_v33 = vsub.f32 1.0, %v1331_v4  ;;  %v1290_v29 = vmul.f32 1.442695, %v1240_v8  ;;  %v826_v25 = vadd.f32 1.0, %v794_v50  ;;  %v5463_v45 = vpop.eup %4051  ;;  %v1141_v1 = vadd.f32 0.2548296, %v1109_v53 }
 0x246   : > { %v1142_v24 = vadd.f32 0.2548296, %v1110_v20  ;;  %v1048_v18 = vmul.f32 %v5439_v22, %v1016_v43  ;;  %v5466_v39 = vmul.f32 0.70710677, %v731_v42  ;;  %v1457_v16 = vsel %vm1393_vm9, %v1361_v49, %v1425_v7 }
 0x247   : > { %v1143_v48 = vadd.f32 0.2548296, %v1111_v59  ;;  %v921_v21 = vmul.f32 1.0614054, %v5463_v45  ;;  %4061 = vrcp.f32 %v826_v25  ;;  %v5471_v2 = vpop.eup %4053  ;;  %v5473_v5 = vmul.f32 %v4050_v60, %v1172_v32 }
 0x248   : > { %v1080_v44 = vadd.f32 -0.28449672, %v1048_v18  ;;  %v5476_v8 = vmul.f32 0.5, %v5345_v37  ;;  %v1209_v4 = vmul.f32 %v5414_v12, %v5414_v12  ;;  %v1458_v62 = vsel %vm1394_vm10, %v1362_v46, %v1426_v35 }
 0x249   : > { %v1427_v0 = vsub.f32 0.0, %v1363_v33  ;;  %v953_v49 = vadd.f32 -1.4531521, %v921_v21  ;;  %v795_v53 = vmul.f32 0.3275911, %v5466_v39  ;;  %v4056_v20 = vpop.eup %4055  ;;  %v5483_v26 = vadd.f32 1.0, %v1457_v16 }
 0x24a   : > { %6929 = vst [vmem:[#allocation57_spill] sm:$0xff] %v5476_v8  ;;  %v1173_v60 = vmul.f32 %v5395_v34, %v1141_v1  ;;  %v1174_v7 = vmul.f32 %v5404_v57, %v1142_v24  ;;  %4063 = vpow2.f32 %v1290_v29  ;;  %v1175_v59 = vmul.f32 %v5416_v31, %v1143_v48 }
 0x24b   : > { %v985_v50 = vmul.f32 %v5463_v45, %v953_v49  ;;  %v5490_v12 = vmul.f32 0.5, %v5389_v55  ;;  %v827_v11 = vadd.f32 1.0, %v795_v53  ;;  %v5492_v46 = vadd.f32 1.0, %v1458_v62 }
 0x24c   : > { %v1364_v32 = vsub.f32 1.0, %v5473_v5  ;;  %vm1396_vm12 = vcmp.ge.f32.partialorder %v5254_v14, 0.0  ;;  %v1112_v43 = vmul.f32 %v5439_v22, %v1080_v44  ;;  %v1241_v34 = vsub.f32 0.0, %v1209_v4  ;;  %v4058_v42 = vpop.eup %4057 }
 0x24d   : > { %v1459_v57 = vsel %vm1395_vm11, %v1363_v33, %v1427_v0  ;;  %v1017_v31 = vadd.f32 1.4214138, %v985_v50  ;;  %v5500_v35 = vmul.f32 0.5, %v5434_v9  ;;  %4065 = vrcp.f32 %v827_v11 }
 0x24e   : > { %v4060_v29 = vpop.eup %4059  ;;  %v1333_v25 = vmul.f32 %v4056_v20, %v1173_v60  ;;  %v1334_v1 = vmul.f32 %v4058_v42, %v1174_v7  ;;  %v1210_v24 = vmul.f32 %v762_v63, %v762_v63  ;;  %v5504_v18 = vadd.f32 %v5150_v36, %v5005_v54 }
 0x24f   : > { %6930 = vst [vmem:[#allocation58_spill] sm:$0xff] %v5500_v35  ;;  %v1335_v16 = vmul.f32 %v4060_v29, %v1175_v59  ;;  %v1049_v48 = vmul.f32 %v5463_v45, %v1017_v31  ;;  %v5509_v38 = vadd.f32 %v5152_v51, %v5020_v6  ;;  %v5513_v33 = vadd.f32 %v5175_v27, %v5005_v54 }
 0x250   : > { %4067 = vpow2.f32 %v5157_v41  ;;  %v1144_v21 = vadd.f32 0.2548296, %v1112_v43  ;;  %v1292_v5 = vmul.f32 1.442695, %v1241_v34  ;;  %v732_v63 = vand.u32 2147483647, %v5504_v18 }
 0x251   : > { %v5517_v44 = vpop.eup %4061  ;;  %v5519_v36 = vadd.f32 1.0, %v1459_v57  ;;  %v1428_v4 = vsub.f32 0.0, %v1364_v32  ;;  %v1081_v62 = vadd.f32 -0.28449672, %v1049_v48  ;;  %v733_v0 = vand.u32 2147483647, %v5509_v38 }
 0x252   : > { %v1365_v51 = vsub.f32 1.0, %v1333_v25  ;;  %vm1397_vm13 = vcmp.ge.f32.partialorder %v5304_v56, 0.0  ;;  %vm1398_vm14 = vcmp.ge.f32.partialorder %v5308_v17, 0.0  ;;  %vm1399_vm15 = vcmp.ge.f32.partialorder %v5314_v19, 0.0  ;;  %v6931_v17 = vld [vmem:[#allocation38_spill] sm:$0xff] }
 0x253   : > { %v922_v41 = vmul.f32 1.0614054, %v5517_v44  ;;  %v1242_v27 = vsub.f32 0.0, %v1210_v24  ;;  %v764_v49 = vmul.f32 0.70710677, %v732_v63  ;;  %v1366_v53 = vsub.f32 1.0, %v1334_v1 }
 0x254   : > { %v1367_v20 = vsub.f32 1.0, %v1335_v16  ;;  %v765_v60 = vmul.f32 0.70710677, %v733_v0  ;;  %v734_v7 = vand.u32 2147483647, %v5513_v33  ;;  %v4064_v59 = vpop.eup %4063  ;;  %v1176_v50 = vmul.f32 %v5439_v22, %v1144_v21 }
 0x255   : > { %4069 = vpow2.f32 %v1292_v5  ;;  %v954_v11 = vadd.f32 -1.4531521, %v922_v41  ;;  %v796_v43 = vmul.f32 0.3275911, %v764_v49  ;;  %v1460_v34 = vsel %vm1396_vm12, %v1364_v32, %v1428_v4 }
 0x256   : > { %v1113_v42 = vmul.f32 %v5463_v45, %v1081_v62  ;;  %v797_v57 = vmul.f32 0.3275911, %v765_v60  ;;  %v5531_v31 = vmul.f32 0.70710677, %v734_v7  ;;  %v1294_v25 = vmul.f32 1.442695, %v1242_v27 }
 0x257   : > { %v986_v29 = vmul.f32 %v5517_v44, %v954_v11  ;;  %v1211_v1 = vmul.f32 %v5466_v39, %v5466_v39  ;;  %v828_v24 = vadd.f32 1.0, %v796_v43  ;;  %v5536_v16 = vpop.eup %4065  ;;  %v1429_v22 = vsub.f32 0.0, %v1365_v51 }
 0x258   : > { %v1430_v48 = vsub.f32 0.0, %v1366_v53  ;;  %v1431_v21 = vsub.f32 0.0, %v1367_v20  ;;  %v829_v5 = vadd.f32 1.0, %v797_v57  ;;  %v5538_v14 = vmul.f32 %v4064_v59, %v1176_v50 }
 0x259   : > { %v1018_v32 = vadd.f32 1.4214138, %v986_v29  ;;  %v923_v63 = vmul.f32 1.0614054, %v5536_v16  ;;  %4071 = vrcp.f32 %v828_v24  ;;  %v5541_v4 = vadd.f32 1.0, %v1460_v34  ;;  %v6932_v24 = vld [vmem:[#allocation39_spill] sm:$0xff] }
 0x25a   : > { %v1145_v62 = vadd.f32 0.2548296, %v1113_v42  ;;  %4073 = vrcp.f32 %v829_v5  ;;  %v798_v0 = vmul.f32 0.3275911, %v5531_v31  ;;  %v5544_v39 = vpop.eup %4067  ;;  %v1243_v7 = vsub.f32 0.0, %v1211_v1 }
 0x25b   : > { %v1050_v41 = vmul.f32 %v5517_v44, %v1018_v32  ;;  %4075 = vpow2.f32 %v1294_v25  ;;  %v955_v27 = vadd.f32 -1.4531521, %v923_v63  ;;  %v1461_v59 = vsel %vm1397_vm13, %v1365_v51, %v1429_v22 }
 0x25c   : > { %v1462_v50 = vsel %vm1398_vm14, %v1366_v53, %v1430_v48  ;;  %v1463_v11 = vsel %vm1399_vm15, %v1367_v20, %v1431_v21  ;;  %v830_v43 = vadd.f32 1.0, %v798_v0  ;;  %v1368_v34 = vsub.f32 1.0, %v5538_v14 }
 0x25d   : > { %v1082_v42 = vadd.f32 -0.28449672, %v1050_v41  ;;  %v987_v57 = vmul.f32 %v5536_v16, %v955_v27  ;;  %v5557_v29 = vadd.f32 %v5183_v28, %v5020_v6  ;;  %vm1400_vm0 = vcmp.ge.f32.partialorder %v5345_v37, 0.0 }
 0x25e   : > { %v1177_v56 = vmul.f32 %v5463_v45, %v1145_v62  ;;  %v1212_v51 = vmul.f32 %v764_v49, %v764_v49  ;;  %4077 = vrcp.f32 %v830_v43  ;;  %v5563_v19 = vadd.f32 %v6931_v17, %v5005_v54 }
 0x25f   : > { %v4070_v53 = vpop.eup %4069  ;;  %v1114_v20 = vmul.f32 %v5517_v44, %v1082_v42  ;;  %v1019_v25 = vadd.f32 1.4214138, %v987_v57  ;;  %v735_v1 = vand.u32 2147483647, %v5557_v29  ;;  %v5569_v28 = vadd.f32 %v6932_v24, %v5020_v6 }
 0x260   : > { %v5571_v22 = vadd.f32 1.0, %v1461_v59  ;;  %v5573_v48 = vadd.f32 1.0, %v1462_v50  ;;  %v1296_v45 = vmul.f32 1.442695, %v1243_v7  ;;  %v736_v49 = vand.u32 2147483647, %v5563_v19 }
 0x261   : > { %v5576_v21 = vadd.f32 1.0, %v1463_v11  ;;  %v1051_v5 = vmul.f32 %v5536_v16, %v1019_v25  ;;  %v5580_v14 = vmul.f32 0.5, %v5457_v52  ;;  %v1213_v32 = vmul.f32 %v765_v60, %v765_v60 }
 0x262   : > { %v5582_v63 = vmul.f32 %v4070_v53, %v1177_v56  ;;  %v1146_v62 = vadd.f32 0.2548296, %v1114_v20  ;;  %v767_v0 = vmul.f32 0.70710677, %v735_v1  ;;  %v768_v41 = vmul.f32 0.70710677, %v736_v49 }
 0x263   : > { %6933 = vst [vmem:[#allocation38_spill] sm:$0xff] %v5580_v14  ;;  %v5584_v27 = vpop.eup %4071  ;;  %v1432_v59 = vsub.f32 0.0, %v1368_v34  ;;  %v1083_v50 = vadd.f32 -0.28449672, %v1051_v5  ;;  %v1244_v7 = vsub.f32 0.0, %v1212_v51  ;;  %4079 = vpow2.f32 %v1296_v45 }
 0x264   : > { %v737_v43 = vand.u32 2147483647, %v5569_v28  ;;  %v5587_v11 = vpop.eup %4073  ;;  %v924_v42 = vmul.f32 1.0614054, %v5584_v27  ;;  %v799_v57 = vmul.f32 0.3275911, %v767_v0  ;;  %v1178_v1 = vmul.f32 %v5517_v44, %v1146_v62 }
 0x265   : > { %v800_v17 = vmul.f32 0.3275911, %v768_v41  ;;  %v4076_v60 = vpop.eup %4075  ;;  %v5591_v56 = vmul.f32 0.5, %v5504_v18  ;;  %v925_v53 = vmul.f32 1.0614054, %v5587_v11  ;;  %v1245_v20 = vsub.f32 0.0, %v1213_v32 }
 0x266   : > { %v5595_v25 = vmul.f32 0.5, %v5509_v38  ;;  %v1369_v51 = vsub.f32 1.0, %v5582_v63  ;;  %v956_v24 = vadd.f32 -1.4531521, %v924_v42  ;;  %v831_v45 = vadd.f32 1.0, %v799_v57 }
 0x267   : > { %6934 = vst [vmem:[#allocation39_spill] sm:$0xff] %v5591_v56  ;;  %v1464_v49 = vsel %vm1400_vm0, %v1368_v34, %v1432_v59  ;;  %vm1401_vm1 = vcmp.ge.f32.partialorder %v5389_v55, 0.0  ;;  %v1115_v5 = vmul.f32 %v5536_v16, %v1083_v50  ;;  %v1298_v56 = vmul.f32 1.442695, %v1244_v7  ;;  %v6941_v55 = vld [vmem:[#allocation36_spill] sm:$0xff] }
 0x268   : > { %6935 = vst [vmem:[#allocation59_spill] sm:$0xff] %v5595_v25  ;;  %v957_v35 = vadd.f32 -1.4531521, %v925_v53  ;;  %v5603_v14 = vpop.eup %4077  ;;  %v988_v32 = vmul.f32 %v5584_v27, %v956_v24  ;;  %4081 = vrcp.f32 %v831_v45  ;;  %v832_v25 = vadd.f32 1.0, %v800_v17 }
 0x269   : > { %v5606_v63 = vmul.f32 0.70710677, %v737_v43  ;;  %v1300_v62 = vmul.f32 1.442695, %v1245_v20  ;;  %v926_v37 = vmul.f32 1.0614054, %v5603_v14  ;;  %v1214_v34 = vmul.f32 %v5531_v31, %v5531_v31 }
 0x26a   : > { %v989_v44 = vmul.f32 %v5587_v11, %v957_v35  ;;  %v1433_v59 = vsub.f32 0.0, %v1369_v51  ;;  %v1338_v50 = vmul.f32 %v4076_v60, %v1178_v1  ;;  %v1020_v7 = vadd.f32 1.4214138, %v988_v32 }
 0x26b   : > { %v801_v42 = vmul.f32 0.3275911, %v5606_v63  ;;  %v1147_v57 = vadd.f32 0.2548296, %v1115_v5  ;;  %4083 = vpow2.f32 %v1298_v56  ;;  %v958_v24 = vadd.f32 -1.4531521, %v926_v37 }
 0x26c   : > { %v1021_v53 = vadd.f32 1.4214138, %v989_v44  ;;  %v1052_v43 = vmul.f32 %v5584_v27, %v1020_v7  ;;  %v1215_v17 = vmul.f32 %v767_v0, %v767_v0  ;;  %4085 = vrcp.f32 %v832_v25  ;;  %v6937_v0 = vld [vmem:[#allocation41_spill] sm:$0xff] }
 0x26d   : > { %v833_v35 = vadd.f32 1.0, %v801_v42  ;;  %vm1402_vm2 = vcmp.ge.f32.partialorder %v5434_v9, 0.0  ;;  %v990_v31 = vmul.f32 %v5603_v14, %v958_v24  ;;  %v1246_v45 = vsub.f32 0.0, %v1214_v34  ;;  %v4080_v1 = vpop.eup %4079 }
 0x26e   : > { %v1053_v20 = vmul.f32 %v5587_v11, %v1021_v53  ;;  %v1216_v60 = vmul.f32 %v768_v41, %v768_v41  ;;  %v5617_v32 = vadd.f32 1.0, %v1464_v49  ;;  %v1370_v5 = vsub.f32 1.0, %v1338_v50 }
 0x26f   : > { %v1084_v56 = vadd.f32 -0.28449672, %v1052_v43  ;;  %4087 = vrcp.f32 %v833_v35  ;;  %v1179_v44 = vmul.f32 %v5536_v16, %v1147_v57  ;;  %v5622_v25 = vadd.f32 %v6937_v0, %v5005_v54 }
 0x270   : > { %6936 = vst [vmem:[#allocation60_spill] sm:$0xff] %v5617_v32  ;;  %v1085_v37 = vadd.f32 -0.28449672, %v1053_v20  ;;  %4089 = vpow2.f32 %v1300_v62  ;;  %v1465_v7 = vsel %vm1401_vm1, %v1369_v51, %v1433_v59  ;;  %v1022_v42 = vadd.f32 1.4214138, %v990_v31 }
 0x271   : > { %6938 = vst [vmem:[#allocation41_spill] sm:$0xff] %v5622_v25  ;;  %v5627_v41 = vmul.f32 0.5, %v5513_v33  ;;  %v1247_v49 = vsub.f32 0.0, %v1215_v17  ;;  %v1116_v34 = vmul.f32 %v5584_v27, %v1084_v56  ;;  %v1302_v50 = vmul.f32 1.442695, %v1246_v45 }
 0x272   : > { %v1248_v53 = vsub.f32 0.0, %v1216_v60  ;;  %v738_v16 = vand.u32 2147483647, %v5622_v25  ;;  %v5631_v57 = vpop.eup %4081  ;;  %v1434_v62 = vsub.f32 0.0, %v1370_v5  ;;  %v1117_v24 = vmul.f32 %v5587_v11, %v1085_v37 }
 0x273   : > { %6939 = vst [vmem:[#allocation61_spill] sm:$0xff] %v5627_v41  ;;  %v5635_v43 = vmul.f32 0.5, %v5557_v29  ;;  %v903_v51 = vmul.f32 1.0614054, %v6941_v55  ;;  %v5638_v59 = vadd.f32 1.0, %v1465_v7  ;;  %v1339_v35 = vmul.f32 %v4080_v1, %v1179_v44 }
 0x274   : > { %v927_v17 = vmul.f32 1.0614054, %v5631_v57  ;;  %v5642_v20 = vmul.f32 0.5, %v5563_v19  ;;  %v1054_v31 = vmul.f32 %v5603_v14, %v1022_v42  ;;  %v1304_v45 = vmul.f32 1.442695, %v1247_v49 }
 0x275   : > { %6940 = vst [vmem:[#allocation62_spill] sm:$0xff] %v5635_v43  ;;  %v770_v60 = vmul.f32 0.70710677, %v738_v16  ;;  %v905_v56 = vmul.f32 1.0614054, %v5471_v2  ;;  %v4084_v37 = vpop.eup %4083  ;;  %4091 = vpow2.f32 %v1302_v50  ;;  %v1466_v1 = vsel %vm1402_vm2, %v1370_v5, %v1434_v62 }
 0x276   : > { %6942 = vst [vmem:[#allocation36_spill] sm:$0xff] %v5642_v20  ;;  %v1148_v0 = vadd.f32 0.2548296, %v1116_v34  ;;  %v959_v25 = vadd.f32 -1.4531521, %v927_v17  ;;  %v5646_v43 = vpop.eup %4085  ;;  %vm1403_vm3 = vcmp.ge.f32.partialorder %v5457_v52, 0.0  ;;  %v1217_v34 = vmul.f32 %v5606_v63, %v5606_v63 }
 0x277   : > { %v1306_v41 = vmul.f32 1.442695, %v1248_v53  ;;  %v1149_v44 = vadd.f32 0.2548296, %v1117_v24  ;;  %v802_v7 = vmul.f32 0.3275911, %v770_v60  ;;  %4093 = vpow2.f32 %v1304_v45 }
 0x278   : > { %v935_v20 = vadd.f32 -1.4531521, %v903_v51  ;;  %v1371_v42 = vsub.f32 1.0, %v1339_v35  ;;  %v991_v49 = vmul.f32 %v5631_v57, %v959_v25  ;;  %v928_v16 = vmul.f32 1.0614054, %v5646_v43 }
 0x279   : > { %v5655_v50 = vpop.eup %4087  ;;  %v1086_v53 = vadd.f32 -0.28449672, %v1054_v31  ;;  %v834_v17 = vadd.f32 1.0, %v802_v7  ;;  %v937_v9 = vadd.f32 -1.4531521, %v905_v56  ;;  %v5657_v62 = vadd.f32 1.0, %v1466_v1 }
 0x27a   : > { %v4090_v5 = vpop.eup %4089  ;;  %v1180_v24 = vmul.f32 %v5584_v27, %v1148_v0  ;;  %v1023_v51 = vadd.f32 1.4214138, %v991_v49  ;;  %v960_v35 = vadd.f32 -1.4531521, %v928_v16  ;;  %v1181_v25 = vmul.f32 %v5587_v11, %v1149_v44 }
 0x27b   : > { %6943 = vst [vmem:[#allocation63_spill] sm:$0xff] %v5657_v62  ;;  %v929_v32 = vmul.f32 1.0614054, %v5655_v50  ;;  %4095 = vrcp.f32 %v834_v17  ;;  %v967_v63 = vmul.f32 %v6941_v55, %v935_v20  ;;  %v1435_v8 = vsub.f32 0.0, %v1371_v42 }
 0x27c   : > { %v1055_v31 = vmul.f32 %v5631_v57, %v1023_v51  ;;  %v992_v45 = vmul.f32 %v5646_v43, %v960_v35  ;;  %v1249_v56 = vsub.f32 0.0, %v1217_v34  ;;  %v1118_v1 = vmul.f32 %v5603_v14, %v1086_v53 }
 0x27d   : > { %4097 = vpow2.f32 %v1306_v41  ;;  %v961_v7 = vadd.f32 -1.4531521, %v929_v32  ;;  %v969_v27 = vmul.f32 %v5471_v2, %v937_v9  ;;  %v5667_v0 = vmul.f32 %v4084_v37, %v1180_v24 }
 0x27e   : > { %v1087_v11 = vadd.f32 -0.28449672, %v1055_v31  ;;  %v1218_v44 = vmul.f32 %v770_v60, %v770_v60  ;;  %v5671_v49 = vadd.f32 %v5297_v58, %v5020_v6  ;;  %v5673_v20 = vmul.f32 %v4090_v5, %v1181_v25 }
 0x27f   : > { %v1024_v16 = vadd.f32 1.4214138, %v992_v45  ;;  %v993_v17 = vmul.f32 %v5655_v50, %v961_v7  ;;  %v999_v34 = vadd.f32 1.4214138, %v967_v63  ;;  %v4092_v51 = vpop.eup %4091  ;;  %v1467_v32 = vsel %vm1403_vm3, %v1371_v42, %v1435_v8 }
 0x280   : > { %6944 = vst [vmem:[#allocation64_spill] sm:$0xff] %v5671_v49  ;;  %v1119_v41 = vmul.f32 %v5631_v57, %v1087_v11  ;;  %v1308_v37 = vmul.f32 1.442695, %v1249_v56  ;;  %v1001_v53 = vadd.f32 1.4214138, %v969_v27  ;;  %v1372_v5 = vsub.f32 1.0, %v5667_v0 }
 0x281   : > { %v1150_v9 = vadd.f32 0.2548296, %v1118_v1  ;;  %v1056_v60 = vmul.f32 %v5646_v43, %v1024_v16  ;;  %v1025_v24 = vadd.f32 1.4214138, %v993_v17  ;;  %v1031_v58 = vmul.f32 %v6941_v55, %v999_v34  ;;  %v4094_v31 = vpop.eup %4093 }
 0x282   : > { %v1250_v35 = vsub.f32 0.0, %v1218_v44  ;;  %v1033_v25 = vmul.f32 %v5471_v2, %v1001_v53  ;;  %v739_v63 = vand.u32 2147483647, %v5671_v49  ;;  %vm1404_vm4 = vcmp.ge.f32.partialorder %v5504_v18, 0.0 }
 0x283   : > { %v1373_v52 = vsub.f32 1.0, %v5673_v20  ;;  %v1088_v8 = vadd.f32 -0.28449672, %v1056_v60  ;;  %v1057_v42 = vmul.f32 %v5655_v50, %v1025_v24  ;;  %v1063_v45 = vadd.f32 -0.28449672, %v1031_v58 }
 0x284   : > { %vm1405_vm5 = vcmp.ge.f32.partialorder %v5509_v38, 0.0  ;;  %v1151_v56 = vadd.f32 0.2548296, %v1119_v41  ;;  %4099 = vpow2.f32 %v1308_v37  ;;  %v1065_v1 = vadd.f32 -0.28449672, %v1033_v25  ;;  %v6945_v25 = vld [vmem:[#allocation32_spill] sm:$0xff] }
 0x285   : > { %v771_v7 = vmul.f32 0.70710677, %v739_v63  ;;  %v5688_v27 = vpop.eup %4095  ;;  %v1182_v0 = vmul.f32 %v5603_v14, %v1150_v9  ;;  %v1120_v11 = vmul.f32 %v5646_v43, %v1088_v8  ;;  %v1089_v44 = vadd.f32 -0.28449672, %v1057_v42  ;;  %v6946_v42 = vld [vmem:[#allocation33_spill] sm:$0xff] }
 0x286   : > { %v1095_v16 = vmul.f32 %v6941_v55, %v1063_v45  ;;  %v1436_v20 = vsub.f32 0.0, %v1372_v5  ;;  %v930_v17 = vmul.f32 1.0614054, %v5688_v27  ;;  %v1097_v34 = vmul.f32 %v5471_v2, %v1065_v1 }
 0x287   : > { %v803_v53 = vmul.f32 0.3275911, %v771_v7  ;;  %v4098_v60 = vpop.eup %4097  ;;  %v1152_v41 = vadd.f32 0.2548296, %v1120_v11  ;;  %v1121_v37 = vmul.f32 %v5655_v50, %v1089_v44  ;;  %v1310_v24 = vmul.f32 1.442695, %v1250_v35 }
 0x288   : > { %v1127_v58 = vadd.f32 0.2548296, %v1095_v16  ;;  %vm1383_vm6 = vcmp.ge.f32.partialorder %v6945_v25, 0.0  ;;  %v1183_v14 = vmul.f32 %v5631_v57, %v1151_v56  ;;  %v962_v9 = vadd.f32 -1.4531521, %v930_v17  ;;  %v6947_v17 = vld [vmem:[#allocation40_spill] sm:$0xff] }
 0x289   : > { %v1129_v63 = vadd.f32 0.2548296, %v1097_v34  ;;  %v835_v8 = vadd.f32 1.0, %v803_v53  ;;  %vm1385_vm7 = vcmp.ge.f32.partialorder %v6946_v42, 0.0  ;;  %v1437_v45 = vsub.f32 0.0, %v1373_v52 }
 0x28a   : > { %v1184_v49 = vmul.f32 %v5646_v43, %v1152_v41  ;;  %v1153_v1 = vadd.f32 0.2548296, %v1121_v37  ;;  %v1159_v62 = vmul.f32 %v6941_v55, %v1127_v58  ;;  %v5702_v11 = vmul.f32 0.5, %v5569_v28 }
 0x28b   : > { %v994_v35 = vmul.f32 %v5688_v27, %v962_v9  ;;  %v1161_v44 = vmul.f32 %v5471_v2, %v1129_v63  ;;  %4101 = vrcp.f32 %v835_v8  ;;  %v5706_v57 = vadd.f32 1.0, %v1467_v32  ;;  %v6948_v9 = vld [vmem:[#allocation34_spill] sm:$0xff] }
 0x28c   : > { %v5708_v56 = vmul.f32 %v4092_v51, %v1182_v0  ;;  %v1185_v16 = vmul.f32 %v5655_v50, %v1153_v1  ;;  %v1319_v34 = vmul.f32 %v6947_v17, %v1159_v62  ;;  %v1468_v43 = vsel %vm1404_vm4, %v1372_v5, %v1436_v20  ;;  %v6949_v62 = vld [vmem:[#allocation35_spill] sm:$0xff] }
 0x28d   : > { %v1343_v55 = vmul.f32 %v4094_v31, %v1183_v14  ;;  %v1321_v53 = vmul.f32 %v5544_v39, %v1161_v44  ;;  %v1219_v41 = vmul.f32 %v771_v7, %v771_v7  ;;  %v1469_v37 = vsel %vm1405_vm5, %v1373_v52, %v1437_v45 }
 0x28e   : > { %v1344_v2 = vmul.f32 %v4098_v60, %v1184_v49  ;;  %4103 = vpow2.f32 %v1310_v24  ;;  %v1351_v32 = vsub.f32 1.0, %v1319_v34  ;;  %v4100_v58 = vpop.eup %4099  ;;  %v1026_v51 = vadd.f32 1.4214138, %v994_v35 }
 0x28f   : > { %v1353_v0 = vsub.f32 1.0, %v1321_v53  ;;  %v1542_v50 = vmul.f32 %v5283_v10, %v6948_v9  ;;  %v1544_v18 = vmul.f32 %v5289_v30, %v6949_v62  ;;  %v1374_v5 = vsub.f32 1.0, %v5708_v56 }
 0x290   : > { %v1345_v31 = vmul.f32 %v4100_v58, %v1185_v16  ;;  %v1415_v39 = vsub.f32 0.0, %v1351_v32  ;;  %v5724_v38 = vadd.f32 %v5381_v47, %v5005_v54  ;;  %vm1406_vm8 = vcmp.ge.f32.partialorder %v5513_v33, 0.0  ;;  %v6950_v33 = vld [vmem:[#allocation37_spill] sm:$0xff] }
 0x291   : > { %v1375_v49 = vsub.f32 1.0, %v1343_v55  ;;  %vm1407_vm9 = vcmp.ge.f32.partialorder %v5557_v29, 0.0  ;;  %v1417_v52 = vsub.f32 0.0, %v1353_v0  ;;  %v1251_v7 = vsub.f32 0.0, %v1219_v41 }
 0x292   : > { %v1574_v20 = vpack.c.bf16 %v1544_v18, %v1542_v50  ;;  %v1376_v10 = vsub.f32 1.0, %v1344_v2  ;;  %vm1408_vm10 = vcmp.ge.f32.partialorder %v5563_v19, 0.0  ;;  %v1447_v30 = vsel %vm1383_vm6, %v1351_v32, %v1415_v39  ;;  %v6953_v19 = vld [vmem:[#allocation44_spill] sm:$0xff] }
 0x293   : > { %v1479_v60 = vmul.f32 0.5, %v6945_v25  ;;  %v740_v24 = vand.u32 2147483647, %v5724_v38  ;;  %vm1409_vm11 = vcmp.ge.f32.partialorder %v5569_v28, 0.0  ;;  %v1058_v54 = vmul.f32 %v5688_v27, %v1026_v51 }
 0x294   : > { %v1449_v47 = vsel %vm1385_vm7, %v1353_v0, %v1417_v52  ;;  %v1511_v14 = vadd.f32 1.0, %v1447_v30  ;;  %v5739_v63 = vadd.f32 %v5423_v23, %v5020_v6  ;;  %v1377_v8 = vsub.f32 1.0, %v1345_v31 }
 0x295   : > { %v1481_v45 = vmul.f32 0.5, %v6946_v42  ;;  %v1513_v1 = vadd.f32 1.0, %v1449_v47  ;;  %v772_v35 = vmul.f32 0.70710677, %v740_v24  ;;  %v5742_v25 = vpop.eup %4101  ;;  %v5744_v44 = vadd.f32 1.0, %v1468_v43 }
 0x296   : > { %v1438_v56 = vsub.f32 0.0, %v1374_v5  ;;  %v1439_v16 = vsub.f32 0.0, %v1375_v49  ;;  %v1312_v17 = vmul.f32 1.442695, %v1251_v7  ;;  %v1543_v34 = vmul.f32 %v1511_v14, %v1479_v60  ;;  %v6956_v14 = vld [vmem:[#allocation43_spill] sm:$0xff] }
 0x297   : > { %v1545_v55 = vmul.f32 %v1513_v1, %v1481_v45  ;;  %v931_v53 = vmul.f32 1.0614054, %v5742_v25  ;;  %v804_v41 = vmul.f32 0.3275911, %v772_v35  ;;  %v5747_v2 = vadd.f32 1.0, %v1469_v37  ;;  %v6958_v1 = vld [vmem:[#allocation45_spill] sm:$0xff] }
 0x298   : > { %v1440_v6 = vsub.f32 0.0, %v1376_v10  ;;  %v1090_v23 = vadd.f32 -0.28449672, %v1058_v54  ;;  %v741_v42 = vand.u32 2147483647, %v5739_v63  ;;  %v5750_v32 = vpop.eup %4103  ;;  %v1441_v58 = vsub.f32 0.0, %v1377_v8 }
 0x299   : > { %v1575_v51 = vpack.c.bf16 %v1545_v55, %v1543_v34  ;;  %v963_v43 = vadd.f32 -1.4531521, %v931_v53  ;;  %v836_v0 = vadd.f32 1.0, %v804_v41  ;;  %4105 = vpow2.f32 %v1312_v17  ;;  %v6955_v54 = vld [vmem:[#allocation47_spill] sm:$0xff] }
 0x29a   : > { %v773_v9 = vmul.f32 0.70710677, %v741_v42  ;;  %v1547_v50 = vmul.f32 %v5316_v15, %v5215_v40  ;;  %v1549_v62 = vmul.f32 %v5322_v61, %v5232_v13  ;;  %v1470_v37 = vsel %vm1406_vm8, %v1374_v5, %v1438_v56  ;;  %v6951_v5 = vld [vmem:[#allocation42_spill] sm:$0xff] }
 0x29b   : > { %v1471_v18 = vsel %vm1407_vm9, %v1375_v49, %v1439_v16  ;;  %1826 = vmatprep.mubr.bf16.mxu1 %v1575_v51  ;;  %v995_v31 = vmul.f32 %v5742_v25, %v963_v43  ;;  %4107 = vrcp.f32 %v836_v0  ;;  %v1472_v39 = vsel %vm1408_vm10, %v1376_v10, %v1440_v6  ;;  %v6952_v49 = vld [vmem:[#allocation46_spill] sm:$0xff]  ;;  %v6954_v10 = vld [vmem:[#allocation51_spill] sm:$0xff]  ;;  %v6960_v6 = vld [vmem:[#allocation49_spill] sm:$0xff] }
 0x29c   : > { %v1122_v52 = vmul.f32 %v5688_v27, %v1090_v23  ;;  %1827 = vmatmul.mubr.bf16.vlgmr.msra.gmra.mrb[0].mxu1 %v1574_v20  ;;  %v805_v40 = vmul.f32 0.3275911, %v773_v9  ;;  %v1577_v15 = vpack.c.bf16 %v1549_v62, %v1547_v50  ;;  %v1473_v13 = vsel %vm1409_vm11, %v1377_v8, %v1441_v58  ;;  %v6957_v8 = vld [vmem:[#allocation50_spill] sm:$0xff]  ;;  %v6962_v58 = vld [vmem:[#allocation48_spill] sm:$0xff] }
 0x29d   : > { %v1027_v61 = vadd.f32 1.4214138, %v995_v31  ;;  %v1546_v29 = vmul.f32 %v5291_v3, %v6950_v33  ;;  %v1548_v7 = vmul.f32 %v6952_v49, %v6951_v5  ;;  %v1220_v30 = vmul.f32 %v772_v35, %v772_v35  ;;  %v6959_v3 = vld [vmem:[#allocation53_spill] sm:$0xff]  ;;  %v6961_v23 = vld [vmem:[#allocation54_spill] sm:$0xff]  ;;  %v6963_v43 = vld [vmem:[#allocation52_spill] sm:$0xff] }
 0x29e   : > { %v837_v60 = vadd.f32 1.0, %v805_v40  ;;  %1836 = vmatprep.mubr.bf16.mxu1 %v1577_v15  ;;  %v1551_v24 = vmul.f32 %v6954_v10, %v6953_v19  ;;  %v1553_v20 = vmul.f32 %v5483_v26, %v6955_v54  ;;  %v1550_v45 = vmul.f32 %v6957_v8, %v6956_v14  ;;  %v6965_v40 = vld [vmem:[#allocation55_spill] sm:$0xff]  ;;  %v6967_v15 = vld [vmem:[#allocation60_spill] sm:$0xff] }
 0x29f   : > { %v1059_v47 = vmul.f32 %v5742_v25, %v1027_v61  ;;  %v1576_v28 = vpack.c.bf16 %v1548_v7, %v1546_v29  ;;  %v1552_v56 = vmul.f32 %v6959_v3, %v6958_v1  ;;  %v1534_v16 = vadd.f32 1.0, %v1470_v37  ;;  %v6964_v37 = vld [vmem:[#allocation56_spill] sm:$0xff]  ;;  %v6971_v7 = vld [vmem:[#allocation63_spill] sm:$0xff] }
 0x2a0   : > { %v1535_v17 = vadd.f32 1.0, %v1471_v18  ;;  %4109 = vrcp.f32 %v837_v60  ;;  %v1579_v35 = vpack.c.bf16 %v1553_v20, %v1551_v24  ;;  %v1536_v34 = vadd.f32 1.0, %v1472_v39  ;;  %v6972_v60 = vld [vmem:[#allocation39_spill] sm:$0xff]  ;;  %v6973_v24 = vld [vmem:[#allocation62_spill] sm:$0xff]  ;;  %v6975_v14 = vld [vmem:[#allocation36_spill] sm:$0xff] }
 0x2a1   : > { %v1537_v55 = vadd.f32 1.0, %v1473_v13  ;;  %v1154_v53 = vadd.f32 0.2548296, %v1122_v52  ;;  %v1578_v41 = vpack.c.bf16 %v1552_v56, %v1550_v45  ;;  %v1555_v26 = vmul.f32 %v5519_v36, %v6960_v6 }
 0x2a2   : > { %v1557_v42 = vmul.f32 %v5571_v22, %v6961_v23  ;;  %v1554_v51 = vmul.f32 %v5492_v46, %v6962_v58  ;;  %v1556_v0 = vmul.f32 %v5541_v4, %v6963_v43  ;;  %v1091_v50 = vadd.f32 -0.28449672, %v1059_v47  ;;  %v6966_v46 = vld [vmem:[#allocation57_spill] sm:$0xff] }
 0x2a3   : > { %v1252_v62 = vsub.f32 0.0, %v1220_v30  ;;  %v1559_v18 = vmul.f32 %v5576_v21, %v6964_v37  ;;  %v1561_v31 = vmul.f32 %v5638_v59, %v5490_v12  ;;  %v4106_v39 = vpop.eup %4105  ;;  %v5793_v22 = vmul.f32 %v5573_v48, %v6965_v40  ;;  %v6968_v21 = vld [vmem:[#allocation38_spill] sm:$0xff]  ;;  %v6969_v12 = vld [vmem:[#allocation59_spill] sm:$0xff]  ;;  %v6974_v47 = vld [vmem:[#allocation61_spill] sm:$0xff] }
 0x2a4   : > { %1837 = vmatmul.mubr.bf16.gmra.mrb[4].mxu1 %v1576_v28  ;;  %v1581_v36 = vpack.c.bf16 %v1557_v42, %v1555_v26  ;;  %v1580_v52 = vpack.c.bf16 %v1556_v0, %v1554_v51  ;;  %v5797_v13 = vmul.f32 %v6967_v15, %v6966_v46  ;;  %v1221_v61 = vmul.f32 %v773_v9, %v773_v9  ;;  %v6970_v48 = vld [vmem:[#allocation58_spill] sm:$0xff] }
 0x2a5   : > { %v4108_v4 = vpop.eup %4107  ;;  %1846 = vmatprep.mubr.bf16.mxu1 %v1579_v35  ;;  %v1583_v33 = vpack.c.bf16 %v1561_v31, %v1559_v18  ;;  %v1563_v29 = vmul.f32 %v5706_v57, %v6968_v21  ;;  %v1565_v59 = vmul.f32 %v5747_v2, %v6969_v12  ;;  %v5807_v30 = vmul.f32 %v6971_v7, %v6970_v48 }
 0x2a6   : > { %v932_v5 = vmul.f32 1.0614054, %v4108_v4  ;;  %v1582_v49 = vpack.c.bf16 %v5797_v13, %v5793_v22  ;;  %v5811_v19 = vmul.f32 %v5744_v44, %v6972_v60  ;;  %v1123_v9 = vmul.f32 %v5742_v25, %v1091_v50  ;;  %v6976_v22 = vld [vmem:[#allocation41_spill] sm:$0xff] }
 0x2a7   : > { %v1585_v10 = vpack.c.bf16 %v1565_v59, %v1563_v29  ;;  %v5815_v57 = vmul.f32 %v1535_v17, %v6973_v24  ;;  %v5818_v2 = vmul.f32 %v1537_v55, %v5702_v11  ;;  %v5823_v28 = vmul.f32 %v1534_v16, %v6974_v47 }
 0x2a8   : > { %v964_v54 = vadd.f32 -1.4531521, %v932_v5  ;;  %v1584_v20 = vpack.c.bf16 %v5811_v19, %v5807_v30  ;;  %v5826_v8 = vmul.f32 %v1536_v34, %v6975_v14  ;;  %v1314_v44 = vmul.f32 1.442695, %v1252_v62  ;;  %v3973_v30 = vld [vmem:[#allocation9 + $0x48] sm:$0xff]  }
 0x2a9   : > { %v1587_v45 = vpack.c.bf16 %v5818_v2, %v5815_v57  ;;  %v1186_v3 = vmul.f32 %v5688_v27, %v1154_v53  ;;  %v1253_v11 = vsub.f32 0.0, %v1221_v61  ;;  %v1155_v35 = vadd.f32 0.2548296, %v1123_v9  ;;  %v3974_v19 = vld [vmem:[#allocation9 + $0x8] sm:$0xff]   ;;  %v3975_v57 = vld [vmem:[#allocation9 + $0x50] sm:$0xff]  }
 0x2aa   : > { %v4110_v1 = vpop.eup %4109  ;;  %v996_v56 = vmul.f32 %v4108_v4, %v964_v54  ;;  %v1586_v17 = vpack.c.bf16 %v5826_v8, %v5823_v28  ;;  %4111 = vpow2.f32 %v1314_v44  ;;  %vm1410_vm12 = vcmp.ge.f32.partialorder %v6976_v22, 0.0  ;;  %v3976_v2 = vld [vmem:[#allocation9 + $0x10] sm:$0xff]   ;;  %v3978_v28 = vld [vmem:[#allocation9 + $0x18] sm:$0xff]   ;;  %v3979_v8 = vld [vmem:[#allocation9 + $0x60] sm:$0xff]  }
 0x2ab   : > { %v933_v55 = vmul.f32 1.0614054, %v4110_v1  ;;  %v1346_v34 = vmul.f32 %v5750_v32, %v1186_v3  ;;  %v1316_v23 = vmul.f32 1.442695, %v1253_v11  ;;  %v1187_v42 = vmul.f32 %v5742_v25, %v1155_v35  ;;  %v1622_v11 = vld [vmem:[%s6978_s21] sm:$0x3] }
 0x2ac   : > { %v1028_v6 = vadd.f32 1.4214138, %v996_v56  ;;  %1847 = vmatmul.mubr.bf16.gmra.mrb[8].mxu1 %v1578_v41  ;;  %vm1412_vm13 = vcmp.ge.f32.partialorder %v5724_v38, 0.0  ;;  %v1508_v5 = vmul.f32 0.5, %v5724_v38  ;;  %vm1413_vm15 = vcmp.ge.f32.partialorder %v5739_v63, 0.0  ;;  %v3971_v56 = vld [vmem:[#allocation9 + $0x40] sm:$0xff]  }
 0x2ad   : > { %v965_v16 = vadd.f32 -1.4531521, %v933_v55  ;;  %1856 = vmatprep.mubr.bf16.mxu1 %v1581_v36  ;;  %v1378_v51 = vsub.f32 1.0, %v1346_v34  ;;  %4113 = vpow2.f32 %v1316_v23  ;;  %v1347_v0 = vmul.f32 %v4106_v39, %v1187_v42  ;;  %3575 = vmatprep.subr.bf16.mxu0 %v3971_v56  ;;  %v3981_v34 = vld [vmem:[#allocation9 + $0x68] sm:$0xff]  }
 0x2ae   : > { %v1060_v26 = vmul.f32 %v4108_v4, %v1028_v6  ;;  %v1509_v14 = vmul.f32 0.5, %v5739_v63  ;;  %v3972_v63 = vld [vmem:[#allocation9] sm:$0xff]   ;;  %3687 = vmatprep.subr.bf16.mxu1 %v3971_v56 }
 0x2af   : > { %v997_v58 = vmul.f32 %v4110_v1, %v965_v16  ;;  %v1442_v37 = vsub.f32 0.0, %v1378_v51  ;;  %v1379_v32 = vsub.f32 1.0, %v1347_v0  ;;  %3576 = vmatpush3.bf16.msra.mxu0 %v3972_v63  ;;  %3695 = vmatpush3.bf16.msra.mxu1 %v3972_v63 }
 0x2b0   : > { %v1092_v27 = vadd.f32 -0.28449672, %v1060_v26  ;;  %3577 = vmatprep.subr.bf16.mxu0 %v3973_v30  ;;  %3688 = vmatprep.subr.bf16.mxu1 %v3973_v30  ;;  %v3982_v26 = vld [vmem:[#allocation9 + $0x28] sm:$0xff]  }
 0x2b1   : > { %v1029_v53 = vadd.f32 1.4214138, %v997_v58  ;;  %v1474_v46 = vsel %vm1410_vm12, %v1378_v51, %v1442_v37  ;;  %v1443_v13 = vsub.f32 0.0, %v1379_v32 }
 0x2b2   : > { %v1124_v43 = vmul.f32 %v4108_v4, %v1092_v27  ;;  %v1538_v29 = vadd.f32 1.0, %v1474_v46 }
 0x2b3   : > { %v1061_v50 = vmul.f32 %v4110_v1, %v1029_v53  ;;  %3578 = vmatpush3.bf16.msra.mxu0 %v3974_v19  ;;  %3696 = vmatpush3.bf16.msra.mxu1 %v3974_v19 }
 0x2b4   : > { %v1156_v62 = vadd.f32 0.2548296, %v1124_v43  ;;  %1857 = vmatmul.mubr.bf16.gmra.mrb[12].mxu1 %v1580_v52  ;;  %v4112_v31 = vpop.eup %4111  ;;  %3579 = vmatprep.subr.bf16.mxu0 %v3975_v57 }
 0x2b5   : > { %v1093_v41 = vadd.f32 -0.28449672, %v1061_v50  ;;  %1866 = vmatprep.mubr.bf16.mxu1 %v1583_v33  ;;  %v6977_v33 = vld [vmem:[#allocation64_spill] sm:$0xff]  ;;  %3689 = vmatprep.subr.bf16.mxu1 %v3975_v57 }
 0x2b6   : > { %v1188_v18 = vmul.f32 %v4108_v4, %v1156_v62  ;;  %v1506_v4 = vmul.f32 0.5, %v6976_v22  ;;  %vm1411_vm14 = vcmp.ge.f32.partialorder %v6977_v33, 0.0 }
 0x2b7   : > { %v1125_v36 = vmul.f32 %v4110_v1, %v1093_v41  ;;  %v4114_v21 = vpop.eup %4113  ;;  %v1475_v59 = vsel %vm1411_vm14, %v1379_v32, %v1443_v13  ;;  %3580 = vmatpush3.bf16.msra.mxu0 %v3976_v2  ;;  %3697 = vmatpush3.bf16.msra.mxu1 %v3976_v2 }
 0x2b8   : > { %v1348_v40 = vmul.f32 %v4112_v31, %v1188_v18  ;;  %v1570_v9 = vmul.f32 %v1538_v29, %v1506_v4  ;;  %v1539_v54 = vadd.f32 1.0, %v1475_v59  ;;  %v3983_v4 = vld [vmem:[#allocation9 + $0x70] sm:$0xff]  }
 0x2b9   : > { %v1157_v25 = vadd.f32 0.2548296, %v1125_v36 }
 0x2ba   : > { %v1380_v15 = vsub.f32 1.0, %v1348_v40 }
 0x2bb   : > { %v1189_v61 = vmul.f32 %v4110_v1, %v1157_v25 }
 0x2bc   : > { %v1444_v39 = vsub.f32 0.0, %v1380_v15  ;;  %1867 = vmatmul.mubr.bf16.gmra.mrb[16].mxu1 %v1582_v49 }
 0x2bd   : > { %v1349_v52 = vmul.f32 %v4114_v21, %v1189_v61  ;;  %1876 = vmatprep.mubr.bf16.mxu1 %v1585_v10  ;;  %v1507_v10 = vmul.f32 0.5, %v6977_v33 }
 0x2be   : > { %v1476_v12 = vsel %vm1412_vm13, %v1380_v15, %v1444_v39 }
 0x2bf   : > { %v1540_v48 = vadd.f32 1.0, %v1476_v12  ;;  %v1381_v7 = vsub.f32 1.0, %v1349_v52  ;;  %v1571_v38 = vmul.f32 %v1539_v54, %v1507_v10 }
 0x2c1   : > { %v1445_v60 = vsub.f32 0.0, %v1381_v7  ;;  %v1572_v24 = vmul.f32 %v1540_v48, %v1508_v5 }
 0x2c3   : > { %v1477_v49 = vsel %vm1413_vm15, %v1381_v7, %v1445_v60  ;;  %v1588_v47 = vpack.c.bf16 %v1572_v24, %v1570_v9 }
 0x2c4   : > { %v1541_v44 = vadd.f32 1.0, %v1477_v49  ;;  %1877 = vmatmul.mubr.bf16.gmra.mrb[20].mxu1 %v1584_v20  ;;  %v3977_v20 = vld [vmem:[#allocation9 + $0x58] sm:$0xff]  }
 0x2c5   : > { %1886 = vmatprep.mubr.bf16.mxu1 %v1587_v45  ;;  %3581 = vmatprep.subr.bf16.mxu0 %v3977_v20  ;;  %v3980_v45 = vld [vmem:[#allocation9 + $0x20] sm:$0xff]  }
 0x2c6   : > { %v1573_v1 = vmul.f32 %v1541_v44, %v1509_v14  ;;  %3690 = vmatprep.subr.bf16.mxu1 %v3977_v20  ;;  %3582 = vmatpush3.bf16.msra.mxu0 %v3978_v28 }
 0x2c7   : > { %3698 = vmatpush3.bf16.msra.mxu1 %v3978_v28  ;;  %3583 = vmatprep.subr.bf16.mxu0 %v3979_v8 }
 0x2c8   : > { %v1589_v3 = vpack.c.bf16 %v1573_v1, %v1571_v38  ;;  %3691 = vmatprep.subr.bf16.mxu1 %v3979_v8 }
 0x2ca   : > { %3584 = vmatpush3.bf16.msra.mxu0 %v3980_v45 }
 0x2cb   : > { %3699 = vmatpush3.bf16.msra.mxu1 %v3980_v45  ;;  %3585 = vmatprep.subr.bf16.mxu0 %v3981_v34 }
 0x2cc   : > { %1887 = vmatmul.mubr.bf16.gmra.mrb[24].mxu1 %v1586_v17  ;;  %v6979_v17 = vld [vmem:[#allocation31_spill] sm:$0xff]  ;;  %3692 = vmatprep.subr.bf16.mxu1 %v3981_v34 }
 0x2cd   : > { %1896 = vmatprep.mubr.bf16.mxu1 %v1589_v3  ;;  %v6980_v35 = vsub.s32 0, %v6979_v17  ;;  %v6981_v6 = vsub.s32 1, %v6979_v17 }
 0x2ce   : > { %3586 = vmatpush3.bf16.msra.mxu0 %v3982_v26 }
 0x2cf   : > { %v5857_v55 = vrot.slane %v1622_v11, %v6980_v35  ;;  %v5861_v16 = vrot.slane %v1622_v11, %v6981_v6  ;;  %3700 = vmatpush3.bf16.msra.mxu1 %v3982_v26  ;;  %3587 = vmatprep.subr.bf16.mxu0 %v3983_v4 }
 0x2d0   : > { %3693 = vmatprep.subr.bf16.mxu1 %v3983_v4 }
 0x2d4   : > { %1897 = vmatmul.mubr.bf16.gmra.mrb[28].mxu1 %v1588_v47 }
 0x36f   : > { %v1828_v23 = vpop.f32.mrb[0].mxu1 }
 0x370   : > { %v5864_v42 = vadd.f32 %v1828_v23, %v5857_v55  ;;  %v1830_v58 = vpop.f32.mrb[1].mxu1 }
 0x371   : > { %v5867_v27 = vadd.f32 %v1830_v58, %v5861_v16  ;;  %v1832_v53 = vpop.f32.mrb[2].mxu1 }
 0x372   : > { %v1907_v51 = vand.u32 2147483647, %v5864_v42  ;;  %v5871_v43 = vadd.f32 %v1832_v53, %v5857_v55  ;;  %v1834_v0 = vpop.f32.mrb[3].mxu1  ;;  %v3984_v53 = vld [vmem:[#allocation9 + $0x30] sm:$0xff]   ;;  %vm2579_vm0 = vcmp.ge.f32.partialorder %v5864_v42, 0.0 }
 0x373   : > { %v1908_v50 = vand.u32 2147483647, %v5867_v27  ;;  %v5875_v62 = vadd.f32 %v1834_v0, %v5861_v16  ;;  %3588 = vmatpush3.bf16.msra.mxu0 %v3984_v53  ;;  %3701 = vmatpush3.bf16.msra.mxu1 %v3984_v53  ;;  %vm2580_vm2 = vcmp.ge.f32.partialorder %v5867_v27, 0.0 }
 0x374   : > { %v1939_v41 = vmul.f32 0.70710677, %v1907_v51  ;;  %v1909_v37 = vand.u32 2147483647, %v5871_v43  ;;  %vm2581_vm1 = vcmp.ge.f32.partialorder %v5871_v43, 0.0 }
 0x375   : > { %v1940_v18 = vmul.f32 0.70710677, %v1908_v50  ;;  %v1910_v31 = vand.u32 2147483647, %v5875_v62  ;;  %vm2582_vm3 = vcmp.ge.f32.partialorder %v5875_v62, 0.0 }
 0x376   : > { %v1971_v32 = vmul.f32 0.3275911, %v1939_v41  ;;  %v1941_v36 = vmul.f32 0.70710677, %v1909_v37  ;;  %v2387_v60 = vmul.f32 %v1939_v41, %v1939_v41 }
 0x377   : > { %v1972_v40 = vmul.f32 0.3275911, %v1940_v18  ;;  %v1942_v22 = vmul.f32 0.70710677, %v1910_v31  ;;  %v1838_v25 = vpop.f32.mrb[4].mxu1  ;;  %v2388_v54 = vmul.f32 %v1940_v18, %v1940_v18 }
 0x378   : > { %v2003_v46 = vadd.f32 1.0, %v1971_v32  ;;  %v1973_v15 = vmul.f32 0.3275911, %v1941_v36  ;;  %v1840_v13 = vpop.f32.mrb[5].mxu1  ;;  %v5880_v12 = vadd.f32 %v1838_v25, %v5857_v55  ;;  %v2389_v14 = vmul.f32 %v1941_v36, %v1941_v36 }
 0x379   : > { %v2004_v61 = vadd.f32 1.0, %v1972_v40  ;;  %v1974_v21 = vmul.f32 0.3275911, %v1942_v22  ;;  %v1842_v39 = vpop.f32.mrb[6].mxu1  ;;  %v5883_v59 = vadd.f32 %v1840_v13, %v5861_v16  ;;  %v2390_v3 = vmul.f32 %v1942_v22, %v1942_v22 }
 0x37a   : > { %4115 = vrcp.f32 %v2003_v46  ;;  %v2005_v29 = vadd.f32 1.0, %v1973_v15  ;;  %v1844_v52 = vpop.f32.mrb[7].mxu1  ;;  %v5886_v5 = vadd.f32 %v1842_v39, %v5857_v55  ;;  %v1911_v7 = vand.u32 2147483647, %v5880_v12 }
 0x37b   : > { %4117 = vrcp.f32 %v2004_v61  ;;  %v2006_v33 = vadd.f32 1.0, %v1974_v21  ;;  %v5889_v48 = vadd.f32 %v1844_v52, %v5861_v16  ;;  %v1912_v9 = vand.u32 2147483647, %v5883_v59 }
 0x37c   : > { %4119 = vrcp.f32 %v2005_v29  ;;  %v1943_v49 = vmul.f32 0.70710677, %v1911_v7  ;;  %v1913_v47 = vand.u32 2147483647, %v5886_v5  ;;  %v2419_v19 = vsub.f32 0.0, %v2387_v60 }
 0x37d   : > { %4121 = vrcp.f32 %v2006_v33  ;;  %v1944_v44 = vmul.f32 0.70710677, %v1912_v9  ;;  %v1914_v38 = vand.u32 2147483647, %v5889_v48  ;;  %v2420_v28 = vsub.f32 0.0, %v2388_v54 }
 0x37e   : > { %v1975_v56 = vmul.f32 0.3275911, %v1943_v49  ;;  %v5899_v63 = vmul.f32 0.70710677, %v1913_v47  ;;  %v2421_v35 = vsub.f32 0.0, %v2389_v14  ;;  %v2422_v23 = vsub.f32 0.0, %v2390_v3 }
 0x37f   : > { %v1848_v24 = vpop.f32.mrb[8].mxu1  ;;  %v1976_v57 = vmul.f32 0.3275911, %v1944_v44  ;;  %v5903_v2 = vmul.f32 0.70710677, %v1914_v38  ;;  %v2391_v33 = vmul.f32 %v1943_v49, %v1943_v49  ;;  %vm2583_vm4 = vcmp.ge.f32.partialorder %v5880_v12, 0.0 }
 0x380   : > { %v5894_v10 = vpop.f32.mrb[9].mxu1  ;;  %v2007_v8 = vadd.f32 1.0, %v1975_v56  ;;  %v1977_v45 = vmul.f32 0.3275911, %v5899_v63  ;;  %v2451_v0 = vmul.f32 1.442695, %v2419_v19  ;;  %v5927_v61 = vadd.f32 %v1848_v24, %v5857_v55 }
 0x381   : > { %v5897_v1 = vpop.f32.mrb[10].mxu1  ;;  %v2008_v6 = vadd.f32 1.0, %v1976_v57  ;;  %v1978_v34 = vmul.f32 0.3275911, %v5903_v2  ;;  %v2453_v18 = vmul.f32 1.442695, %v2420_v28  ;;  %v2392_v24 = vmul.f32 %v1944_v44, %v1944_v44 }
 0x382   : > { %v5901_v30 = vpop.f32.mrb[11].mxu1  ;;  %4123 = vrcp.f32 %v2007_v8  ;;  %v2009_v58 = vadd.f32 1.0, %v1977_v45  ;;  %v2455_v22 = vmul.f32 1.442695, %v2421_v35  ;;  %v2457_v13 = vmul.f32 1.442695, %v2422_v23 }
 0x383   : > { %4125 = vrcp.f32 %v2008_v6  ;;  %v2010_v31 = vadd.f32 1.0, %v1978_v34  ;;  %v1915_v7 = vand.u32 2147483647, %v5927_v61  ;;  %v2423_v57 = vsub.f32 0.0, %v2391_v33 }
 0x384   : > { %v5905_v20 = vpop.eup %4115  ;;  %4127 = vrcp.f32 %v2009_v58  ;;  %v2424_v58 = vsub.f32 0.0, %v2392_v24  ;;  %v5956_v53 = vmul.f32 %v5899_v63, %v5899_v63  ;;  %vm2584_vm5 = vcmp.ge.f32.partialorder %v5883_v59, 0.0 }
 0x385   : > { %v5908_v11 = vpop.eup %4117  ;;  %v2099_v17 = vmul.f32 1.0614054, %v5905_v20  ;;  %4129 = vpow2.f32 %v2451_v0  ;;  %v5935_v47 = vmul.f32 0.70710677, %v1915_v7  ;;  %vm2585_vm6 = vcmp.ge.f32.partialorder %v5886_v5, 0.0 }
 0x386   : > { %v2100_v26 = vmul.f32 1.0614054, %v5908_v11  ;;  %v5915_v41 = vpop.eup %4119  ;;  %4131 = vrcp.f32 %v2010_v31  ;;  %vm2586_vm7 = vcmp.ge.f32.partialorder %v5889_v48, 0.0  ;;  %vm2587_vm8 = vcmp.ge.f32.partialorder %v5927_v61, 0.0 }
 0x387   : > { %v2131_v51 = vadd.f32 -1.4531521, %v2099_v17  ;;  %v5913_v50 = vpop.f32.mrb[12].mxu1  ;;  %v2101_v40 = vmul.f32 1.0614054, %v5915_v41  ;;  %v5923_v46 = vpop.eup %4121  ;;  %4133 = vpow2.f32 %v2453_v18 }
 0x388   : > { %v2132_v37 = vadd.f32 -1.4531521, %v2100_v26  ;;  %v5917_v32 = vpop.f32.mrb[13].mxu1  ;;  %v2102_v52 = vmul.f32 1.0614054, %v5923_v46  ;;  %4135 = vpow2.f32 %v2455_v22  ;;  %v3985_v26 = vld [vmem:[#allocation9 + $0x78] sm:$0xff]  }
 0x389   : > { %v2163_v36 = vmul.f32 %v5905_v20, %v2131_v51  ;;  %v5921_v25 = vpop.f32.mrb[14].mxu1  ;;  %v2133_v29 = vadd.f32 -1.4531521, %v2101_v40  ;;  %4137 = vpow2.f32 %v2457_v13  ;;  %v1979_v28 = vmul.f32 0.3275911, %v5935_v47  ;;  %3589 = vmatprep.subr.bf16.mxu0 %v3985_v26  ;;  %3694 = vmatprep.subr.bf16.mxu1 %v3985_v26 }
 0x38a   : > { %v2164_v15 = vmul.f32 %v5908_v11, %v2132_v37  ;;  %v5929_v21 = vpop.f32.mrb[15].mxu1  ;;  %v2134_v54 = vadd.f32 -1.4531521, %v2102_v52  ;;  %v3986_v37 = vld [vmem:[#allocation9 + $0x38] sm:$0xff]  }
 0x38b   : > { %v2195_v39 = vadd.f32 1.4214138, %v2163_v36  ;;  %v2165_v9 = vmul.f32 %v5915_v41, %v2133_v29  ;;  %v2011_v51 = vadd.f32 1.0, %v1979_v28  ;;  %3590 = vmatpush3.bf16.msra.mxu0 %v3986_v37  ;;  %3702 = vmatpush3.bf16.msra.mxu1 %v3986_v37 }
 0x38c   : > { %v2196_v4 = vadd.f32 1.4214138, %v2164_v15  ;;  %v2166_v3 = vmul.f32 %v5923_v46, %v2134_v54  ;;  %v5940_v49 = vpop.eup %4123  ;;  %v5965_v15 = vmul.f32 0.5, %v5864_v42  ;;  %v2461_v54 = vmul.f32 1.442695, %v2424_v58 }
 0x38d   : > { %v2227_v60 = vmul.f32 %v5905_v20, %v2195_v39  ;;  %v2197_v38 = vadd.f32 1.4214138, %v2165_v9  ;;  %v5946_v44 = vpop.eup %4125  ;;  %v2103_v6 = vmul.f32 1.0614054, %v5940_v49  ;;  %4139 = vrcp.f32 %v2011_v51 }
 0x38e   : > { %v2228_v19 = vmul.f32 %v5908_v11, %v2196_v4  ;;  %v2198_v35 = vadd.f32 1.4214138, %v2166_v3  ;;  %v2104_v23 = vmul.f32 1.0614054, %v5946_v44  ;;  %v5961_v22 = vpop.eup %4127  ;;  %v6004_v42 = vadd.f32 %v5894_v10, %v5861_v16 }
 0x38f   : > { %v2259_v14 = vadd.f32 -0.28449672, %v2227_v60  ;;  %v5938_v56 = vpop.f32.mrb[16].mxu1  ;;  %v2229_v17 = vmul.f32 %v5915_v41, %v2197_v38  ;;  %v2135_v40 = vadd.f32 -1.4531521, %v2103_v6  ;;  %v4130_v39 = vpop.eup %4129 }
 0x390   : > { %v5944_v8 = vpop.f32.mrb[17].mxu1  ;;  %v2230_v36 = vmul.f32 %v5923_v46, %v2198_v35  ;;  %v2260_v63 = vadd.f32 -0.28449672, %v2228_v19  ;;  %v2136_v13 = vadd.f32 -1.4531521, %v2104_v23  ;;  %v5970_v7 = vpop.eup %4131  ;;  %v2425_v19 = vsub.f32 0.0, %v5956_v53 }
 0x391   : > { %v2291_v45 = vmul.f32 %v5905_v20, %v2259_v14  ;;  %v5951_v34 = vpop.f32.mrb[18].mxu1  ;;  %v2261_v31 = vadd.f32 -0.28449672, %v2229_v17  ;;  %v2167_v33 = vmul.f32 %v5940_v49, %v2135_v40  ;;  %v2459_v60 = vmul.f32 1.442695, %v2423_v57 }
 0x392   : > { %v5958_v0 = vpop.f32.mrb[19].mxu1  ;;  %v2262_v4 = vadd.f32 -0.28449672, %v2230_v36  ;;  %v2168_v9 = vmul.f32 %v5946_v44, %v2136_v13  ;;  %v2105_v24 = vmul.f32 1.0614054, %v5961_v22  ;;  %vm2588_vm9 = vcmp.ge.f32.partialorder %v6004_v42, 0.0 }
 0x393   : > { %v2323_v18 = vadd.f32 0.2548296, %v2291_v45  ;;  %v2293_v52 = vmul.f32 %v5915_v41, %v2261_v31  ;;  %v2199_v3 = vadd.f32 1.4214138, %v2167_v33  ;;  %v2292_v45 = vmul.f32 %v5908_v11, %v2260_v63 }
 0x394   : > { %v2200_v17 = vadd.f32 1.4214138, %v2168_v9  ;;  %v2137_v35 = vadd.f32 -1.4531521, %v2105_v24  ;;  %v2106_v57 = vmul.f32 1.0614054, %v5970_v7  ;;  %v2294_v58 = vmul.f32 %v5923_v46, %v2262_v4 }
 0x395   : > { %v2355_v29 = vmul.f32 %v5905_v20, %v2323_v18  ;;  %v2325_v38 = vadd.f32 0.2548296, %v2293_v52  ;;  %v4134_v20 = vpop.eup %4133  ;;  %v2231_v51 = vmul.f32 %v5940_v49, %v2199_v3  ;;  %4141 = vpow2.f32 %v2459_v60 }
 0x396   : > { %v4136_v6 = vpop.eup %4135  ;;  %v2232_v18 = vmul.f32 %v5946_v44, %v2200_v17  ;;  %v2169_v31 = vmul.f32 %v5961_v22, %v2137_v35  ;;  %v2138_v36 = vadd.f32 -1.4531521, %v2106_v57  ;;  %v2324_v52 = vadd.f32 0.2548296, %v2292_v45 }
 0x397   : > { %v2515_v14 = vmul.f32 %v4130_v39, %v2355_v29  ;;  %v5975_v28 = vpop.f32.mrb[20].mxu1  ;;  %v2357_v23 = vmul.f32 %v5915_v41, %v2325_v38  ;;  %v4138_v37 = vpop.eup %4137  ;;  %v2263_v39 = vadd.f32 -0.28449672, %v2231_v51  ;;  %v2394_v41 = vmul.f32 %v5903_v2, %v5903_v2 }
 0x398   : > { %v5983_v53 = vpop.f32.mrb[21].mxu1  ;;  %v2264_v4 = vadd.f32 -0.28449672, %v2232_v18  ;;  %v2201_v33 = vadd.f32 1.4214138, %v2169_v31  ;;  %v2170_v60 = vmul.f32 %v5970_v7, %v2138_v36  ;;  %v5997_v3 = vpop.eup %4139  ;;  %v2677_v17 = vmul.f32 0.5, %v5871_v43 }
 0x399   : > { %v2547_v26 = vsub.f32 1.0, %v2515_v14  ;;  %v5987_v40 = vpop.f32.mrb[22].mxu1  ;;  %v2517_v13 = vmul.f32 %v4136_v6, %v2357_v23  ;;  %v2326_v14 = vadd.f32 0.2548296, %v2294_v58  ;;  %v2295_v38 = vmul.f32 %v5940_v49, %v2263_v39 }
 0x39a   : > { %v5991_v29 = vpop.f32.mrb[23].mxu1  ;;  %v2296_v2 = vmul.f32 %v5946_v44, %v2264_v4  ;;  %4143 = vpow2.f32 %v2461_v54  ;;  %v2233_v45 = vmul.f32 %v5961_v22, %v2201_v33  ;;  %v2463_v57 = vmul.f32 1.442695, %v2425_v19 }
 0x39b   : > { %v2611_v63 = vsub.f32 0.0, %v2547_v26  ;;  %v2549_v24 = vsub.f32 1.0, %v2517_v13  ;;  %v2426_v6 = vsub.f32 0.0, %v2394_v41  ;;  %v2356_v58 = vmul.f32 %v5908_v11, %v2324_v52 }
 0x39c   : > { %v2265_v51 = vadd.f32 -0.28449672, %v2233_v45  ;;  %v2202_v18 = vadd.f32 1.4214138, %v2170_v60  ;;  %v2358_v54 = vmul.f32 %v5923_v46, %v2326_v14  ;;  %v2327_v36 = vadd.f32 0.2548296, %v2295_v38 }
 0x39d   : > { %v2643_v9 = vsel %vm2579_vm0, %v2547_v26, %v2611_v63  ;;  %v2613_v35 = vsub.f32 0.0, %v2549_v24  ;;  %v2107_v19 = vmul.f32 1.0614054, %v5997_v3  ;;  %v2328_v10 = vadd.f32 0.2548296, %v2296_v2 }
 0x39e   : > { %v2707_v23 = vadd.f32 1.0, %v2643_v9  ;;  %v2297_v39 = vmul.f32 %v5961_v22, %v2265_v51  ;;  %v2234_v41 = vmul.f32 %v5970_v7, %v2202_v18  ;;  %4145 = vpow2.f32 %v2463_v57 }
 0x39f   : > { %v6006_v26 = vpop.f32.mrb[24].mxu1  ;;  %v2645_v31 = vsel %vm2581_vm1, %v2549_v24, %v2613_v35  ;;  %v2139_v11 = vadd.f32 -1.4531521, %v2107_v19  ;;  %v1916_v43 = vand.u32 2147483647, %v6004_v42  ;;  %v4142_v46 = vpop.eup %4141  ;;  %v2516_v60 = vmul.f32 %v4134_v20, %v2356_v58 }
 0x3a0   : > { %v6013_v63 = vpop.f32.mrb[25].mxu1  ;;  %v2709_v13 = vadd.f32 1.0, %v2645_v31  ;;  %v6023_v33 = vmul.f32 %v2707_v23, %v5965_v15  ;;  %v2465_v24 = vmul.f32 1.442695, %v2426_v6  ;;  %v2266_v14 = vadd.f32 -0.28449672, %v2234_v41 }
 0x3a1   : > { %v6017_v4 = vpop.f32.mrb[26].mxu1  ;;  %v2171_v38 = vmul.f32 %v5997_v3, %v2139_v11  ;;  %v2395_v2 = vmul.f32 %v5935_v47, %v5935_v47  ;;  %v1948_v45 = vmul.f32 0.70710677, %v1916_v43  ;;  %v2518_v57 = vmul.f32 %v4138_v37, %v2358_v54 }
 0x3a2   : > { %v6020_v52 = vpop.f32.mrb[27].mxu1  ;;  %6982 = vst [vmem:[#allocation32_spill] sm:$0xff] %v6023_v33  ;;  %v6025_v9 = vmul.f32 %v2709_v13, %v2677_v17  ;;  %v2359_v51 = vmul.f32 %v5940_v49, %v2327_v36  ;;  %v2329_v18 = vadd.f32 0.2548296, %v2297_v39  ;;  %v2360_v15 = vmul.f32 %v5946_v44, %v2328_v10 }
 0x3a3   : > { %v2203_v20 = vadd.f32 1.4214138, %v2171_v38  ;;  %v1980_v17 = vmul.f32 0.3275911, %v1948_v45  ;;  %v2548_v58 = vsub.f32 1.0, %v2516_v60  ;;  %v6038_v47 = vmul.f32 0.5, %v5867_v27 }
 0x3a4   : > { %v4144_v6 = vpop.eup %4143  ;;  %v6042_v31 = vadd.f32 %v5897_v1, %v5857_v55  ;;  %v2298_v49 = vmul.f32 %v5970_v7, %v2266_v14  ;;  %v2427_v54 = vsub.f32 0.0, %v2395_v2  ;;  %v2550_v13 = vsub.f32 1.0, %v2518_v57 }
 0x3a5   : > { %v2235_v44 = vmul.f32 %v5997_v3, %v2203_v20  ;;  %v2012_v36 = vadd.f32 1.0, %v1980_v17  ;;  %v6052_v10 = vmul.f32 0.5, %v5875_v62  ;;  %v2519_v39 = vmul.f32 %v4142_v46, %v2359_v51 }
 0x3a6   : > { %4147 = vpow2.f32 %v2465_v24  ;;  %v6057_v41 = vmul.f32 0.5, %v5880_v12  ;;  %v2520_v11 = vmul.f32 %v4144_v6, %v2360_v15  ;;  %v2361_v43 = vmul.f32 %v5961_v22, %v2329_v18 }
 0x3a7   : > { %v6034_v23 = vpop.f32.mrb[28].mxu1  ;;  %4149 = vrcp.f32 %v2012_v36  ;;  %v2612_v60 = vsub.f32 0.0, %v2548_v58  ;;  %v6061_v14 = vmul.f32 0.5, %v5883_v59  ;;  %v2267_v38 = vadd.f32 -0.28449672, %v2235_v44 }
 0x3a8   : > { %v6044_v37 = vpop.f32.mrb[29].mxu1  ;;  %6985 = vst [vmem:[#allocation34_spill] sm:$0xff] %v6057_v41  ;;  %v1917_v2 = vand.u32 2147483647, %v6042_v31  ;;  %v4146_v57 = vpop.eup %4145  ;;  %v6066_v46 = vmul.f32 0.5, %v5886_v5  ;;  %v6070_v15 = vadd.f32 %v5901_v30, %v5861_v16  ;;  %v2614_v22 = vsub.f32 0.0, %v2550_v13 }
 0x3a9   : > { %v6049_v19 = vpop.f32.mrb[30].mxu1  ;;  %6986 = vst [vmem:[#allocation35_spill] sm:$0xff] %v6061_v14  ;;  %v2330_v24 = vadd.f32 0.2548296, %v2298_v49  ;;  %v2467_v51 = vmul.f32 1.442695, %v2427_v54  ;;  %v6075_v17 = vadd.f32 %v5913_v50, %v5857_v55  ;;  %v2521_v44 = vmul.f32 %v4146_v57, %v2361_v43 }
 0x3aa   : > { %6983 = vst [vmem:[#allocation33_spill] sm:$0xff] %v6049_v19  ;;  %v6054_v1 = vpop.f32.mrb[31].mxu1  ;;  %6987 = vst [vmem:[#allocation37_spill] sm:$0xff] %v6066_v46  ;;  %v2551_v18 = vsub.f32 1.0, %v2519_v39  ;;  %v1949_v20 = vmul.f32 0.70710677, %v1917_v2  ;;  %v2644_v30 = vsel %vm2580_vm2, %v2548_v58, %v2612_v60  ;;  %v2299_v54 = vmul.f32 %v5997_v3, %v2267_v38 }
 0x3ab   : > { %6984 = vst [vmem:[#allocation40_spill] sm:$0xff] %v6054_v1  ;;  %v2552_v6 = vsub.f32 1.0, %v2520_v11  ;;  %v6078_v36 = vmul.f32 0.5, %v5889_v48  ;;  %v1918_v49 = vand.u32 2147483647, %v6070_v15  ;;  %v2396_v39 = vmul.f32 %v1948_v45, %v1948_v45 }
 0x3ac   : > { %v1981_v35 = vmul.f32 0.3275911, %v1949_v20  ;;  %v2362_v2 = vmul.f32 %v5970_v7, %v2330_v24  ;;  %4151 = vpow2.f32 %v2467_v51  ;;  %v1919_v50 = vand.u32 2147483647, %v6075_v17 }
 0x3ad   : > { %6988 = vst [vmem:[#allocation42_spill] sm:$0xff] %v6078_v36  ;;  %v1950_v46 = vmul.f32 0.70710677, %v1918_v49  ;;  %v2646_v11 = vsel %vm2582_vm3, %v2550_v13, %v2614_v22  ;;  %v2615_v43 = vsub.f32 0.0, %v2551_v18  ;;  %v6090_v57 = vmul.f32 0.5, %v5927_v61 }
 0x3ae   : > { %v2013_v27 = vadd.f32 1.0, %v1981_v35  ;;  %v6092_v58 = vadd.f32 1.0, %v2644_v30  ;;  %v2616_v45 = vsub.f32 0.0, %v2552_v6  ;;  %v2553_v60 = vsub.f32 1.0, %v2521_v44 }
 0x3af   : > { %6989 = vst [vmem:[#allocation46_spill] sm:$0xff] %v6090_v57  ;;  %v1982_v38 = vmul.f32 0.3275911, %v1950_v46  ;;  %v2331_v24 = vadd.f32 0.2548296, %v2299_v54  ;;  %v2428_v51 = vsub.f32 0.0, %v2396_v39  ;;  %v6100_v57 = vadd.f32 %v5917_v32, %v5861_v16 }
 0x3b0   : > { %v4148_v7 = vpop.eup %4147  ;;  %4153 = vrcp.f32 %v2013_v27  ;;  %v1951_v49 = vmul.f32 0.70710677, %v1919_v50  ;;  %v6096_v62 = vadd.f32 1.0, %v2646_v11  ;;  %v2647_v35 = vsel %vm2583_vm4, %v2551_v18, %v2615_v43 }
 0x3b1   : > { %v6094_v41 = vpop.eup %4149  ;;  %v2522_v13 = vmul.f32 %v4148_v7, %v2362_v2  ;;  %v2014_v22 = vadd.f32 1.0, %v1982_v38  ;;  %v2397_v30 = vmul.f32 %v1949_v20, %v1949_v20  ;;  %v2648_v39 = vsel %vm2584_vm5, %v2552_v6, %v2616_v45 }
 0x3b2   : > { %v2108_v44 = vmul.f32 1.0614054, %v6094_v41  ;;  %v1983_v54 = vmul.f32 0.3275911, %v1951_v49  ;;  %v2617_v50 = vsub.f32 0.0, %v2553_v60  ;;  %v2363_v2 = vmul.f32 %v5997_v3, %v2331_v24 }
 0x3b3   : > { %4155 = vrcp.f32 %v2014_v22  ;;  %v1920_v11 = vand.u32 2147483647, %v6100_v57  ;;  %v2469_v27 = vmul.f32 1.442695, %v2428_v51  ;;  %v6110_v12 = vadd.f32 1.0, %v2647_v35 }
 0x3b4   : > { %v2140_v32 = vadd.f32 -1.4531521, %v2108_v44  ;;  %v2015_v38 = vadd.f32 1.0, %v1983_v54  ;;  %v2554_v18 = vsub.f32 1.0, %v2522_v13  ;;  %v6113_v20 = vmul.f32 0.5, %v6004_v42 }
 0x3b5   : > { %6990 = vst [vmem:[#allocation44_spill] sm:$0xff] %v6110_v12  ;;  %v1952_v43 = vmul.f32 0.70710677, %v1920_v11  ;;  %v6115_v59 = vadd.f32 1.0, %v2648_v39  ;;  %v2429_v45 = vsub.f32 0.0, %v2397_v30  ;;  %v2649_v3 = vsel %vm2585_vm6, %v2553_v60, %v2617_v50 }
 0x3b6   : > { %6991 = vst [vmem:[#allocation51_spill] sm:$0xff] %v6113_v20  ;;  %v2172_v6 = vmul.f32 %v6094_v41, %v2140_v32  ;;  %4157 = vrcp.f32 %v2015_v38  ;;  %v4152_v7 = vpop.eup %4151  ;;  %v6122_v51 = vadd.f32 %v5921_v25, %v5857_v55  ;;  %v6126_v13 = vadd.f32 %v5929_v21, %v5861_v16 }
 0x3b7   : > { %6992 = vst [vmem:[#allocation47_spill] sm:$0xff] %v6115_v59  ;;  %v1984_v24 = vmul.f32 0.3275911, %v1952_v43  ;;  %v2523_v22 = vmul.f32 %v4152_v7, %v2363_v2  ;;  %4159 = vpow2.f32 %v2469_v27  ;;  %v6129_v44 = vmul.f32 0.5, %v6042_v31 }
 0x3b8   : > { %v2204_v35 = vadd.f32 1.4214138, %v2172_v6  ;;  %v2618_v30 = vsub.f32 0.0, %v2554_v18  ;;  %v2398_v54 = vmul.f32 %v1950_v46, %v1950_v46  ;;  %v1921_v5 = vand.u32 2147483647, %v6122_v51 }
 0x3b9   : > { %6993 = vst [vmem:[#allocation43_spill] sm:$0xff] %v6129_v44  ;;  %v2016_v39 = vadd.f32 1.0, %v1984_v24  ;;  %v6134_v50 = vadd.f32 1.0, %v2649_v3  ;;  %v2471_v25 = vmul.f32 1.442695, %v2429_v45  ;;  %v6139_v21 = vadd.f32 %v5938_v56, %v5857_v55 }
 0x3ba   : > { %v6132_v60 = vpop.eup %4153  ;;  %v1922_v11 = vand.u32 2147483647, %v6126_v13  ;;  %v2236_v2 = vmul.f32 %v6094_v41, %v2204_v35  ;;  %v1953_v32 = vmul.f32 0.70710677, %v1921_v5  ;;  %v2555_v27 = vsub.f32 1.0, %v2523_v22 }
 0x3bb   : > { %6994 = vst [vmem:[#allocation50_spill] sm:$0xff] %v6134_v50  ;;  %v2109_v46 = vmul.f32 1.0614054, %v6132_v60  ;;  %4161 = vrcp.f32 %v2016_v39  ;;  %v6145_v38 = vmul.f32 0.5, %v6070_v15  ;;  %v6148_v6 = vmul.f32 0.5, %v6075_v17 }
 0x3bc   : > { %v1954_v45 = vmul.f32 0.70710677, %v1922_v11  ;;  %v2650_v56 = vsel %vm2586_vm7, %v2554_v18, %v2618_v30  ;;  %v2430_v24 = vsub.f32 0.0, %v2398_v54  ;;  %v1985_v35 = vmul.f32 0.3275911, %v1953_v32 }
 0x3bd   : > { %6995 = vst [vmem:[#allocation45_spill] sm:$0xff] %v6145_v38  ;;  %6996 = vst [vmem:[#allocation53_spill] sm:$0xff] %v6148_v6  ;;  %v6150_v7 = vpop.eup %4155  ;;  %v2141_v3 = vadd.f32 -1.4531521, %v2109_v46  ;;  %4163 = vpow2.f32 %v2471_v25  ;;  %v2399_v5 = vmul.f32 %v1951_v49, %v1951_v49  ;;  %v2268_v44 = vadd.f32 -0.28449672, %v2236_v2 }
 0x3be   : > { %v2110_v39 = vmul.f32 1.0614054, %v6150_v7  ;;  %v1986_v22 = vmul.f32 0.3275911, %v1954_v45  ;;  %v2017_v20 = vadd.f32 1.0, %v1985_v35  ;;  %v2619_v50 = vsub.f32 0.0, %v2555_v27 }
 0x3bf   : > { %v2173_v38 = vmul.f32 %v6132_v60, %v2141_v3  ;;  %v1923_v6 = vand.u32 2147483647, %v6139_v21  ;;  %v2400_v48 = vmul.f32 %v1952_v43, %v1952_v43  ;;  %v6159_v30 = vadd.f32 1.0, %v2650_v56 }
 0x3c0   : > { %v6157_v11 = vpop.eup %4157  ;;  %v2142_v12 = vadd.f32 -1.4531521, %v2110_v39  ;;  %v2018_v18 = vadd.f32 1.0, %v1986_v22  ;;  %4165 = vrcp.f32 %v2017_v20  ;;  %v2473_v46 = vmul.f32 1.442695, %v2430_v24 }
 0x3c1   : > { %6997 = vst [vmem:[#allocation49_spill] sm:$0xff] %v6159_v30  ;;  %v2205_v54 = vadd.f32 1.4214138, %v2173_v38  ;;  %v2111_v25 = vmul.f32 1.0614054, %v6157_v11  ;;  %v4160_v49 = vpop.eup %4159  ;;  %v6165_v3 = vadd.f32 %v5944_v8, %v5861_v16  ;;  %v2300_v35 = vmul.f32 %v6094_v41, %v2268_v44 }
 0x3c2   : > { %v2174_v2 = vmul.f32 %v6150_v7, %v2142_v12  ;;  %4167 = vrcp.f32 %v2018_v18  ;;  %v1955_v56 = vmul.f32 0.70710677, %v1923_v6  ;;  %v2651_v38 = vsel %vm2587_vm8, %v2555_v27, %v2619_v50 }
 0x3c3   : > { %v2237_v43 = vmul.f32 %v6132_v60, %v2205_v54  ;;  %v2143_v39 = vadd.f32 -1.4531521, %v2111_v25  ;;  %v2431_v20 = vsub.f32 0.0, %v2399_v5  ;;  %v2432_v30 = vsub.f32 0.0, %v2400_v48 }
 0x3c4   : > { %v2206_v22 = vadd.f32 1.4214138, %v2174_v2  ;;  %v2401_v18 = vmul.f32 %v1953_v32, %v1953_v32  ;;  %v1987_v8 = vmul.f32 0.3275911, %v1955_v56  ;;  %v2402_v54 = vmul.f32 %v1954_v45, %v1954_v45 }
 0x3c5   : > { %v6171_v36 = vpop.eup %4161  ;;  %v2269_v12 = vadd.f32 -0.28449672, %v2237_v43  ;;  %v2175_v24 = vmul.f32 %v6157_v11, %v2143_v39  ;;  %v1924_v6 = vand.u32 2147483647, %v6165_v3  ;;  %v2332_v25 = vadd.f32 0.2548296, %v2300_v35 }
 0x3c6   : > { %v2238_v59 = vmul.f32 %v6150_v7, %v2206_v22  ;;  %v2112_v44 = vmul.f32 1.0614054, %v6171_v36  ;;  %v2019_v27 = vadd.f32 1.0, %v1987_v8  ;;  %4169 = vpow2.f32 %v2473_v46 }
 0x3c7   : > { %v2301_v61 = vmul.f32 %v6132_v60, %v2269_v12  ;;  %v2207_v50 = vadd.f32 1.4214138, %v2175_v24  ;;  %v4164_v5 = vpop.eup %4163  ;;  %v2475_v2 = vmul.f32 1.442695, %v2431_v20  ;;  %v2477_v39 = vmul.f32 1.442695, %v2432_v30 }
 0x3c8   : > { %v2270_v48 = vadd.f32 -0.28449672, %v2238_v59  ;;  %v2144_v43 = vadd.f32 -1.4531521, %v2112_v44  ;;  %v2433_v14 = vsub.f32 0.0, %v2401_v18  ;;  %4171 = vrcp.f32 %v2019_v27 }
 0x3c9   : > { %v2239_v32 = vmul.f32 %v6157_v11, %v2207_v50  ;;  %v2333_v22 = vadd.f32 0.2548296, %v2301_v61  ;;  %v1956_v35 = vmul.f32 0.70710677, %v1924_v6  ;;  %v2364_v12 = vmul.f32 %v6094_v41, %v2332_v25 }
 0x3ca   : > { %v2302_v45 = vmul.f32 %v6150_v7, %v2270_v48  ;;  %v2176_v1 = vmul.f32 %v6171_v36, %v2144_v43  ;;  %v6181_v19 = vpop.eup %4165  ;;  %v6185_v59 = vmul.f32 0.5, %v6100_v57  ;;  %v2434_v46 = vsub.f32 0.0, %v2402_v54 }
 0x3cb   : > { %v2271_v24 = vadd.f32 -0.28449672, %v2239_v32  ;;  %4173 = vpow2.f32 %v2475_v2  ;;  %v2113_v8 = vmul.f32 1.0614054, %v6181_v19  ;;  %v1988_v61 = vmul.f32 0.3275911, %v1956_v35 }
 0x3cc   : > { %6998 = vst [vmem:[#allocation54_spill] sm:$0xff] %v6185_v59  ;;  %v6187_v20 = vpop.eup %4167  ;;  %v2334_v30 = vadd.f32 0.2548296, %v2302_v45  ;;  %v2208_v18 = vadd.f32 1.4214138, %v2176_v1  ;;  %4175 = vpow2.f32 %v2477_v39  ;;  %v2365_v41 = vmul.f32 %v6132_v60, %v2333_v22 }
 0x3cd   : > { %v2303_v44 = vmul.f32 %v6157_v11, %v2271_v24  ;;  %v2114_v6 = vmul.f32 1.0614054, %v6187_v20  ;;  %v2145_v50 = vadd.f32 -1.4531521, %v2113_v8  ;;  %v2479_v27 = vmul.f32 1.442695, %v2433_v14 }
 0x3ce   : > { %v2240_v25 = vmul.f32 %v6171_v36, %v2208_v18  ;;  %v2524_v54 = vmul.f32 %v4160_v49, %v2364_v12  ;;  %v2481_v43 = vmul.f32 1.442695, %v2434_v46  ;;  %v2020_v32 = vadd.f32 1.0, %v1988_v61 }
 0x3cf   : > { %v2146_v48 = vadd.f32 -1.4531521, %v2114_v6  ;;  %v2366_v1 = vmul.f32 %v6150_v7, %v2334_v30  ;;  %v2177_v45 = vmul.f32 %v6181_v19, %v2145_v50  ;;  %v2403_v24 = vmul.f32 %v1955_v56, %v1955_v56 }
 0x3d0   : > { %v2272_v2 = vadd.f32 -0.28449672, %v2240_v25  ;;  %v6196_v39 = vadd.f32 1.0, %v2651_v38  ;;  %v2335_v59 = vadd.f32 0.2548296, %v2303_v44  ;;  %4177 = vrcp.f32 %v2020_v32  ;;  %v4170_v60 = vpop.eup %4169 }
 0x3d1   : > { %v2178_v33 = vmul.f32 %v6187_v20, %v2146_v48  ;;  %v6199_v22 = vmul.f32 %v4164_v5, %v2365_v41  ;;  %v2209_v49 = vadd.f32 1.4214138, %v2177_v45  ;;  %4179 = vpow2.f32 %v2479_v27 }
 0x3d2   : > { %v2304_v14 = vmul.f32 %v6171_v36, %v2272_v2  ;;  %v6202_v12 = vpop.eup %4171  ;;  %v6206_v7 = vmul.f32 0.5, %v6122_v51  ;;  %4181 = vpow2.f32 %v2481_v43  ;;  %v6209_v38 = vmul.f32 0.5, %v6126_v13 }
 0x3d3   : > { %v2210_v56 = vadd.f32 1.4214138, %v2178_v33  ;;  %v2556_v46 = vsub.f32 1.0, %v2524_v54  ;;  %v2526_v30 = vmul.f32 %v4170_v60, %v2366_v1  ;;  %v2241_v5 = vmul.f32 %v6181_v19, %v2209_v49 }
 0x3d4   : > { %6999 = vst [vmem:[#allocation48_spill] sm:$0xff] %v6206_v7  ;;  %v2435_v18 = vsub.f32 0.0, %v2403_v24  ;;  %v2367_v8 = vmul.f32 %v6157_v11, %v2335_v59  ;;  %v2115_v6 = vmul.f32 1.0614054, %v6202_v12  ;;  %v6217_v61 = vadd.f32 %v5951_v34, %v5857_v55 }
 0x3d5   : > { %v2242_v44 = vmul.f32 %v6187_v20, %v2210_v56  ;;  %v4174_v33 = vpop.eup %4173  ;;  %v2557_v41 = vsub.f32 1.0, %v6199_v22  ;;  %v2336_v25 = vadd.f32 0.2548296, %v2304_v14  ;;  %v2273_v50 = vadd.f32 -0.28449672, %v2241_v5 }
 0x3d6   : > { %v2404_v27 = vmul.f32 %v1956_v35, %v1956_v35  ;;  %v4176_v54 = vpop.eup %4175  ;;  %v2147_v43 = vadd.f32 -1.4531521, %v2115_v6  ;;  %v6221_v32 = vmul.f32 0.5, %v6139_v21  ;;  %v6225_v11 = vadd.f32 %v5958_v0, %v5861_v16 }
 0x3d7   : > { %v2274_v48 = vadd.f32 -0.28449672, %v2242_v44  ;;  %v2620_v59 = vsub.f32 0.0, %v2556_v46  ;;  %vm2589_vm10 = vcmp.ge.f32.partialorder %v6042_v31, 0.0  ;;  %vm2590_vm11 = vcmp.ge.f32.partialorder %v6070_v15, 0.0 }
 0x3d8   : > { %7000 = vst [vmem:[#allocation52_spill] sm:$0xff] %v6221_v32  ;;  %v2305_v34 = vmul.f32 %v6181_v19, %v2273_v50  ;;  %v2483_v1 = vmul.f32 1.442695, %v2435_v18  ;;  %v1925_v35 = vand.u32 2147483647, %v6217_v61  ;;  %v2558_v2 = vsub.f32 1.0, %v2526_v30 }
 0x3d9   : > { %v2527_v45 = vmul.f32 %v4174_v33, %v2367_v8  ;;  %v2306_v24 = vmul.f32 %v6187_v20, %v2274_v48  ;;  %v2179_v60 = vmul.f32 %v6202_v12, %v2147_v43  ;;  %v2621_v22 = vsub.f32 0.0, %v2557_v41 }
 0x3da   : > { %v2368_v0 = vmul.f32 %v6171_v36, %v2336_v25  ;;  %v2436_v14 = vsub.f32 0.0, %v2404_v27  ;;  %v1957_v49 = vmul.f32 0.70710677, %v1925_v35  ;;  %v6234_v56 = vpop.eup %4177  ;;  %v2337_v5 = vadd.f32 0.2548296, %v2305_v34 }
 0x3db   : > { %v2211_v44 = vadd.f32 1.4214138, %v2179_v60  ;;  %v1926_v6 = vand.u32 2147483647, %v6225_v11  ;;  %v4180_v18 = vpop.eup %4179  ;;  %v2652_v30 = vsel %vm2588_vm9, %v2556_v46, %v2620_v59  ;;  %v2338_v8 = vadd.f32 0.2548296, %v2306_v24 }
 0x3dc   : > { %v2116_v33 = vmul.f32 1.0614054, %v6234_v56  ;;  %v1989_v50 = vmul.f32 0.3275911, %v1957_v49  ;;  %v4182_v48 = vpop.eup %4181  ;;  %v2622_v43 = vsub.f32 0.0, %v2558_v2  ;;  %v2559_v32 = vsub.f32 1.0, %v2527_v45 }
 0x3dd   : > { %vm2591_vm12 = vcmp.ge.f32.partialorder %v6075_v17, 0.0  ;;  %v2243_v36 = vmul.f32 %v6202_v12, %v2211_v44  ;;  %v1958_v25 = vmul.f32 0.70710677, %v1926_v6  ;;  %v2528_v27 = vmul.f32 %v4176_v54, %v2368_v0 }
 0x3de   : > { %4183 = vpow2.f32 %v2483_v1  ;;  %v2148_v34 = vadd.f32 -1.4531521, %v2116_v33  ;;  %v2021_v35 = vadd.f32 1.0, %v1989_v50  ;;  %v6242_v60 = vadd.f32 1.0, %v2652_v30 }
 0x3df   : > { %v2369_v42 = vmul.f32 %v6181_v19, %v2337_v5  ;;  %v2275_v46 = vadd.f32 -0.28449672, %v2243_v36  ;;  %v2485_v59 = vmul.f32 1.442695, %v2436_v14  ;;  %v2370_v24 = vmul.f32 %v6187_v20, %v2338_v8 }
 0x3e0   : > { %v2180_v7 = vmul.f32 %v6234_v56, %v2148_v34  ;;  %4185 = vrcp.f32 %v2021_v35  ;;  %v1990_v45 = vmul.f32 0.3275911, %v1958_v25  ;;  %v2653_v44 = vsel %vm2589_vm10, %v2557_v41, %v2621_v22 }
 0x3e1   : > { %v2654_v54 = vsel %vm2590_vm11, %v2558_v2, %v2622_v43  ;;  %v2623_v1 = vsub.f32 0.0, %v2559_v32  ;;  %vm2592_vm13 = vcmp.ge.f32.partialorder %v6100_v57, 0.0  ;;  %v2307_v0 = vmul.f32 %v6202_v12, %v2275_v46 }
 0x3e2   : > { %v2560_v19 = vsub.f32 1.0, %v2528_v27  ;;  %v2212_v5 = vadd.f32 1.4214138, %v2180_v7  ;;  %v2022_v14 = vadd.f32 1.0, %v1990_v45  ;;  %v6255_v20 = vadd.f32 %v5975_v28, %v5857_v55 }
 0x3e3   : > { %v2529_v6 = vmul.f32 %v4180_v18, %v2369_v42  ;;  %v2339_v30 = vadd.f32 0.2548296, %v2307_v0  ;;  %4187 = vpow2.f32 %v2485_v59  ;;  %v2405_v31 = vmul.f32 %v1957_v49, %v1957_v49 }
 0x3e4   : > { %v2530_v41 = vmul.f32 %v4182_v48, %v2370_v24  ;;  %v2244_v15 = vmul.f32 %v6234_v56, %v2212_v5  ;;  %v6259_v2 = vmul.f32 0.5, %v6165_v3  ;;  %4189 = vrcp.f32 %v2022_v14 }
 0x3e5   : > { %v6261_v22 = vadd.f32 1.0, %v2653_v44  ;;  %v6263_v8 = vadd.f32 1.0, %v2654_v54  ;;  %v2371_v7 = vmul.f32 %v6202_v12, %v2339_v30  ;;  %v2406_v33 = vmul.f32 %v1958_v25, %v1958_v25 }
 0x3e6   : > { %v2655_v28 = vsel %vm2591_vm12, %v2559_v32, %v2623_v1  ;;  %v2624_v18 = vsub.f32 0.0, %v2560_v19  ;;  %v2276_v50 = vadd.f32 -0.28449672, %v2244_v15  ;;  %v1927_v49 = vand.u32 2147483647, %v6255_v20 }
 0x3e7   : > { %v2561_v48 = vsub.f32 1.0, %v2529_v6  ;;  %vm2593_vm14 = vcmp.ge.f32.partialorder %v6122_v51, 0.0  ;;  %vm2594_vm15 = vcmp.ge.f32.partialorder %v6126_v13, 0.0  ;;  %v2437_v43 = vsub.f32 0.0, %v2405_v31 }
 0x3e8   : > { %v6272_v36 = vmul.f32 0.5, %v6217_v61  ;;  %v6276_v12 = vadd.f32 %v5983_v53, %v5861_v16  ;;  %v4184_v25 = vpop.eup %4183  ;;  %v2562_v17 = vsub.f32 1.0, %v2530_v41  ;;  %v2308_v32 = vmul.f32 %v6234_v56, %v2276_v50 }
 0x3e9   : > { %v1959_v27 = vmul.f32 0.70710677, %v1927_v49  ;;  %v6281_v34 = vadd.f32 %v5987_v40, %v5857_v55  ;;  %v6283_v35 = vadd.f32 1.0, %v2655_v28  ;;  %v2531_v42 = vmul.f32 %v4184_v25, %v2371_v7 }
 0x3ea   : > { %7001 = vst [vmem:[#allocation56_spill] sm:$0xff] %v6272_v36  ;;  %v2438_v46 = vsub.f32 0.0, %v2406_v33  ;;  %v1928_v59 = vand.u32 2147483647, %v6276_v12  ;;  %v6286_v24 = vpop.eup %4185  ;;  %v2656_v53 = vsel %vm2592_vm13, %v2560_v19, %v2624_v18  ;;  %v2340_v45 = vadd.f32 0.2548296, %v2308_v32 }
 0x3eb   : > { %v1991_v44 = vmul.f32 0.3275911, %v1959_v27  ;;  %v1929_v54 = vand.u32 2147483647, %v6281_v34  ;;  %v2117_v1 = vmul.f32 1.0614054, %v6286_v24  ;;  %v2407_v18 = vmul.f32 %v1959_v27, %v1959_v27 }
 0x3ec   : > { %v2487_v0 = vmul.f32 1.442695, %v2437_v43  ;;  %v1960_v40 = vmul.f32 0.70710677, %v1928_v59  ;;  %v2625_v5 = vsub.f32 0.0, %v2561_v48  ;;  %v2626_v14 = vsub.f32 0.0, %v2562_v17 }
 0x3ed   : > { %vm2595_vm0 = vcmp.ge.f32.partialorder %v6139_v21, 0.0  ;;  %v2023_v6 = vadd.f32 1.0, %v1991_v44  ;;  %v1961_v30 = vmul.f32 0.70710677, %v1929_v54  ;;  %v4188_v31 = vpop.eup %4187  ;;  %v6293_v41 = vadd.f32 1.0, %v2656_v53 }
 0x3ee   : > { %v2563_v15 = vsub.f32 1.0, %v2531_v42  ;;  %v2149_v57 = vadd.f32 -1.4531521, %v2117_v1  ;;  %v1992_v19 = vmul.f32 0.3275911, %v1960_v40  ;;  %v6295_v7 = vpop.eup %4189  ;;  %v2372_v33 = vmul.f32 %v6234_v56, %v2340_v45 }
 0x3ef   : > { %v2489_v28 = vmul.f32 1.442695, %v2438_v46  ;;  %4191 = vrcp.f32 %v2023_v6  ;;  %v2118_v49 = vmul.f32 1.0614054, %v6295_v7  ;;  %v6302_v25 = vadd.f32 %v5991_v29, %v5861_v16 }
 0x3f0   : > { %v2181_v50 = vmul.f32 %v6286_v24, %v2149_v57  ;;  %v2024_v43 = vadd.f32 1.0, %v1992_v19  ;;  %v2657_v32 = vsel %vm2593_vm14, %v2561_v48, %v2625_v5  ;;  %v2658_v42 = vsel %vm2594_vm15, %v2562_v17, %v2626_v14 }
 0x3f1   : > { %4193 = vpow2.f32 %v2487_v0  ;;  %v1993_v56 = vmul.f32 0.3275911, %v1961_v30  ;;  %v2627_v46 = vsub.f32 0.0, %v2563_v15  ;;  %v2150_v27 = vadd.f32 -1.4531521, %v2118_v49 }
 0x3f2   : > { %v2213_v59 = vadd.f32 1.4214138, %v2181_v50  ;;  %4195 = vrcp.f32 %v2024_v43  ;;  %v2532_v53 = vmul.f32 %v4188_v31, %v2372_v33  ;;  %v6309_v45 = vmul.f32 0.5, %v6225_v11 }
 0x3f3   : > { %v2439_v44 = vsub.f32 0.0, %v2407_v18  ;;  %v2025_v54 = vadd.f32 1.0, %v1993_v56  ;;  %v2182_v51 = vmul.f32 %v6295_v7, %v2150_v27  ;;  %4197 = vpow2.f32 %v2489_v28 }
 0x3f4   : > { %v2245_v29 = vmul.f32 %v6286_v24, %v2213_v59  ;;  %v1930_v13 = vand.u32 2147483647, %v6302_v25  ;;  %v6314_v48 = vadd.f32 1.0, %v2657_v32  ;;  %v6316_v17 = vadd.f32 1.0, %v2658_v42 }
 0x3f5   : > { %v2408_v1 = vmul.f32 %v1960_v40, %v1960_v40  ;;  %4199 = vrcp.f32 %v2025_v54  ;;  %v2659_v0 = vsel %vm2595_vm0, %v2563_v15, %v2627_v46  ;;  %v2214_v14 = vadd.f32 1.4214138, %v2182_v51 }
 0x3f6   : > { %v2277_v5 = vadd.f32 -0.28449672, %v2245_v29  ;;  %v6321_v6 = vmul.f32 0.5, %v6255_v20  ;;  %v2564_v31 = vsub.f32 1.0, %v2532_v53  ;;  %vm2596_vm1 = vcmp.ge.f32.partialorder %v6165_v3, 0.0 }
 0x3f7   : > { %v2491_v57 = vmul.f32 1.442695, %v2439_v44  ;;  %v1962_v19 = vmul.f32 0.70710677, %v1930_v13  ;;  %v6326_v33 = vadd.f32 %v6006_v26, %v5857_v55  ;;  %v2246_v28 = vmul.f32 %v6295_v7, %v2214_v14 }
 0x3f8   : > { %7002 = vst [vmem:[#allocation55_spill] sm:$0xff] %v6321_v6  ;;  %v2309_v40 = vmul.f32 %v6286_v24, %v2277_v5  ;;  %v2409_v21 = vmul.f32 %v1961_v30, %v1961_v30  ;;  %v6332_v15 = vadd.f32 %v6013_v63, %v5861_v16  ;;  %v2440_v50 = vsub.f32 0.0, %v2408_v1 }
 0x3f9   : > { %v6334_v18 = vpop.eup %4191  ;;  %v6337_v49 = vmul.f32 0.5, %v6276_v12  ;;  %v1994_v43 = vmul.f32 0.3275911, %v1962_v19  ;;  %v1931_v32 = vand.u32 2147483647, %v6326_v33  ;;  %v6343_v30 = vadd.f32 %v6034_v23, %v5857_v55 }
 0x3fa   : > { %v2341_v26 = vadd.f32 0.2548296, %v2309_v40  ;;  %v2278_v42 = vadd.f32 -0.28449672, %v2246_v28  ;;  %v2119_v56 = vmul.f32 1.0614054, %v6334_v18 }
 0x3fb   : > { %7003 = vst [vmem:[#allocation57_spill] sm:$0xff] %v6337_v49  ;;  %v4194_v46 = vpop.eup %4193  ;;  %v6345_v63 = vadd.f32 1.0, %v2659_v0  ;;  %v2628_v59 = vsub.f32 0.0, %v2564_v31  ;;  %v2026_v27 = vadd.f32 1.0, %v1994_v43  ;;  %v1963_v53 = vmul.f32 0.70710677, %v1931_v32 }
 0x3fc   : > { %v6347_v44 = vpop.eup %4195  ;;  %v2310_v54 = vmul.f32 %v6295_v7, %v2278_v42  ;;  %v2151_v29 = vadd.f32 -1.4531521, %v2119_v56  ;;  %v2441_v51 = vsub.f32 0.0, %v2409_v21  ;;  %v1932_v13 = vand.u32 2147483647, %v6332_v15 }
 0x3fd   : > { %v2373_v1 = vmul.f32 %v6286_v24, %v2341_v26  ;;  %v2120_v5 = vmul.f32 1.0614054, %v6347_v44  ;;  %4201 = vrcp.f32 %v2026_v27  ;;  %v1995_v23 = vmul.f32 0.3275911, %v1963_v53  ;;  %v4198_v14 = vpop.eup %4197 }
 0x3fe   : > { %v2342_v0 = vadd.f32 0.2548296, %v2310_v54  ;;  %v2183_v40 = vmul.f32 %v6334_v18, %v2151_v29  ;;  %4203 = vpow2.f32 %v2491_v57  ;;  %v2493_v28 = vmul.f32 1.442695, %v2440_v50 }
 0x3ff   : > { %v6354_v43 = vpop.eup %4199  ;;  %v2152_v32 = vadd.f32 -1.4531521, %v2120_v5  ;;  %v2410_v42 = vmul.f32 %v1962_v19, %v1962_v19  ;;  %v2027_v56 = vadd.f32 1.0, %v1995_v23  ;;  %v1964_v21 = vmul.f32 0.70710677, %v1932_v13 }
 0x400   : > { %v2660_v6 = vsel %vm2596_vm1, %v2564_v31, %v2628_v59  ;;  %v2215_v24 = vadd.f32 1.4214138, %v2183_v40  ;;  %v2121_v26 = vmul.f32 1.0614054, %v6354_v43  ;;  %v2495_v27 = vmul.f32 1.442695, %v2441_v51 }
 0x401   : > { %v2533_v49 = vmul.f32 %v4194_v46, %v2373_v1  ;;  %v2184_v54 = vmul.f32 %v6347_v44, %v2152_v32  ;;  %4205 = vrcp.f32 %v2027_v56  ;;  %v1996_v29 = vmul.f32 0.3275911, %v1964_v21 }
 0x402   : > { %v2374_v57 = vmul.f32 %v6295_v7, %v2342_v0  ;;  %v2247_v50 = vmul.f32 %v6334_v18, %v2215_v24  ;;  %v2153_v5 = vadd.f32 -1.4531521, %v2121_v26  ;;  %v6363_v19 = vmul.f32 0.5, %v6281_v34 }
 0x403   : > { %v2216_v13 = vadd.f32 1.4214138, %v2184_v54  ;;  %4207 = vpow2.f32 %v2493_v28  ;;  %v2442_v3 = vsub.f32 0.0, %v2410_v42  ;;  %v2028_v31 = vadd.f32 1.0, %v1996_v29 }
 0x404   : > { %7004 = vst [vmem:[#allocation60_spill] sm:$0xff] %v6363_v19  ;;  %v6365_v59 = vadd.f32 1.0, %v2660_v6  ;;  %vm2597_vm2 = vcmp.ge.f32.partialorder %v6217_v61, 0.0  ;;  %v2279_v46 = vadd.f32 -0.28449672, %v2247_v50  ;;  %v2185_v51 = vmul.f32 %v6354_v43, %v2153_v5 }
 0x405   : > { %v6370_v1 = vmul.f32 0.5, %v6302_v25  ;;  %v2565_v7 = vsub.f32 1.0, %v2533_v49  ;;  %v2248_v23 = vmul.f32 %v6347_v44, %v2216_v13  ;;  %4209 = vpow2.f32 %v2495_v27 }
 0x406   : > { %v6375_v0 = vadd.f32 %v6017_v4, %v5857_v55  ;;  %v2534_v40 = vmul.f32 %v4198_v14, %v2374_v57  ;;  %v2311_v6 = vmul.f32 %v6334_v18, %v2279_v46  ;;  %v2217_v28 = vadd.f32 1.4214138, %v2185_v51 }
 0x407   : > { %7005 = vst [vmem:[#allocation38_spill] sm:$0xff] %v6370_v1  ;;  %4211 = vrcp.f32 %v2028_v31  ;;  %v6378_v32 = vpop.eup %4201  ;;  %v2280_v42 = vadd.f32 -0.28449672, %v2248_v23  ;;  %v2497_v56 = vmul.f32 1.442695, %v2442_v3  ;;  %v2411_v24 = vmul.f32 %v1963_v53, %v1963_v53 }
 0x408   : > { %v6382_v49 = vadd.f32 %v6020_v52, %v5861_v16  ;;  %v4204_v26 = vpop.eup %4203  ;;  %v2343_v27 = vadd.f32 0.2548296, %v2311_v6  ;;  %v2249_v54 = vmul.f32 %v6354_v43, %v2217_v28  ;;  %v2122_v4 = vmul.f32 1.0614054, %v6378_v32 }
 0x409   : > { %v6387_v14 = vmul.f32 0.5, %v6326_v33  ;;  %v2629_v29 = vsub.f32 0.0, %v2565_v7  ;;  %vm2598_vm3 = vcmp.ge.f32.partialorder %v6225_v11, 0.0  ;;  %v2312_v57 = vmul.f32 %v6347_v44, %v2280_v42 }
 0x40a   : > { %v2412_v50 = vmul.f32 %v1964_v21, %v1964_v21  ;;  %v1933_v53 = vand.u32 2147483647, %v6375_v0  ;;  %v2566_v5 = vsub.f32 1.0, %v2534_v40  ;;  %v2375_v52 = vmul.f32 %v6334_v18, %v2343_v27 }
 0x40b   : > { %v2281_v13 = vadd.f32 -0.28449672, %v2249_v54  ;;  %v2154_v3 = vadd.f32 -1.4531521, %v2122_v4  ;;  %v6393_v31 = vpop.eup %4205  ;;  %v2344_v46 = vadd.f32 0.2548296, %v2312_v57  ;;  %4213 = vpow2.f32 %v2497_v56 }
 0x40c   : > { %v2443_v51 = vsub.f32 0.0, %v2411_v24  ;;  %v1965_v23 = vmul.f32 0.70710677, %v1933_v53  ;;  %v2535_v6 = vmul.f32 %v4204_v26, %v2375_v52  ;;  %v2123_v21 = vmul.f32 1.0614054, %v6393_v31 }
 0x40d   : > { %v2313_v28 = vmul.f32 %v6354_v43, %v2281_v13  ;;  %v2186_v19 = vmul.f32 %v6378_v32, %v2154_v3  ;;  %v4208_v42 = vpop.eup %4207  ;;  %v2661_v40 = vsel %vm2597_vm2, %v2565_v7, %v2629_v29  ;;  %v2376_v18 = vmul.f32 %v6347_v44, %v2344_v46 }
 0x40e   : > { %v1997_v27 = vmul.f32 0.3275911, %v1965_v23  ;;  %v1934_v54 = vand.u32 2147483647, %v6382_v49  ;;  %v2630_v4 = vsub.f32 0.0, %v2566_v5  ;;  %vm2599_vm4 = vcmp.ge.f32.partialorder %v6255_v20, 0.0 }
 0x40f   : > { %v2345_v56 = vadd.f32 0.2548296, %v2313_v28  ;;  %v2218_v24 = vadd.f32 1.4214138, %v2186_v19  ;;  %v2444_v26 = vsub.f32 0.0, %v2412_v50  ;;  %v4210_v57 = vpop.eup %4209  ;;  %v2567_v53 = vsub.f32 1.0, %v2535_v6 }
 0x410   : > { %v2536_v52 = vmul.f32 %v4208_v42, %v2376_v18  ;;  %v2155_v13 = vadd.f32 -1.4531521, %v2123_v21  ;;  %v2029_v3 = vadd.f32 1.0, %v1997_v27  ;;  %v6405_v61 = vadd.f32 1.0, %v2661_v40 }
 0x411   : > { %v6403_v1 = vpop.eup %4211  ;;  %v2250_v44 = vmul.f32 %v6378_v32, %v2218_v24  ;;  %v2499_v7 = vmul.f32 1.442695, %v2443_v51  ;;  %v1966_v29 = vmul.f32 0.70710677, %v1934_v54  ;;  %v2413_v19 = vmul.f32 %v1965_v23, %v1965_v23 }
 0x412   : > { %v2187_v46 = vmul.f32 %v6393_v31, %v2155_v13  ;;  %v2124_v36 = vmul.f32 1.0614054, %v6403_v1  ;;  %4215 = vrcp.f32 %v2029_v3  ;;  %v2662_v50 = vsel %vm2598_vm3, %v2566_v5, %v2630_v4 }
 0x413   : > { %v2377_v6 = vmul.f32 %v6354_v43, %v2345_v56  ;;  %v2282_v28 = vadd.f32 -0.28449672, %v2250_v44  ;;  %v2501_v21 = vmul.f32 1.442695, %v2444_v26  ;;  %v2631_v42 = vsub.f32 0.0, %v2567_v53 }
 0x414   : > { %v2568_v40 = vsub.f32 1.0, %v2536_v52  ;;  %vm2600_vm5 = vcmp.ge.f32.partialorder %v6276_v12, 0.0  ;;  %v2219_v18 = vadd.f32 1.4214138, %v2187_v46  ;;  %v2156_v51 = vadd.f32 -1.4531521, %v2124_v36 }
 0x415   : > { %v2314_v27 = vmul.f32 %v6378_v32, %v2282_v28  ;;  %4217 = vpow2.f32 %v2499_v7  ;;  %v6416_v54 = vmul.f32 0.5, %v6332_v15  ;;  %v1998_v23 = vmul.f32 0.3275911, %v1966_v29  ;;  %v4214_v24 = vpop.eup %4213 }
 0x416   : > { %v6418_v11 = vadd.f32 1.0, %v2662_v50  ;;  %v2251_v43 = vmul.f32 %v6393_v31, %v2219_v18  ;;  %v2188_v5 = vmul.f32 %v6403_v1, %v2156_v51  ;;  %v2445_v4 = vsub.f32 0.0, %v2413_v19 }
 0x417   : > { %v6422_v56 = vmul.f32 %v4210_v57, %v2377_v6  ;;  %v2346_v26 = vadd.f32 0.2548296, %v2314_v27  ;;  %4219 = vpow2.f32 %v2501_v21  ;;  %v2030_v36 = vadd.f32 1.0, %v1998_v23 }
 0x418   : > { %v2663_v52 = vsel %vm2599_vm4, %v2567_v53, %v2631_v42  ;;  %v2632_v13 = vsub.f32 0.0, %v2568_v40  ;;  %v2283_v3 = vadd.f32 -0.28449672, %v2251_v43  ;;  %v2220_v44 = vadd.f32 1.4214138, %v2188_v5 }
 0x419   : > { %v2378_v7 = vmul.f32 %v6378_v32, %v2346_v26  ;;  %4221 = vrcp.f32 %v2030_v36  ;;  %v2414_v46 = vmul.f32 %v1966_v29, %v1966_v29  ;;  %v1935_v50 = vand.u32 2147483647, %v6343_v30 }
 0x41a   : > { %v2315_v28 = vmul.f32 %v6393_v31, %v2283_v3  ;;  %v2252_v57 = vmul.f32 %v6403_v1, %v2220_v44  ;;  %v2503_v19 = vmul.f32 1.442695, %v2445_v4  ;;  %v6431_v6 = vmul.f32 0.5, %v6375_v0 }
 0x41b   : > { %v6433_v21 = vadd.f32 1.0, %v2663_v52  ;;  %v2569_v20 = vsub.f32 1.0, %v6422_v56  ;;  %v6436_v53 = vmul.f32 %v4214_v24, %v2378_v7  ;;  %v1967_v42 = vmul.f32 0.70710677, %v1935_v50  ;;  %v7006_v7 = vld [vmem:[#allocation32_spill] sm:$0xff] }
 0x41c   : > { %v6438_v32 = vpop.eup %4215  ;;  %vm2601_vm6 = vcmp.ge.f32.partialorder %v6281_v34, 0.0  ;;  %v2347_v29 = vadd.f32 0.2548296, %v2315_v28  ;;  %v2284_v18 = vadd.f32 -0.28449672, %v2252_v57  ;;  %v2740_v51 = vmul.f32 %v6092_v58, %v6038_v47 }
 0x41d   : > { %v2742_v27 = vmul.f32 %v6096_v62, %v6052_v10  ;;  %v2664_v23 = vsel %vm2600_vm5, %v2568_v40, %v2632_v13  ;;  %vm2603_vm7 = vcmp.ge.f32.partialorder %v6326_v33, 0.0  ;;  %v2125_v24 = vmul.f32 1.0614054, %v6438_v32 }
 0x41e   : > { %v2446_v43 = vsub.f32 0.0, %v2414_v46  ;;  %v1999_v5 = vmul.f32 0.3275911, %v1967_v42  ;;  %v2379_v4 = vmul.f32 %v6393_v31, %v2347_v29  ;;  %v2316_v56 = vmul.f32 %v6403_v1, %v2284_v18 }
 0x41f   : > { %v2772_v26 = vpack.c.bf16 %v2742_v27, %v2740_v51  ;;  %v6453_v47 = vadd.f32 %v6044_v37, %v5861_v16  ;;  %v4218_v58 = vpop.eup %4217  ;;  %v2570_v10 = vsub.f32 1.0, %v6436_v53  ;;  %vm2602_vm8 = vcmp.ge.f32.partialorder %v6302_v25, 0.0  ;;  %v7008_v51 = vld [vmem:[#allocation33_spill] sm:$0xff] }
 0x420   : > { %v2157_v62 = vadd.f32 -1.4531521, %v2125_v24  ;;  %v2031_v12 = vadd.f32 1.0, %v1999_v5  ;;  %v2415_v40 = vmul.f32 %v1967_v42, %v1967_v42  ;;  %v2539_v36 = vmul.f32 %v4218_v58, %v2379_v4 }
 0x421   : > { %v2348_v52 = vadd.f32 0.2548296, %v2316_v56  ;;  %4223 = vpow2.f32 %v2503_v19  ;;  %2954 = vmatprep.mubr.bf16.mxu0 %v2772_v26  ;;  %v1936_v31 = vand.u32 2147483647, %v6453_v47  ;;  %v4220_v13 = vpop.eup %4219  ;;  %v6458_v3 = vadd.f32 1.0, %v2664_v23 }
 0x422   : > { %v2633_v44 = vsub.f32 0.0, %v2569_v20  ;;  %v2189_v37 = vmul.f32 %v6438_v32, %v2157_v62  ;;  %4225 = vrcp.f32 %v2031_v12  ;;  %v7007_v46 = vpack.c.bf16 %v6025_v9, %v7006_v7 }
 0x423   : > { %v2571_v50 = vsub.f32 1.0, %v2539_v36  ;;  %v2380_v28 = vmul.f32 %v6403_v1, %v2348_v52  ;;  %v2505_v57 = vmul.f32 1.442695, %v2446_v43  ;;  %v1968_v53 = vmul.f32 0.70710677, %v1936_v31  ;;  %v6465_v19 = vpop.eup %4221 }
 0x424   : > { %2955 = vmatmul.mubr.bf16.vlgmr.msra.gmra.mrb[32].mxu0 %v7007_v46  ;;  %v2634_v42 = vsub.f32 0.0, %v2570_v10  ;;  %v2221_v29 = vadd.f32 1.4214138, %v2189_v37  ;;  %v2447_v18 = vsub.f32 0.0, %v2415_v40  ;;  %v6469_v27 = vadd.f32 %v7008_v51, %v5857_v55 }
 0x425   : > { %v2635_v23 = vsub.f32 0.0, %v2571_v50  ;;  %v2540_v24 = vmul.f32 %v4220_v13, %v2380_v28  ;;  %v2126_v5 = vmul.f32 1.0614054, %v6465_v19  ;;  %v2000_v9 = vmul.f32 0.3275911, %v1968_v53  ;;  %v7009_v28 = vld [vmem:[#allocation40_spill] sm:$0xff] }
 0x426   : > { %v2665_v4 = vsel %vm2601_vm6, %v2569_v20, %v2633_v44  ;;  %vm2604_vm9 = vcmp.ge.f32.partialorder %v6332_v15, 0.0  ;;  %v2253_v1 = vmul.f32 %v6438_v32, %v2221_v29  ;;  %v2416_v43 = vmul.f32 %v1968_v53, %v1968_v53  ;;  %v7016_v15 = vld [vmem:[#allocation37_spill] sm:$0xff] }
 0x427   : > { %v1937_v56 = vand.u32 2147483647, %v6469_v27  ;;  %v2667_v26 = vsel %vm2603_vm7, %v2571_v50, %v2635_v23  ;;  %v2572_v55 = vsub.f32 1.0, %v2540_v24  ;;  %v2158_v58 = vadd.f32 -1.4531521, %v2126_v5 }
 0x428   : > { %v2032_v62 = vadd.f32 1.0, %v2000_v9  ;;  %v2285_v12 = vadd.f32 -0.28449672, %v2253_v1  ;;  %4227 = vpow2.f32 %v2505_v57  ;;  %v2507_v40 = vmul.f32 1.442695, %v2447_v18 }
 0x429   : > { %v1969_v36 = vmul.f32 0.70710677, %v1937_v56  ;;  %v6479_v52 = vadd.f32 1.0, %v2665_v4  ;;  %v2666_v34 = vsel %vm2602_vm8, %v2570_v10, %v2634_v42  ;;  %v2190_v20 = vmul.f32 %v6465_v19, %v2158_v58  ;;  %v7010_v58 = vld [vmem:[#allocation35_spill] sm:$0xff] }
 0x42a   : > { %4229 = vrcp.f32 %v2032_v62  ;;  %v2731_v31 = vadd.f32 1.0, %v2667_v26  ;;  %v2317_v13 = vmul.f32 %v6438_v32, %v2285_v12  ;;  %v2448_v33 = vsub.f32 0.0, %v2416_v43  ;;  %v7011_v62 = vld [vmem:[#allocation47_spill] sm:$0xff] }
 0x42b   : > { %v2001_v44 = vmul.f32 0.3275911, %v1969_v36  ;;  %v4224_v37 = vpop.eup %4223  ;;  %v2636_v7 = vsub.f32 0.0, %v2572_v55  ;;  %v2222_v46 = vadd.f32 1.4214138, %v2190_v20  ;;  %v2417_v50 = vmul.f32 %v1969_v36, %v1969_v36  ;;  %v7013_v36 = vld [vmem:[#allocation49_spill] sm:$0xff] }
 0x42c   : > { %v6487_v57 = vadd.f32 %v7009_v28, %v5861_v16  ;;  %v6489_v53 = vpop.eup %4225  ;;  %v6491_v25 = vadd.f32 1.0, %v2666_v34  ;;  %v2349_v10 = vadd.f32 0.2548296, %v2317_v13  ;;  %4231 = vpow2.f32 %v2507_v40  ;;  %v7012_v40 = vld [vmem:[#allocation42_spill] sm:$0xff] }
 0x42d   : > { %v2033_v42 = vadd.f32 1.0, %v2001_v44  ;;  %vm2605_vm10 = vcmp.ge.f32.partialorder %v6375_v0, 0.0  ;;  %v2254_v29 = vmul.f32 %v6465_v19, %v2222_v46  ;;  %v2127_v18 = vmul.f32 1.0614054, %v6489_v53  ;;  %v7014_v20 = vld [vmem:[#allocation34_spill] sm:$0xff] }
 0x42e   : > { %v2449_v51 = vsub.f32 0.0, %v2417_v50  ;;  %v1938_v23 = vand.u32 2147483647, %v6487_v57  ;;  %v6498_v24 = vmul.f32 %v2731_v31, %v6387_v14  ;;  %v2381_v16 = vmul.f32 %v6438_v32, %v2349_v10  ;;  %v7015_v31 = vld [vmem:[#allocation44_spill] sm:$0xff] }
 0x42f   : > { %v2509_v5 = vmul.f32 1.442695, %v2448_v33  ;;  %4233 = vrcp.f32 %v2033_v42  ;;  %v2668_v9 = vsel %vm2604_vm9, %v2572_v55, %v2636_v7  ;;  %v2286_v4 = vadd.f32 -0.28449672, %v2254_v29  ;;  %v7017_v55 = vld [vmem:[#allocation50_spill] sm:$0xff] }
 0x430   : > { %v2159_v1 = vadd.f32 -1.4531521, %v2127_v18  ;;  %v2511_v43 = vmul.f32 1.442695, %v2449_v51  ;;  %v2541_v56 = vmul.f32 %v4224_v37, %v2381_v16  ;;  %v1970_v26 = vmul.f32 0.70710677, %v1938_v23 }
 0x431   : > { %v2744_v12 = vmul.f32 %v7011_v62, %v7010_v58  ;;  %v2746_v34 = vmul.f32 %v7013_v36, %v7012_v40  ;;  %v2318_v14 = vmul.f32 %v6465_v19, %v2286_v4  ;;  %v2743_v13 = vmul.f32 %v7015_v31, %v7014_v20  ;;  %v7018_v4 = vld [vmem:[#allocation51_spill] sm:$0xff]  ;;  %v7020_v20 = vld [vmem:[#allocation46_spill] sm:$0xff] }
 0x432   : > { %v2191_v32 = vmul.f32 %v6489_v53, %v2159_v1  ;;  %v2745_v33 = vmul.f32 %v7017_v55, %v7016_v15  ;;  %v4228_v44 = vpop.eup %4227  ;;  %v6513_v7 = vadd.f32 1.0, %v2668_v9  ;;  %v2573_v37 = vsub.f32 1.0, %v2541_v56  ;;  %v7019_v56 = vld [vmem:[#allocation45_spill] sm:$0xff]  ;;  %v7021_v31 = vld [vmem:[#allocation43_spill] sm:$0xff] }
 0x433   : > { %v2002_v46 = vmul.f32 0.3275911, %v1970_v26  ;;  %v2774_v50 = vpack.c.bf16 %v2746_v34, %v2744_v12  ;;  %v2350_v10 = vadd.f32 0.2548296, %v2318_v14  ;;  %4235 = vpow2.f32 %v2509_v5 }
 0x434   : > { %v6515_v28 = vpop.eup %4229  ;;  %v2223_v42 = vadd.f32 1.4214138, %v2191_v32  ;;  %v2773_v29 = vpack.c.bf16 %v2745_v33, %v2743_v13  ;;  %v2637_v18 = vsub.f32 0.0, %v2573_v37  ;;  %vm2606_vm11 = vcmp.ge.f32.partialorder %v6382_v49, 0.0  ;;  %v7022_v13 = vld [vmem:[#allocation54_spill] sm:$0xff] }
 0x435   : > { %v2128_v51 = vmul.f32 1.0614054, %v6515_v28  ;;  %4237 = vpow2.f32 %v2511_v43  ;;  %v2034_v23 = vadd.f32 1.0, %v2002_v46  ;;  %2962 = vmatprep.mubr.bf16.mxu0 %v2774_v50  ;;  %v2382_v16 = vmul.f32 %v6465_v19, %v2350_v10  ;;  %v7023_v46 = vld [vmem:[#allocation53_spill] sm:$0xff] }
 0x436   : > { %v2255_v9 = vmul.f32 %v6489_v53, %v2223_v42  ;;  %2963 = vmatmul.mubr.bf16.gmra.mrb[36].mxu0 %v2773_v29  ;;  %v2748_v1 = vmul.f32 %v6242_v60, %v7018_v4  ;;  %v2750_v5 = vmul.f32 %v6263_v8, %v7019_v56  ;;  %v4232_v58 = vpop.eup %4231  ;;  %v2669_v62 = vsel %vm2605_vm10, %v2573_v37, %v2637_v18  ;;  %v7024_v18 = vld [vmem:[#allocation48_spill] sm:$0xff] }
 0x437   : > { %v2160_v12 = vadd.f32 -1.4531521, %v2128_v51  ;;  %4239 = vrcp.f32 %v2034_v23  ;;  %v2418_v43 = vmul.f32 %v1970_v26, %v1970_v26  ;;  %v2733_v40 = vadd.f32 1.0, %v2669_v62 }
 0x438   : > { %v2542_v36 = vmul.f32 %v4228_v44, %v2382_v16  ;;  %v2287_v34 = vadd.f32 -0.28449672, %v2255_v9  ;;  %v2776_v19 = vpack.c.bf16 %v2750_v5, %v2748_v1  ;;  %v2747_v60 = vmul.f32 %v6196_v39, %v7020_v20 }
 0x439   : > { %v6527_v14 = vpop.eup %4233  ;;  %v2192_v32 = vmul.f32 %v6515_v28, %v2160_v12  ;;  %v2749_v8 = vmul.f32 %v6261_v22, %v7021_v31  ;;  %v2752_v0 = vmul.f32 %v6293_v41, %v7022_v13  ;;  %v6537_v15 = vmul.f32 %v2733_v40, %v6431_v6  ;;  %v7026_v12 = vld [vmem:[#allocation56_spill] sm:$0xff]  ;;  %v7029_v13 = vld [vmem:[#allocation55_spill] sm:$0xff] }
 0x43a   : > { %v2574_v26 = vsub.f32 1.0, %v2542_v36  ;;  %v2319_v55 = vmul.f32 %v6489_v53, %v2287_v34  ;;  %v2129_v33 = vmul.f32 1.0614054, %v6527_v14  ;;  %2970 = vmatprep.mubr.bf16.mxu0 %v2776_v19  ;;  %v2754_v39 = vmul.f32 %v6316_v17, %v6209_v38  ;;  %v7027_v19 = vld [vmem:[#allocation57_spill] sm:$0xff] }
 0x43b   : > { %v2224_v44 = vadd.f32 1.4214138, %v2192_v32  ;;  %v2775_v37 = vpack.c.bf16 %v2749_v8, %v2747_v60  ;;  %v2751_v22 = vmul.f32 %v6283_v35, %v7023_v46  ;;  %v2783_v41 = vpack.c.bf16 %v6537_v15, %v6498_v24 }
 0x43c   : > { %v2638_v50 = vsub.f32 0.0, %v2574_v26  ;;  %v2351_v6 = vadd.f32 0.2548296, %v2319_v55  ;;  %v2161_v10 = vadd.f32 -1.4531521, %v2129_v33  ;;  %v2778_v29 = vpack.c.bf16 %v2754_v39, %v2752_v0 }
 0x43d   : > { %v2256_v42 = vmul.f32 %v6515_v28, %v2224_v44  ;;  %v2753_v51 = vmul.f32 %v6314_v48, %v7024_v18  ;;  %v2756_v23 = vmul.f32 %v6365_v59, %v6259_v2  ;;  %v4236_v16 = vpop.eup %4235  ;;  %v2758_v24 = vmul.f32 %v6418_v11, %v6309_v45  ;;  %v7025_v59 = vld [vmem:[#allocation52_spill] sm:$0xff]  ;;  %v7028_v11 = vld [vmem:[#allocation38_spill] sm:$0xff] }
 0x43e   : > { %v2670_v38 = vsel %vm2606_vm11, %v2574_v26, %v2638_v50  ;;  %v2383_v35 = vmul.f32 %v6489_v53, %v2351_v6  ;;  %v2193_v17 = vmul.f32 %v6527_v14, %v2161_v10  ;;  %2971 = vmatmul.mubr.bf16.gmra.mrb[40].mxu0 %v2775_v37  ;;  %v2450_v56 = vsub.f32 0.0, %v2418_v43 }
 0x43f   : > { %v4238_v9 = vpop.eup %4237  ;;  %v2734_v4 = vadd.f32 1.0, %v2670_v38  ;;  %v2288_v1 = vadd.f32 -0.28449672, %v2256_v42  ;;  %2978 = vmatprep.mubr.bf16.mxu0 %v2778_v29  ;;  %v2777_v48 = vpack.c.bf16 %v2753_v51, %v2751_v22  ;;  %v2780_v2 = vpack.c.bf16 %v2758_v24, %v2756_v23 }
 0x440   : > { %v2225_v5 = vadd.f32 1.4214138, %v2193_v17  ;;  %v2755_v62 = vmul.f32 %v6345_v63, %v7025_v59  ;;  %v2757_v53 = vmul.f32 %v6405_v61, %v7026_v12  ;;  %v2543_v36 = vmul.f32 %v4232_v58, %v2383_v35  ;;  %v7030_v58 = vld [vmem:[#allocation60_spill] sm:$0xff] }
 0x441   : > { %v4240_v40 = vpop.eup %4239  ;;  %v2320_v34 = vmul.f32 %v6515_v28, %v2288_v1  ;;  %v2760_v45 = vmul.f32 %v6458_v3, %v7027_v19  ;;  %v2762_v43 = vmul.f32 %v6491_v25, %v7028_v11  ;;  %v2702_v32 = vmul.f32 0.5, %v6382_v49  ;;  %v6589_v11 = vld [vmem:[%s7031_s1] ss:$0 sm:$0xff] }
 0x442   : > { %v2257_v20 = vmul.f32 %v6527_v14, %v2225_v5  ;;  %v2130_v60 = vmul.f32 1.0614054, %v4240_v40  ;;  %v2779_v31 = vpack.c.bf16 %v2757_v53, %v2755_v62  ;;  %v2759_v61 = vmul.f32 %v6433_v21, %v7029_v13 }
 0x443   : > { %v2352_v63 = vadd.f32 0.2548296, %v2320_v34  ;;  %v2782_v8 = vpack.c.bf16 %v2762_v43, %v2760_v45  ;;  %v2761_v0 = vmul.f32 %v6479_v52, %v7030_v58  ;;  %v2764_v3 = vmul.f32 %v6513_v7, %v6416_v54 }
 0x444   : > { %v2289_v15 = vadd.f32 -0.28449672, %v2257_v20  ;;  %v2162_v26 = vadd.f32 -1.4531521, %v2130_v60  ;;  %v2766_v25 = vmul.f32 %v2734_v4, %v2702_v32  ;;  %v2575_v55 = vsub.f32 1.0, %v2543_v36 }
 0x445   : > { %v2513_v49 = vmul.f32 1.442695, %v2450_v56  ;;  %v2781_v33 = vpack.c.bf16 %v2761_v0, %v2759_v61  ;;  %v2384_v44 = vmul.f32 %v6515_v28, %v2352_v63  ;;  %vm2607_vm12 = vcmp.ge.f32.partialorder %v6343_v30, 0.0 }
 0x446   : > { %v2321_v37 = vmul.f32 %v6527_v14, %v2289_v15  ;;  %v2194_v39 = vmul.f32 %v4240_v40, %v2162_v26  ;;  %2979 = vmatmul.mubr.bf16.gmra.mrb[44].mxu0 %v2777_v48  ;;  %v2784_v46 = vpack.c.bf16 %v2766_v25, %v2764_v3  ;;  %v2639_v52 = vsub.f32 0.0, %v2575_v55 }
 0x447   : > { %2986 = vmatprep.mubr.bf16.mxu0 %v2780_v2  ;;  %4241 = vpow2.f32 %v2513_v49  ;;  %v2544_v50 = vmul.f32 %v4236_v16, %v2384_v44  ;;  %vm2609_vm13 = vcmp.ge.f32.partialorder %v6469_v27, 0.0  ;;  %v2703_v17 = vmul.f32 0.5, %v6343_v30 }
 0x448   : > { %v2353_v21 = vadd.f32 0.2548296, %v2321_v37  ;;  %v2226_v22 = vadd.f32 1.4214138, %v2194_v39  ;;  %3002 = vmatprep.mubr.bf16.mxu1 %v2784_v46  ;;  %v2671_v28 = vsel %vm2607_vm12, %v2575_v55, %v2639_v52  ;;  %v2705_v24 = vmul.f32 0.5, %v6469_v27 }
 0x449   : > { %3003 = vmatmul.mubr.bf16.vlgmr.msra.gmra.mrb[32].mxu1 %v2783_v41  ;;  %v2576_v42 = vsub.f32 1.0, %v2544_v50  ;;  %v2735_v38 = vadd.f32 1.0, %v2671_v28  ;;  %vm2608_vm14 = vcmp.ge.f32.partialorder %v6453_v47, 0.0  ;;  %vm2610_vm15 = vcmp.ge.f32.partialorder %v6487_v57, 0.0 }
 0x44a   : > { %v2385_v54 = vmul.f32 %v6527_v14, %v2353_v21  ;;  %v2258_v7 = vmul.f32 %v4240_v40, %v2226_v22  ;;  %v2704_v53 = vmul.f32 0.5, %v6453_v47  ;;  %v2706_v30 = vmul.f32 0.5, %v6487_v57 }
 0x44b   : > { %v2640_v41 = vsub.f32 0.0, %v2576_v42  ;;  %v2767_v1 = vmul.f32 %v2735_v38, %v2703_v17 }
 0x44c   : > { %v2545_v6 = vmul.f32 %v4238_v9, %v2385_v54  ;;  %v2290_v10 = vadd.f32 -0.28449672, %v2258_v7 }
 0x44d   : > { %v2672_v48 = vsel %vm2608_vm14, %v2576_v42, %v2640_v41 }
 0x44e   : > { %v2577_v29 = vsub.f32 1.0, %v2545_v6  ;;  %v2322_v18 = vmul.f32 %v4240_v40, %v2290_v10  ;;  %2987 = vmatmul.mubr.bf16.gmra.mrb[48].mxu0 %v2779_v31  ;;  %v2736_v62 = vadd.f32 1.0, %v2672_v48 }
 0x44f   : > { %2994 = vmatprep.mubr.bf16.mxu0 %v2782_v8 }
 0x450   : > { %v2641_v51 = vsub.f32 0.0, %v2577_v29  ;;  %v2354_v23 = vadd.f32 0.2548296, %v2322_v18 }
 0x451   : > { %v4242_v14 = vpop.eup %4241 }
 0x452   : > { %v2673_v16 = vsel %vm2609_vm13, %v2577_v29, %v2641_v51  ;;  %v2386_v35 = vmul.f32 %v4240_v40, %v2354_v23  ;;  %v2768_v40 = vmul.f32 %v2736_v62, %v2704_v53 }
 0x453   : > { %v2737_v9 = vadd.f32 1.0, %v2673_v16 }
 0x454   : > { %v2546_v4 = vmul.f32 %v4242_v14, %v2386_v35 }
 0x455   : > { %v2769_v56 = vmul.f32 %v2737_v9, %v2705_v24 }
 0x456   : > { %v2578_v5 = vsub.f32 1.0, %v2546_v4  ;;  %2995 = vmatmul.mubr.bf16.gmra.mrb[52].mxu0 %v2781_v33 }
 0x457   : > { %v2785_v2 = vpack.c.bf16 %v2769_v56, %v2767_v1 }
 0x458   : > { %v2642_v59 = vsub.f32 0.0, %v2578_v5 }
 0x45a   : > { %v2674_v12 = vsel %vm2610_vm15, %v2578_v5, %v2642_v59 }
 0x45b   : > { %v2738_v27 = vadd.f32 1.0, %v2674_v12 }
 0x45d   : > { %v2770_v36 = vmul.f32 %v2738_v27, %v2706_v30 }
 0x45f   : > { %v2786_v34 = vpack.c.bf16 %v2770_v36, %v2768_v40 }
 0x461   : > { %3010 = vmatprep.mubr.bf16.mxu1 %v2786_v34 }
 0x462   : > { %3011 = vmatmul.mubr.bf16.gmra.mrb[36].mxu1 %v2785_v2 }
 0x4f7   : > { %v3591_v19 = vpop.f32.mrb[32].mxu0 }
 0x4f8   : > { %v3592_v45 = vpop.f32.mrb[33].mxu0 }
 0x4f9   : > { %v3593_v43 = vadd.f32 %v3592_v45, %v3591_v19  ;;  %v3594_v32 = vpop.f32.mrb[34].mxu0 }
 0x4fa   : > { %v3595_v20 = vpop.f32.mrb[35].mxu0 }
 0x4fb   : > { %v3596_v60 = vadd.f32 %v3595_v20, %v3594_v32  ;;  %v6592_v47 = vadd.f32 %v3593_v43, %v6589_v11 }
 0x4fd   : > { %v6595_v57 = vadd.f32 %v3596_v60, %v6589_v11  ;;  %v3019_v31 = vmul.f32 %v6592_v47, %v6592_v47 }
 0x4ff   : > { %3035 = vadd.xlane.f32.xlu0 %v3019_v31  ;;  %v3020_v63 = vmul.f32 %v6595_v57, %v6595_v57 }
 0x503   : > { %3037 = vadd.xlane.f32.xlu0 %v3020_v63 }
 0x509   : > { %v3597_v8 = vpop.f32.mrb[36].mxu0 }
 0x50a   : > { %v3598_v13 = vpop.f32.mrb[37].mxu0 }
 0x50b   : > { %v3599_v61 = vadd.f32 %v3598_v13, %v3597_v8  ;;  %v3600_v58 = vpop.f32.mrb[38].mxu0 }
 0x50c   : > { %v3601_v0 = vpop.f32.mrb[39].mxu0 }
 0x50d   : > { %v3602_v15 = vadd.f32 %v3601_v0, %v3600_v58  ;;  %v6602_v26 = vadd.f32 %v3599_v61, %v6589_v11 }
 0x50f   : > { %v6605_v3 = vadd.f32 %v3602_v15, %v6589_v11  ;;  %v3021_v25 = vmul.f32 %v6602_v26, %v6602_v26 }
 0x511   : > { %v3603_v55 = vpop.f32.mrb[40].mxu0  ;;  %3039 = vadd.xlane.f32.xlu1 %v3021_v25  ;;  %v3022_v37 = vmul.f32 %v6605_v3, %v6605_v3 }
 0x512   : > { %v3604_v49 = vpop.f32.mrb[41].mxu0 }
 0x513   : > { %v3605_v33 = vadd.f32 %v3604_v49, %v3603_v55  ;;  %v3606_v44 = vpop.f32.mrb[42].mxu0 }
 0x514   : > { %v3607_v39 = vpop.f32.mrb[43].mxu0 }
 0x515   : > { %v6612_v46 = vadd.f32 %v3605_v33, %v6589_v11  ;;  %v3608_v21 = vadd.f32 %v3607_v39, %v3606_v44  ;;  %3041 = vadd.xlane.f32.xlu1 %v3022_v37 }
 0x517   : > { %v6615_v22 = vadd.f32 %v3608_v21, %v6589_v11  ;;  %v3023_v52 = vmul.f32 %v6612_v46, %v6612_v46 }
 0x519   : > { %v3609_v50 = vpop.f32.mrb[44].mxu0  ;;  %3043 = vadd.xlane.f32.xlu0 %v3023_v52  ;;  %v3024_v54 = vmul.f32 %v6615_v22, %v6615_v22 }
 0x51a   : > { %v3610_v7 = vpop.f32.mrb[45].mxu0 }
 0x51b   : > { %v3611_v6 = vadd.f32 %v3610_v7, %v3609_v50  ;;  %v3612_v10 = vpop.f32.mrb[46].mxu0  ;;  %3045 = vadd.xlane.f32.xlu1 %v3024_v54 }
 0x51c   : > { %v3613_v28 = vpop.f32.mrb[47].mxu0  ;;  %v3627_v42 = vpop.f32.mrb[32].mxu1 }
 0x51d   : > { %v6622_v29 = vadd.f32 %v3611_v6, %v6589_v11  ;;  %v3614_v18 = vadd.f32 %v3613_v28, %v3612_v10  ;;  %v3628_v51 = vpop.f32.mrb[33].mxu1 }
 0x51e   : > { %v3629_v23 = vadd.f32 %v3628_v51, %v3627_v42  ;;  %v3630_v38 = vpop.f32.mrb[34].mxu1 }
 0x51f   : > { %v6625_v41 = vadd.f32 %v3614_v18, %v6589_v11  ;;  %v3025_v16 = vmul.f32 %v6622_v29, %v6622_v29  ;;  %v3631_v35 = vpop.f32.mrb[35].mxu1 }
 0x520   : > { %v3632_v14 = vadd.f32 %v3631_v35, %v3630_v38  ;;  %v6645_v19 = vadd.f32 %v3629_v23, %v6589_v11 }
 0x521   : > { %v3615_v17 = vpop.f32.mrb[48].mxu0  ;;  %3047 = vadd.xlane.f32.xlu0 %v3025_v16  ;;  %v3026_v24 = vmul.f32 %v6625_v41, %v6625_v41 }
 0x522   : > { %v3616_v9 = vpop.f32.mrb[49].mxu0  ;;  %v6653_v32 = vadd.f32 %v3632_v14, %v6589_v11  ;;  %v3031_v60 = vmul.f32 %v6645_v19, %v6645_v19 }
 0x523   : > { %v3617_v4 = vadd.f32 %v3616_v9, %v3615_v17  ;;  %v3618_v1 = vpop.f32.mrb[50].mxu0  ;;  %3049 = vadd.xlane.f32.xlu1 %v3026_v24 }
 0x524   : > { %v3619_v56 = vpop.f32.mrb[51].mxu0  ;;  %v3032_v31 = vmul.f32 %v6653_v32, %v6653_v32 }
 0x525   : > { %v6632_v48 = vadd.f32 %v3617_v4, %v6589_v11  ;;  %v3620_v5 = vadd.f32 %v3619_v56, %v3618_v1 }
 0x527   : > { %v6635_v2 = vadd.f32 %v3620_v5, %v6589_v11  ;;  %v3027_v59 = vmul.f32 %v6632_v48, %v6632_v48 }
 0x529   : > { %v3621_v62 = vpop.f32.mrb[52].mxu0  ;;  %3051 = vadd.xlane.f32.xlu0 %v3027_v59  ;;  %v3028_v12 = vmul.f32 %v6635_v2, %v6635_v2 }
 0x52a   : > { %v3622_v53 = vpop.f32.mrb[53].mxu0 }
 0x52b   : > { %v3623_v30 = vadd.f32 %v3622_v53, %v3621_v62  ;;  %v3624_v27 = vpop.f32.mrb[54].mxu0  ;;  %3053 = vadd.xlane.f32.xlu1 %v3028_v12 }
 0x52c   : > { %v3625_v40 = vpop.f32.mrb[55].mxu0 }
 0x52d   : > { %v6642_v36 = vadd.f32 %v3623_v30, %v6589_v11  ;;  %v3626_v34 = vadd.f32 %v3625_v40, %v3624_v27 }
 0x52f   : > { %v6648_v45 = vadd.f32 %v3626_v34, %v6589_v11  ;;  %v3029_v43 = vmul.f32 %v6642_v36, %v6642_v36 }
 0x531   : > { %3055 = vadd.xlane.f32.xlu0 %v3029_v43  ;;  %v3030_v20 = vmul.f32 %v6648_v45, %v6648_v45 }
 0x533   : > { %3057 = vadd.xlane.f32.xlu1 %v3030_v20 }
 0x535   : > { %v3633_v63 = vpop.f32.mrb[36].mxu1  ;;  %3059 = vadd.xlane.f32.xlu0 %v3031_v60 }
 0x536   : > { %v3634_v8 = vpop.f32.mrb[37].mxu1 }
 0x537   : > { %v3635_v13 = vadd.f32 %v3634_v8, %v3633_v63  ;;  %v3636_v61 = vpop.f32.mrb[38].mxu1  ;;  %3061 = vadd.xlane.f32.xlu1 %v3032_v31 }
 0x538   : > { %v3637_v58 = vpop.f32.mrb[39].mxu1 }
 0x539   : > { %v6662_v0 = vadd.f32 %v3635_v13, %v6589_v11  ;;  %v3638_v15 = vadd.f32 %v3637_v58, %v3636_v61 }
 0x53b   : > { %v6665_v25 = vadd.f32 %v3638_v15, %v6589_v11  ;;  %v3033_v55 = vmul.f32 %v6662_v0, %v6662_v0 }
 0x53d   : > { %3063 = vadd.xlane.f32.xlu0 %v3033_v55  ;;  %v3034_v49 = vmul.f32 %v6665_v25, %v6665_v25 }
 0x53f   : > { %3065 = vadd.xlane.f32.xlu1 %v3034_v49 }
 0x58c   : > { %v3036_v33 = vpop.xlane.xlu0 %3035 }
 0x58d   : > { %v3067_v44 = vmax.f32 %v3036_v33, 1e-24 }
 0x58f   : > { %4243 = vrsqrt.f32 %v3067_v44 }
 0x590   : > { %v3038_v37 = vpop.xlane.xlu0 %3037 }
 0x591   : > { %v3068_v39 = vmax.f32 %v3038_v37, 1e-24 }
 0x593   : > { %4245 = vrsqrt.f32 %v3068_v39 }
 0x599   : > { %v4244_v21 = vpop.eup %4243 }
 0x59a   : > { %v3099_v50 = vmul.f32 %v4244_v21, %v6592_v47 }
 0x59d   : > { %v4246_v52 = vpop.eup %4245 }
 0x59e   : > { %v3100_v11 = vmul.f32 %v4246_v52, %v6595_v57  ;;  %v3040_v54 = vpop.xlane.xlu1 %3039 }
 0x59f   : > { %v3069_v6 = vmax.f32 %v3040_v54, 1e-24 }
 0x5a0   : > { %v3115_v7 = vpack.c.bf16 %v3100_v11, %v3099_v50 }
 0x5a1   : > { %4247 = vrsqrt.f32 %v3069_v6 }
 0x5a2   : > { %3123 = vst [vmem:[#allocation2] sm:$0xff] %v3115_v7  ;;  %v3042_v10 = vpop.xlane.xlu1 %3041 }
 0x5a3   : > { %v3070_v28 = vmax.f32 %v3042_v10, 1e-24 }
 0x5a5   : > { %4249 = vrsqrt.f32 %v3070_v28 }
 0x5a6   : > { %v3044_v42 = vpop.xlane.xlu0 %3043 }
 0x5a7   : > { %v3071_v18 = vmax.f32 %v3044_v42, 1e-24 }
 0x5a8   : > { %v3046_v51 = vpop.xlane.xlu1 %3045 }
 0x5a9   : > { %4251 = vrsqrt.f32 %v3071_v18  ;;  %v3072_v23 = vmax.f32 %v3046_v51, 1e-24 }
 0x5ab   : > { %4253 = vrsqrt.f32 %v3072_v23  ;;  %v4248_v38 = vpop.eup %4247 }
 0x5ac   : > { %v3101_v57 = vmul.f32 %v4248_v38, %v6602_v26 }
 0x5ae   : > { %v3048_v16 = vpop.xlane.xlu0 %3047 }
 0x5af   : > { %v4250_v35 = vpop.eup %4249  ;;  %v3073_v47 = vmax.f32 %v3048_v16, 1e-24 }
 0x5b0   : > { %v3102_v14 = vmul.f32 %v4250_v35, %v6605_v3  ;;  %v3050_v17 = vpop.xlane.xlu1 %3049 }
 0x5b1   : > { %4255 = vrsqrt.f32 %v3073_v47  ;;  %v3074_v24 = vmax.f32 %v3050_v17, 1e-24 }
 0x5b2   : > { %v3116_v9 = vpack.c.bf16 %v3102_v14, %v3101_v57 }
 0x5b3   : > { %v4252_v4 = vpop.eup %4251  ;;  %4257 = vrsqrt.f32 %v3074_v24 }
 0x5b4   : > { %3124 = vst [vmem:[#allocation2 + $0x8] sm:$0xff] %v3116_v9  ;;  %v3103_v56 = vmul.f32 %v4252_v4, %v6612_v46 }
 0x5b5   : > { %v4254_v1 = vpop.eup %4253 }
 0x5b6   : > { %v3104_v5 = vmul.f32 %v4254_v1, %v6615_v22  ;;  %v3052_v59 = vpop.xlane.xlu0 %3051 }
 0x5b7   : > { %v3075_v62 = vmax.f32 %v3052_v59, 1e-24 }
 0x5b8   : > { %v3117_v12 = vpack.c.bf16 %v3104_v5, %v3103_v56  ;;  %v3054_v53 = vpop.xlane.xlu1 %3053 }
 0x5b9   : > { %4259 = vrsqrt.f32 %v3075_v62  ;;  %v3076_v26 = vmax.f32 %v3054_v53, 1e-24 }
 0x5ba   : > { %3125 = vst [vmem:[#allocation2 + $0x10] sm:$0xff] %v3117_v12 }
 0x5bb   : > { %v4256_v3 = vpop.eup %4255  ;;  %4261 = vrsqrt.f32 %v3076_v26 }
 0x5bc   : > { %v3105_v27 = vmul.f32 %v4256_v3, %v6622_v29 }
 0x5bd   : > { %v4258_v30 = vpop.eup %4257 }
 0x5be   : > { %v3106_v40 = vmul.f32 %v4258_v30, %v6625_v41  ;;  %v3056_v34 = vpop.xlane.xlu0 %3055 }
 0x5bf   : > { %v3077_v43 = vmax.f32 %v3056_v34, 1e-24 }
 0x5c0   : > { %v3118_v20 = vpack.c.bf16 %v3106_v40, %v3105_v27  ;;  %v3058_v46 = vpop.xlane.xlu1 %3057 }
 0x5c1   : > { %4263 = vrsqrt.f32 %v3077_v43  ;;  %v3078_v22 = vmax.f32 %v3058_v46, 1e-24 }
 0x5c2   : > { %3126 = vst [vmem:[#allocation2 + $0x18] sm:$0xff] %v3118_v20  ;;  %v3060_v60 = vpop.xlane.xlu0 %3059 }
 0x5c3   : > { %v4260_v31 = vpop.eup %4259  ;;  %4265 = vrsqrt.f32 %v3078_v22  ;;  %v3079_v63 = vmax.f32 %v3060_v60, 1e-24 }
 0x5c4   : > { %v3062_v8 = vpop.xlane.xlu1 %3061  ;;  %v3107_v58 = vmul.f32 %v4260_v31, %v6632_v48 }
 0x5c5   : > { %v4262_v13 = vpop.eup %4261  ;;  %4267 = vrsqrt.f32 %v3079_v63  ;;  %v3080_v61 = vmax.f32 %v3062_v8, 1e-24 }
 0x5c6   : > { %v3108_v29 = vmul.f32 %v4262_v13, %v6635_v2 }
 0x5c7   : > { %4269 = vrsqrt.f32 %v3080_v61 }
 0x5c8   : > { %v3119_v41 = vpack.c.bf16 %v3108_v29, %v3107_v58 }
 0x5ca   : > { %3127 = vst [vmem:[#allocation2 + $0x20] sm:$0xff] %v3119_v41  ;;  %v3064_v15 = vpop.xlane.xlu0 %3063 }
 0x5cb   : > { %v4264_v55 = vpop.eup %4263  ;;  %v3081_v49 = vmax.f32 %v3064_v15, 1e-24 }
 0x5cc   : > { %v3066_v33 = vpop.xlane.xlu1 %3065  ;;  %v3109_v39 = vmul.f32 %v4264_v55, %v6642_v36 }
 0x5cd   : > { %v4266_v44 = vpop.eup %4265  ;;  %4271 = vrsqrt.f32 %v3081_v49  ;;  %v3082_v37 = vmax.f32 %v3066_v33, 1e-24 }
 0x5ce   : > { %v3110_v21 = vmul.f32 %v4266_v44, %v6648_v45 }
 0x5cf   : > { %v4268_v52 = vpop.eup %4267  ;;  %4273 = vrsqrt.f32 %v3082_v37 }
 0x5d0   : > { %v3120_v50 = vpack.c.bf16 %v3110_v21, %v3109_v39  ;;  %v3111_v2 = vmul.f32 %v4268_v52, %v6645_v19 }
 0x5d1   : > { %v4270_v48 = vpop.eup %4269 }
 0x5d2   : > { %3128 = vst [vmem:[#allocation2 + $0x28] sm:$0xff] %v3120_v50  ;;  %v3112_v11 = vmul.f32 %v4270_v48, %v6653_v32 }
 0x5d4   : > { %v3121_v54 = vpack.c.bf16 %v3112_v11, %v3111_v2 }
 0x5d6   : > { %3129 = vst [vmem:[#allocation2 + $0x30] sm:$0xff] %v3121_v54 }
 0x5d7   : > { %v4272_v7 = vpop.eup %4271 }
 0x5d8   : > { %v3113_v10 = vmul.f32 %v4272_v7, %v6662_v0 }
 0x5d9   : > { %v4274_v6 = vpop.eup %4273 }
 0x5da   : > { %v3114_v28 = vmul.f32 %v4274_v6, %v6665_v25 }
 0x5dc   : > { %v3122_v36 = vpack.c.bf16 %v3114_v28, %v3113_v10 }
 0x5de   : > { %3130 = vst [vmem:[#allocation2 + $0x38] sm:$0xff] %v3122_v36 }
 0x5df PF: > { %v4275_v45 = vld [vmem:[%s4977_s27] sm:$0xff]   ;;  %v4276_v42 = vld [vmem:[%s4977_s27 + $0x8] sm:$0xff]   ;;  %v4277_v19 = vld [vmem:[%s4977_s27 + $0x10] sm:$0xff]   ;;  %s7032_s30 = sld [smem:[#allocation22_spill]]  ;;  %s7033_s25 = sld [smem:[#allocation21_spill]] }
 0x5e0   : > { %3655 = vmatprep.subr.bf16.mxu0 %v4275_v45  ;;  %3703 = vmatprep.subr.bf16.mxu1 %v4275_v45  ;;  %v4278_v32 = vld [vmem:[%s4977_s27 + $0x18] sm:$0xff]   ;;  %v3131_v0 = vld [vmem:[#allocation2] sm:$0xff]  ;;  %v4280_v51 = vld [vmem:[%s4977_s27 + $0x28] sm:$0xff]   ;;  %s7034_s19 = sld [smem:[#allocation70_spill]]  ;;  %s7036_s15 = sld [smem:[#allocation26_spill]] }
 0x5e1   : > { %3656 = vmatpush3.bf16.msra.mxu0 %v4275_v45  ;;  %3711 = vmatpush3.bf16.msra.mxu1 %v4275_v45  ;;  %v3135_v25 = vld [vmem:[#allocation2 + $0x20] sm:$0xff]  ;;  %v4281_v23 = vld [vmem:[%s4977_s27 + $0x30] sm:$0xff]   ;;  %v4282_v38 = vld [vmem:[%s4977_s27 + $0x38] sm:$0xff]   ;;  %s6723_s28 = scalar_lea.sflag [#allocation5], %s415_s4  ;;  %s4598_s21 = smov [#allocation12]  }
 0x5e2   : > { %3657 = vmatprep.subr.bf16.mxu0 %v4276_v42  ;;  %3704 = vmatprep.subr.bf16.mxu1 %v4276_v42  ;;  %v4279_v18 = vld [vmem:[%s4977_s27 + $0x20] sm:$0xff]   ;;  %v3132_v16 = vld [vmem:[#allocation2 + $0x8] sm:$0xff]  ;;  %v3133_v47 = vld [vmem:[#allocation2 + $0x10] sm:$0xff]  ;;  %s3332_s27 = sshll.u32 %s4986_s8, 4  ;;  %s4431_s23 = sshll.u32 %s4598_s21, 4  ;;  %s6713_s27 = int_to_ptr.vmem [resolvable:$true] %s3332_s27  ;;  %s4432_s23 = int_to_ptr.vmem [resolvable:$false] %s4431_s23 }
 0x5e3   : > { %3671 = vmatprep.mubr.bf16.mxu0 %v3131_v0  ;;  %3679 = vmatprep.mubr.bf16.mxu1 %v3135_v25  ;;  %v3136_v35 = vld [vmem:[#allocation2 + $0x28] sm:$0xff]  ;;  %v3137_v57 = vld [vmem:[#allocation2 + $0x30] sm:$0xff]  ;;  %v3134_v14 = vld [vmem:[#allocation2 + $0x18] sm:$0xff]  ;;  %s4427_s11 = scalar_lea.vmem %s6713_s27, 2048  ;;  %s4433_s0 = scalar_lea.vmem %s4432_s23, 4096 }
 0x5e4   : > { %p4428_p12 = scmp.ne.s32.totalorder %s6713_s27, %s4427_s11  ;;  %p4434_p10 = scmp.lt.s32.totalorder %s6713_s27, %s4432_s23 }
 0x5e5   : > { %3658 = vmatpush3.bf16.msra.mxu0 %v4276_v42  ;;  %3712 = vmatpush3.bf16.msra.mxu1 %v4276_v42  ;;  %v3138_v17 = vld [vmem:[#allocation2 + $0x38] sm:$0xff]  ;;  %s3719_s9 = smul.u32 48, %s7032_s30  ;;  %p4435_p9 = scmp.lt.s32.totalorder %s4433_s0, %s4427_s11 }
 0x5e6   : > { %3659 = vmatprep.subr.bf16.mxu0 %v4277_v19  ;;  %3705 = vmatprep.subr.bf16.mxu1 %v4277_v19  ;;  %p7037_p0 = scmp.ne.s32.totalorder %s7036_s15, 0 }
 0x5e7   : > { %s3329_s22 = sadd.s32 %s7033_s25, %s3719_s9  ;;  %p4436_p1 = por %p4435_p9, %p4434_p10 }
 0x5e8   : > { %s3571_s17 = sshll.u32 %s3329_s22, 7  ;;  %p4429_p8 = pnand %p4428_p12, %p7037_p0 }
 0x5e9   : > { %3660 = vmatpush3.bf16.msra.mxu0 %v4277_v19  ;;  %3713 = vmatpush3.bf16.msra.mxu1 %v4277_v19  ;;  %s6709_s20 = scalar_lea.hbm %s7034_s19, %s3571_s17 }
 0x5ea   : > { %3661 = vmatprep.subr.bf16.mxu0 %v4278_v32  ;;  %3706 = vmatprep.subr.bf16.mxu1 %v4278_v32  ;;  %p4430_p7 = pneg %p4429_p8 }
 0x5ec   : > { %p4437_p4 = pnand %p4436_p1, %p4430_p7 }
 0x5ed   : > { %3662 = vmatpush3.bf16.msra.mxu0 %v4278_v32  ;;  %3714 = vmatpush3.bf16.msra.mxu1 %v4278_v32 }
 0x5ee   : > { %3663 = vmatprep.subr.bf16.mxu0 %v4279_v18  ;;  %3707 = vmatprep.subr.bf16.mxu1 %v4279_v18 }
 0x5f1   : > { %3664 = vmatpush3.bf16.msra.mxu0 %v4279_v18  ;;  %3715 = vmatpush3.bf16.msra.mxu1 %v4279_v18 }
 0x5f2   : > { %3665 = vmatprep.subr.bf16.mxu0 %v4280_v51  ;;  %3708 = vmatprep.subr.bf16.mxu1 %v4280_v51 }
 0x5f5   : > { %3666 = vmatpush3.bf16.msra.mxu0 %v4280_v51  ;;  %3716 = vmatpush3.bf16.msra.mxu1 %v4280_v51 }
 0x5f6   : > { %3667 = vmatprep.subr.bf16.mxu0 %v4281_v23  ;;  %3709 = vmatprep.subr.bf16.mxu1 %v4281_v23 }
 0x5f9   : > { %3668 = vmatpush3.bf16.msra.mxu0 %v4281_v23  ;;  %3717 = vmatpush3.bf16.msra.mxu1 %v4281_v23 }
 0x5fa   : > { %3669 = vmatprep.subr.bf16.mxu0 %v4282_v38  ;;  %3710 = vmatprep.subr.bf16.mxu1 %v4282_v38 }
 0x5fd   : > { %3670 = vmatpush3.bf16.msra.mxu0 %v4282_v38  ;;  %3718 = vmatpush3.bf16.msra.mxu1 %v4282_v38 }
 0x600   : > { %3672 = vmatmul.mubr.bf16.vlgmr.msra.gmra.mrb[0].mxu0 %v3132_v16  ;;  %3680 = vmatmul.mubr.bf16.vlgmr.msra.gmra.mrb[0].mxu1 %v3136_v35 }
 0x601   : > { %3675 = vmatprep.mubr.bf16.mxu0 %v3133_v47  ;;  %3683 = vmatprep.mubr.bf16.mxu1 %v3137_v57 }
 0x608   : > { %3676 = vmatmul.mubr.bf16.gmra.mrb[4].mxu0 %v3134_v14  ;;  %3684 = vmatmul.mubr.bf16.gmra.mrb[4].mxu1 %v3138_v17 }
 0x6d3   : > { %v3673_v24 = vpop.f32.mrb[0].mxu0  ;;  %v3681_v9 = vpop.f32.mrb[0].mxu1 }
 0x6d4   : > { %3302 = vst [vmem:[%s4986_s8 + $0x10] sm:$0xff] %v3673_v24  ;;  %3310 = vst [vmem:[%s4986_s8 + $0x50] sm:$0xff] %v3681_v9  ;;  %v3237_v4 = vpop.f32.mrb[1].mxu0  ;;  %v3269_v1 = vpop.f32.mrb[1].mxu1 }
 0x6d5   : > { %3300 = vst [vmem:[%s4986_s8] sm:$0xff] %v3237_v4  ;;  %3308 = vst [vmem:[%s4986_s8 + $0x40] sm:$0xff] %v3269_v1  ;;  %v3674_v56 = vpop.f32.mrb[2].mxu0  ;;  %v3682_v5 = vpop.f32.mrb[2].mxu1 }
 0x6d6   : > { %3303 = vst [vmem:[%s4986_s8 + $0x18] sm:$0xff] %v3674_v56  ;;  %3311 = vst [vmem:[%s4986_s8 + $0x58] sm:$0xff] %v3682_v5  ;;  %v3240_v59 = vpop.f32.mrb[3].mxu0  ;;  %v3272_v62 = vpop.f32.mrb[3].mxu1 }
 0x6d7   : > { %3301 = vst [vmem:[%s4986_s8 + $0x8] sm:$0xff] %v3240_v59  ;;  %3309 = vst [vmem:[%s4986_s8 + $0x48] sm:$0xff] %v3272_v62 }
 0x6db   : > { %v3677_v12 = vpop.f32.mrb[4].mxu0  ;;  %v3685_v53 = vpop.f32.mrb[4].mxu1 }
 0x6dc   : > { %3306 = vst [vmem:[%s4986_s8 + $0x30] sm:$0xff] %v3677_v12  ;;  %3314 = vst [vmem:[%s4986_s8 + $0x70] sm:$0xff] %v3685_v53  ;;  %v3253_v26 = vpop.f32.mrb[5].mxu0  ;;  %v3285_v3 = vpop.f32.mrb[5].mxu1 }
 0x6dd   : > { %3304 = vst [vmem:[%s4986_s8 + $0x20] sm:$0xff] %v3253_v26  ;;  %3312 = vst [vmem:[%s4986_s8 + $0x60] sm:$0xff] %v3285_v3  ;;  %v3678_v30 = vpop.f32.mrb[6].mxu0  ;;  %v3686_v27 = vpop.f32.mrb[6].mxu1 }
 0x6de   : > { %3307 = vst [vmem:[%s4986_s8 + $0x38] sm:$0xff] %v3678_v30  ;;  %3315 = vst [vmem:[%s4986_s8 + $0x78] sm:$0xff] %v3686_v27  ;;  %v3256_v40 = vpop.f32.mrb[7].mxu0  ;;  %v3288_v34 = vpop.f32.mrb[7].mxu1 }
 0x6df   : > { %3305 = vst [vmem:[%s4986_s8 + $0x28] sm:$0xff] %v3256_v40  ;;  %3313 = vst [vmem:[%s4986_s8 + $0x68] sm:$0xff] %v3288_v34 }
 0x6e0   : > { %4440 = shalt.err (!%p4437_p4)
}
 0x6e1   : > { %s4441_s4 = scalar_lea.hbm %s6709_s20, 2048  ;;  %s4445_s30 = scalar_lea.hbm %s7034_s19, 12288 }
 0x6e2   : > { %p4442_p3 = scmp.ne.s32.totalorder %s6709_s20, %s4441_s4  ;;  %p4446_p13 = scmp.lt.u32.totalorder %s6709_s20, %s7034_s19 }
 0x6e3   : > { %p4447_p2 = scmp.lt.u32.totalorder %s4445_s30, %s4441_s4  ;;  %p4449_p12 = scmp.lt.u32.totalorder %s4441_s4, %s6709_s20 }
 0x6e4   : > { %p4443_p5 = pnand %p4442_p3, %p7037_p0 }
 0x6e5   : > { %p4448_p6 = por %p4447_p2, %p4446_p13 }
 0x6e6   : > { %p4444_p11 = pneg %p4443_p5 }
 0x6e7   : > { %p4450_p8 = por %p4449_p12, %p4448_p6 }
 0x6e9   : > { %p4451_p7 = pnand %p4450_p8, %p4444_p11 }
 0x6eb   : > { %4454 = shalt.err (!%p4451_p7)
}
 0x6ec   : > { %s4599_s22 = smov 128   ;;  %s4600_s17 = smov 384  }
 0x6ed   : > { %s4601_s6 = smov 8  }
 0x6ee   : > { %3736 = dma.vmem_to_hbm [thread:$0]  (%p7037_p0), %s6713_s27, 2048, %s6709_s20, %s6723_s28, %s4599_s22, %s4600_s17, %s4601_s6  }
 0x6ef PF: > { %s7038_s24 = sld [smem:[#allocation18_spill]]  ;;  %s7039_s26 = sld [smem:[#allocation27_spill]] }
 0x6f0   : > { %p3766_p10 = scmp.ge.s32.totalorder %s4585_s18, 2 }
 0x6f5   : > { %s3347_s11 = sand.u32 1, %s7038_s24   ;;  %p7040_p9 = scmp.ne.s32.totalorder %s7039_s26, 0 }
 0x6f6   : > { %s3348_s21 = scalar_lea.sflag [#allocation5], %s3347_s11 }
 0x6f7   : > { %p3756_p1 = pnand %p3766_p10, %p7040_p9 }
 0x6f9   : > { %4528 = dma.done.wait (!%p3756_p1), %s3348_s21, 2048  }
 0x6fa   : > { %4530 = vsyncadd (!%p3756_p1), %s3348_s21, 4294965248  ;;  %s26_s18 = sadd.s32 1, %s4585_s18   ;;  %s7042_s27 = sld [smem:[#allocation19_spill]] }
 0x6fb   : > { %p6752_p4 = scmp.ge.s32.totalorder %s26_s18, 8   ;;  %s7043_s30 = sld [smem:[#allocation20_spill]] }
 0x6fc   : > { %s7044_s20 = sld [smem:[#allocation30_spill]]  ;;  %s7045_s15 = sld [smem:[#allocation23_spill]] }
 0x6fd   : > { %s7046_s0 = sld [smem:[#allocation28_spill]]  ;;  %s7047_s17 = sld [smem:[#allocation29_spill]] }
 0x6fe   : > { %s7048_s28 = smov %s4541_s29  ;;  %s7049_s29 = smov %s4823_s14 }
 0x6ff   : > { %s7050_s9 = smov %s4553_s10  ;;  %s7052_s11 = smov %s4561_s12 }
 0x700   : > { %s7053_s12 = smov %s4565_s13  ;;  %s7054_s13 = smov %s4820_s2 }
 0x701   : > { %s7055_s14 = smov %s4577_s16  ;;  %25 = sbr.rel (!%p6752_p4) target bundleno = 19 (0x13), region = 124 }
 0x702   : > { %s7051_s10 = smov %s7044_s20 }
 0x703   : > { %s7056_s16 = smov %s7046_s0 }
 0x708   :  { %3353 = vsyncpa [#allocation4], 1 }
 0x709   :  { %3355 = vsyncpa [#allocation4 + $0x1], 1 }
 0x70a   :  { %3356 = vsyncpa [#allocation7], 1 }
 0x70b   :  { %3357 = vsyncpa [#allocation10], 1 }
 0x70c   :  { %3358 = vsyncpa [#allocation5], 1 }
 0x70d   :  { %3360 = vsyncpa [#allocation5 + $0x1], 1 }

</bundles_post_ra>
